<compile_context>
chip_gen: v7x
topology: tpu7x:2x2x1
jax: 0.10.0
libtpu: 0.0.40
codegen_flags: <defaults>
</compile_context>

<pallas_src>
import numpy as np
import jax
import jax.numpy as jnp
from jax.experimental import pallas as pl
from jax.experimental.pallas import tpu as pltpu

# ----------------- model sizes (small, TPU-tile friendly) -----------------
D_WORD = 128        # hparams.d_word_vec
D_MODEL = 128       # hparams.d_model (per-direction LSTM hidden)
LATENT_N = 128      # rows of pretrained_trg_emb ("latent")
BATCH = 8
MAX_LEN = 8
PAD_ID = 0
EMB_VOCAB = 2001    # nn.Embedding(2001, d_word_vec) in shareEmb
MASK_TH = 2000      # ids >= 2000 are routed through the latent-attention ctx
PRETRAIN_VOCAB = 2048
TEMP = 0.05


# ----------------------------- Pallas kernel -------------------------------
def uni_encoder_kernel(lens_ref, pre_ref, embg_ref, gate_ref,
                       wal_ref, lat_ref,
                       wih_ref, whhf_ref, whhb_ref, bias_ref, wbr_ref,
                       enc_ref, cell_ref, state_ref,
                       gx_ref):
    f32 = jnp.float32
    bf16 = jnp.bfloat16
    T, B, twoH = enc_ref.shape
    H = twoH // 2

    # ---------------- shareEmb: latent attention + table mix ----------------
    # A (bias-free Linear) is pre-folded into the latent projection:
    #   softmax((pe @ A^T) @ latent^T / temp) == softmax(pe @ W_AL / temp)
    pe = pre_ref[...].astype(bf16)                                   # [T*B, D]
    s = jnp.dot(pe, wal_ref[...], preferred_element_type=f32) * (1.0 / TEMP)
    s = s - jnp.max(s, axis=-1, keepdims=True)                       # [T*B, L]
    p = jnp.exp(s)
    attn = p * pl.reciprocal(jnp.sum(p, axis=-1, keepdims=True), approx=True)
    ctx = jnp.dot(attn.astype(bf16), lat_ref[...], preferred_element_type=f32)
    word_emb = ctx * gate_ref[...] + embg_ref[...]                   # [T*B, D]
    # nn.Dropout(): identity (eval mode, dropout=0.0)

    # -------- hoisted input projection: both directions, all timesteps ------
    gx_ref[...] = jnp.dot(word_emb.astype(bf16), wih_ref[...],
                          preferred_element_type=f32) + bias_ref[...]

    # packed-sequence masks, hoisted out of the recurrence (depend only on lens)
    lens = lens_ref[...]                                             # [B,1] i32
    masks = [t < lens for t in range(T)]                             # T x [B,1]

    def lstm_elem(g, c):
        # PyTorch gate order: i, f, g, o
        i = jax.nn.sigmoid(g[:, 0 * H:1 * H])
        f = jax.nn.sigmoid(g[:, 1 * H:2 * H])
        gg = jnp.tanh(g[:, 2 * H:3 * H])
        o = jax.nn.sigmoid(g[:, 3 * H:4 * H])
        c_new = f * c + i * gg                                       # f32 cell
        h_new = (o * jnp.tanh(c_new)).astype(bf16)                   # bf16 state
        return h_new, c_new

    h_f = jnp.zeros((B, H), bf16)
    c_f = jnp.zeros((B, H), f32)
    h_b = jnp.zeros((B, H), bf16)
    c_b = jnp.zeros((B, H), f32)
    pad = jnp.bfloat16(PAD_ID)

    # Statically unrolled time loop (T=8); keeps every ref index static.  Per
    # step: two small dense MXU dots (one per direction, half the weight tiles
    # of the old block-diagonal form on v5e) plus a few vregs of VPU/EUP math.
    for t in range(T):
        tb = T - 1 - t                     # backward direction time index
        rec_f = jnp.dot(h_f, whhf_ref[...], preferred_element_type=f32)
        rec_b = jnp.dot(h_b, whhb_ref[...], preferred_element_type=f32)
        g_f = gx_ref[t * B:(t + 1) * B, 0:4 * H] + rec_f
        g_b = gx_ref[tb * B:(tb + 1) * B, 4 * H:8 * H] + rec_b
        hf_n, cf_n = lstm_elem(g_f, c_f)
        hb_n, cb_n = lstm_elem(g_b, c_b)
        # packed-sequence semantics: freeze state outside the valid range
        m_f = masks[t]
        m_b = masks[tb]
        h_f = jnp.where(m_f, hf_n, h_f)
        c_f = jnp.where(m_f, cf_n, c_f)
        h_b = jnp.where(m_b, hb_n, h_b)
        c_b = jnp.where(m_b, cb_n, c_b)
        # lane-dense (128-wide, 128-aligned) stores straight into [T, B, 2H]
        enc_ref[t, :, 0:H] = jnp.where(m_f, h_f, pad).astype(f32)
        enc_ref[tb, :, H:2 * H] = jnp.where(m_b, h_b, pad).astype(f32)

    # ------------------------ bridge epilogue (fused) ------------------------
    c_cat = jnp.concatenate([c_f, c_b], axis=1).astype(bf16)         # [B, 2H]
    cell = jnp.dot(c_cat, wbr_ref[...], preferred_element_type=f32)  # [B, H]
    cell_ref[...] = cell
    state_ref[...] = jnp.tanh(cell)


# ------------------------------ wrappers -----------------------------------
def uni_encoder_pallas(lens2d, pre, embg, gate, wal, lat,
                       wih_all, whh_f, whh_b, b_all, wbr_t,
                       *, T, B, H, D, L):
    def full(shape):
        return pl.BlockSpec(shape, lambda i, _s=shape: (0,) * len(_s))

    return pl.pallas_call(
        uni_encoder_kernel,
        out_shape=(
            jax.ShapeDtypeStruct((T, B, 2 * H), jnp.float32),   # enc (time-major)
            jax.ShapeDtypeStruct((B, H), jnp.float32),          # dec_init_cell
            jax.ShapeDtypeStruct((B, H), jnp.float32),          # dec_init_state
        ),
        grid=(1,),
        in_specs=[
            full((B, 1)),               # lengths
            full((T * B, D)),           # pretrained emb rows (time-major flat)
            full((T * B, D)),           # trainable emb rows (masked ids)
            full((T * B, 1)),           # ctx gate = float(x >= 2000)
            full((D, L)),               # W_AL = A^T @ latent^T       (bf16)
            full((L, D)),               # latent                      (bf16)
            full((D, 8 * H)),           # [Wih_f^T | Wih_b^T]         (bf16)
            full((H, 4 * H)),           # Whh_f^T                     (bf16)
            full((H, 4 * H)),           # Whh_b^T                     (bf16)
            full((1, 8 * H)),           # combined biases [b_f | b_b]  (f32)
            full((2 * H, H)),           # bridge.weight^T             (bf16)
        ],
        out_specs=(full((T, B, 2 * H)), full((B, H)), full((B, H))),
        scratch_shapes=[pltpu.VMEM((T * B, 8 * H), jnp.float32)],   # hoisted gx
        compiler_params=pltpu.CompilerParams(
            dimension_semantics=("arbitrary",)),
    )(lens2d, pre, embg, gate, wal, lat, wih_all, whh_f, whh_b, b_all, wbr_t)


def pack_params(params):
    """One-time weight packing OUTSIDE the jitted forward (run once).

    Produces kernel-ready (transposed / fused / bf16) arrays so the per-call
    jit does no weight reshuffling or casting.
    """
    bf16 = jnp.bfloat16
    H = D_MODEL
    # fold the bias-free Linear A into the latent projection (f32, cast once)
    w_al = (params["w_A"].T @ params["latent"].T).astype(bf16)        # [D, L]
    return {
        "pre_emb": params["pre_emb"],                                 # f32 gather table
        "emb": params["emb"],                                         # f32 gather table
        "wal": w_al,
        "lat": params["latent"].astype(bf16),                         # [L, D]
        "wih": jnp.concatenate([params["wih_f"].T, params["wih_b"].T],
                               axis=1).astype(bf16),                  # [D, 8H]
        "whh_f": params["whh_f"].T.astype(bf16),                      # [H, 4H]
        "whh_b": params["whh_b"].T.astype(bf16),                      # [H, 4H]
        "bias": jnp.concatenate([params["b_f"], params["b_b"]]
                                ).reshape(1, 8 * H).astype(jnp.float32),
        "wbr": params["w_bridge"].T.astype(bf16),                     # [2H, H]
    }


@jax.jit
def encoder_forward(packed, x_train, x_len):
    """Mirrors uniEncoder.forward with file_idx=[0]. x_train: [B,T] int32."""
    B, T = x_train.shape
    D, H = D_WORD, D_MODEL
    L = packed["lat"].shape[0]

    # shared_emb(x_train) inputs; gathers stay as XLA glue (dynamic row gather)
    ids = x_train.T.reshape(-1)                                   # [T*B] (time-major)
    pre = jnp.take(packed["pre_emb"], ids, axis=0)                # frozen table
    keep = ids < MASK_TH                                          # mask = (x < 2000)
    embg = jnp.take(packed["emb"], jnp.where(keep, ids, 0), axis=0)
    gate = (1.0 - keep.astype(jnp.float32)).reshape(-1, 1)        # ctx * (1-mask)
    lens2d = x_len.reshape(B, 1).astype(jnp.int32)

    enc_tm, dec_cell, dec_state = uni_encoder_pallas(
        lens2d, pre, embg, gate,
        packed["wal"], packed["lat"], packed["wih"],
        packed["whh_f"], packed["whh_b"], packed["bias"], packed["wbr"],
        T=T, B=B, H=H, D=D, L=L)
    enc_output = jnp.transpose(enc_tm, (1, 0, 2))                 # [B, T, 2H]
    return enc_output, (dec_state, dec_cell)


# ------------------------- pure-JAX reference ------------------------------
def _lstm_cell_ref(x, h, c, wih, whh, b):
    gates = x @ wih.T + h @ whh.T + b
    i, f, g, o = jnp.split(gates, 4, axis=-1)
    c = jax.nn.sigmoid(f) * c + jax.nn.sigmoid(i) * jnp.tanh(g)
    h = jax.nn.sigmoid(o) * jnp.tanh(c)
    return h, c


def reference_forward(params, x_train, x_len):
    B, T = x_train.shape
    H = D_MODEL
    # shareEmb
    pe = params["pre_emb"][x_train]                        # [B,T,D]
    q = pe @ params["w_A"].T
    attn = jax.nn.softmax((q @ params["latent"].T) / TEMP, axis=-1)
    ctx = attn @ params["latent"]
    keep = x_train < MASK_TH
    emb = params["emb"][jnp.where(keep, x_train, 0)]
    wemb = ctx * (1.0 - keep.astype(jnp.float32))[..., None] + emb
    emb_tm = jnp.transpose(wemb, (1, 0, 2))                # [T,B,D]
    lens = x_len
    # forward direction
    h, c = jnp.zeros((B, H)), jnp.zeros((B, H))
    out_f = []
    for t in range(T):
        hn, cn = _lstm_cell_ref(emb_tm[t], h, c, params["wih_f"],
                                params["whh_f"], params["b_f"])
        m = (t < lens)[:, None]
        h = jnp.where(m, hn, h)
        c = jnp.where(m, cn, c)
        out_f.append(jnp.where(m, h, float(PAD_ID)))
    cT_f = c
    # backward direction
    h, c = jnp.zeros((B, H)), jnp.zeros((B, H))
    out_b = [None] * T
    for t in range(T - 1, -1, -1):
        hn, cn = _lstm_cell_ref(emb_tm[t], h, c, params["wih_b"],
                                params["whh_b"], params["b_b"])
        m = (t < lens)[:, None]
        h = jnp.where(m, hn, h)
        c = jnp.where(m, cn, c)
        out_b[t] = jnp.where(m, h, float(PAD_ID))
    cT_b = c
    enc = jnp.concatenate([jnp.stack(out_f), jnp.stack(out_b)], axis=-1)
    enc = jnp.transpose(enc, (1, 0, 2))
    cell = jnp.concatenate([cT_f, cT_b], axis=1) @ params["w_bridge"].T
    return enc, (jnp.tanh(cell), cell)


# --------------------------------- main -------------------------------------
def make_params(key):
    ks = jax.random.split(key, 12)
    H, D, L, V = D_MODEL, D_WORD, LATENT_N, EMB_VOCAB
    s_lstm = 1.0 / np.sqrt(H)
    s_br = 1.0 / np.sqrt(2 * H)
    s_a = 1.0 / np.sqrt(D)
    u = lambda k, shape, s: jax.random.uniform(k, shape, jnp.float32, -s, s)
    return {
        # shareEmb
        "pre_emb": jax.random.normal(ks[0], (PRETRAIN_VOCAB, D), jnp.float32) * 0.1,
        "emb": jax.random.normal(ks[1], (V, D), jnp.float32) * 0.1,
        "latent": jax.random.normal(ks[2], (L, D), jnp.float32) * 0.1,
        "w_A": u(ks[3], (D, D), s_a),                     # nn.Linear(D, D, bias=False)
        # bidirectional LSTM, layer 0 (n_layers=1)
        "wih_f": u(ks[4], (4 * H, D), s_lstm),
        "whh_f": u(ks[5], (4 * H, H), s_lstm),
        "b_f": u(ks[6], (4 * H,), s_lstm) + u(ks[7], (4 * H,), s_lstm),  # b_ih+b_hh
        "wih_b": u(ks[8], (4 * H, D), s_lstm),
        "whh_b": u(ks[9], (4 * H, H), s_lstm),
        "b_b": u(ks[10], (4 * H,), s_lstm),
        # bridge: nn.Linear(2H, H, bias=False)
        "w_bridge": u(ks[11], (H, 2 * H), s_br),
    }


if __name__ == "__main__":
    key = jax.random.PRNGKey(0)
    pkey, dkey, okey = jax.random.split(key, 3)
    params = make_params(pkey)
    packed = pack_params(params)       # one-time kernel-ready weight packing

    # descending lengths (pack_padded_sequence requirement), all >= 1
    x_len = jnp.array([8, 8, 7, 6, 5, 4, 3, 1], dtype=jnp.int32)
    tok = jax.random.randint(dkey, (BATCH, MAX_LEN), 1, MASK_TH)
    # sprinkle ids >= 2000 to exercise the latent-attention (ctx) branch
    oov = jax.random.randint(okey, (BATCH, MAX_LEN), MASK_TH, PRETRAIN_VOCAB)
    use_oov = jax.random.uniform(jax.random.fold_in(okey, 1),
                                 (BATCH, MAX_LEN)) < 0.25
    tok = jnp.where(use_oov, oov, tok)
    pos = jnp.arange(MAX_LEN)[None, :]
    x_train = jnp.where(pos < x_len[:, None], tok, PAD_ID).astype(jnp.int32)

    enc_out, (dec_state, dec_cell) = encoder_forward(packed, x_train, x_len)
    jax.block_until_ready((enc_out, dec_state, dec_cell))

    # validate against the pure-f32 JAX reference (kernel uses bf16 MXU operands
    # and a bf16 recurrent hidden state; cell and all gate math stay f32)
    enc_ref, (ref_state, ref_cell) = reference_forward(params, x_train, x_len)
    np.testing.assert_allclose(np.asarray(enc_out), np.asarray(enc_ref),
                               rtol=2e-2, atol=2e-2)
    np.testing.assert_allclose(np.asarray(dec_cell), np.asarray(ref_cell),
                               rtol=2e-2, atol=2e-2)
    np.testing.assert_allclose(np.asarray(dec_state), np.asarray(ref_state),
                               rtol=2e-2, atol=2e-2)

    assert enc_out.shape == (BATCH, MAX_LEN, 2 * D_MODEL)
    assert dec_state.shape == (BATCH, D_MODEL) and dec_cell.shape == (BATCH, D_MODEL)
    print("KERNEL_OK")
</pallas_src>

<mosaic_0001>
module attributes {stable_mosaic.version = 11 : i64} {
  func.func @uni_encoder_kernel(%arg0: i32, %arg1: memref<8x1xi32, #tpu.memory_space<vmem>>, %arg2: memref<64x128xf32, #tpu.memory_space<vmem>>, %arg3: memref<64x128xf32, #tpu.memory_space<vmem>>, %arg4: memref<64x1xf32, #tpu.memory_space<vmem>>, %arg5: memref<128x128xbf16, #tpu.memory_space<vmem>>, %arg6: memref<128x128xbf16, #tpu.memory_space<vmem>>, %arg7: memref<128x1024xbf16, #tpu.memory_space<vmem>>, %arg8: memref<128x512xbf16, #tpu.memory_space<vmem>>, %arg9: memref<128x512xbf16, #tpu.memory_space<vmem>>, %arg10: memref<1x1024xf32, #tpu.memory_space<vmem>>, %arg11: memref<256x128xbf16, #tpu.memory_space<vmem>>, %arg12: memref<8x8x256xf32, #tpu.memory_space<vmem>>, %arg13: memref<8x128xf32, #tpu.memory_space<vmem>>, %arg14: memref<8x128xf32, #tpu.memory_space<vmem>>, %arg15: memref<64x1024xf32, #tpu.memory_space<vmem>>) attributes {dimension_semantics = [#tpu.dimension_semantics<arbitrary>], iteration_bounds = array<i64: 1>, scalar_prefetch = 0 : i64, scratch_operands = 1 : i64, tpu.core_type = #tpu.core_type<tc>, window_params = [{pipeline_mode = #tpu.pipeline_mode<synchronous>, transform_indices = @transform_0, window_bounds = array<i64: 8, 1>}, {pipeline_mode = #tpu.pipeline_mode<synchronous>, transform_indices = @transform_1, window_bounds = array<i64: 64, 128>}, {pipeline_mode = #tpu.pipeline_mode<synchronous>, transform_indices = @transform_2, window_bounds = array<i64: 64, 128>}, {pipeline_mode = #tpu.pipeline_mode<synchronous>, transform_indices = @transform_3, window_bounds = array<i64: 64, 1>}, {pipeline_mode = #tpu.pipeline_mode<synchronous>, transform_indices = @transform_4, window_bounds = array<i64: 128, 128>}, {pipeline_mode = #tpu.pipeline_mode<synchronous>, transform_indices = @transform_5, window_bounds = array<i64: 128, 128>}, {pipeline_mode = #tpu.pipeline_mode<synchronous>, transform_indices = @transform_6, window_bounds = array<i64: 128, 1024>}, {pipeline_mode = #tpu.pipeline_mode<synchronous>, transform_indices = @transform_7, window_bounds = array<i64: 128, 512>}, {pipeline_mode = #tpu.pipeline_mode<synchronous>, transform_indices = @transform_8, window_bounds = array<i64: 128, 512>}, {pipeline_mode = #tpu.pipeline_mode<synchronous>, transform_indices = @transform_9, window_bounds = array<i64: 1, 1024>}, {pipeline_mode = #tpu.pipeline_mode<synchronous>, transform_indices = @transform_10, window_bounds = array<i64: 256, 128>}, {pipeline_mode = #tpu.pipeline_mode<synchronous>, transform_indices = @transform_11, window_bounds = array<i64: 8, 8, 256>}, {pipeline_mode = #tpu.pipeline_mode<synchronous>, transform_indices = @transform_12, window_bounds = array<i64: 8, 128>}, {pipeline_mode = #tpu.pipeline_mode<synchronous>, transform_indices = @transform_13, window_bounds = array<i64: 8, 128>}]} {
    %c0 = arith.constant 0 : index
    %c0_0 = arith.constant 0 : index
    %0 = vector.load %arg2[%c0, %c0_0] : memref<64x128xf32, #tpu.memory_space<vmem>>, vector<64x128xf32>
    %1 = arith.truncf %0 : vector<64x128xf32> to vector<64x128xbf16>
    %c0_1 = arith.constant 0 : index
    %c0_2 = arith.constant 0 : index
    %2 = vector.load %arg5[%c0_1, %c0_2] : memref<128x128xbf16, #tpu.memory_space<vmem>>, vector<128x128xbf16>
    %cst = arith.constant dense<0.000000e+00> : vector<64x128xf32>
    %3 = tpu.matmul %1, %2, %cst {dimension_numbers = #tpu.dot_dimension_numbers<[1], [0], [0], [1], [0, 0, 1, 1], [], []>} : vector<64x128xbf16>, vector<128x128xbf16>, vector<64x128xf32> -> vector<64x128xf32>
    %cst_3 = arith.constant 2.000000e+01 : f32
    %4 = vector.broadcast %cst_3 : f32 to vector<64x128xf32>
    %5 = arith.mulf %3, %4 : vector<64x128xf32>
    %cst_4 = arith.constant dense<0xFF800000> : vector<64xf32>
    %6 = vector.multi_reduction <maximumf>, %5, %cst_4 [1] : vector<64x128xf32> to vector<64xf32>
    %7 = vector.shape_cast %6 : vector<64xf32> to vector<64x1xf32>
    %8 = vector.broadcast %7 : vector<64x1xf32> to vector<64x128xf32>
    %9 = arith.subf %5, %8 : vector<64x128xf32>
    %10 = math.exp %9 : vector<64x128xf32>
    %cst_5 = arith.constant dense<0.000000e+00> : vector<64xf32>
    %11 = vector.multi_reduction <add>, %10, %cst_5 [1] : vector<64x128xf32> to vector<64xf32>
    %12 = vector.shape_cast %11 : vector<64xf32> to vector<64x1xf32>
    %13 = tpu.reciprocal %12 {approx = true} : vector<64x1xf32> -> vector<64x1xf32>
    %14 = vector.broadcast %13 : vector<64x1xf32> to vector<64x128xf32>
    %15 = arith.mulf %10, %14 : vector<64x128xf32>
    %16 = arith.truncf %15 : vector<64x128xf32> to vector<64x128xbf16>
    %c0_6 = arith.constant 0 : index
    %c0_7 = arith.constant 0 : index
    %17 = vector.load %arg6[%c0_6, %c0_7] : memref<128x128xbf16, #tpu.memory_space<vmem>>, vector<128x128xbf16>
    %cst_8 = arith.constant dense<0.000000e+00> : vector<64x128xf32>
    %18 = tpu.matmul %16, %17, %cst_8 {dimension_numbers = #tpu.dot_dimension_numbers<[1], [0], [0], [1], [0, 0, 1, 1], [], []>} : vector<64x128xbf16>, vector<128x128xbf16>, vector<64x128xf32> -> vector<64x128xf32>
    %c0_9 = arith.constant 0 : index
    %c0_10 = arith.constant 0 : index
    %19 = vector.load %arg4[%c0_9, %c0_10] : memref<64x1xf32, #tpu.memory_space<vmem>>, vector<64x1xf32>
    %20 = vector.broadcast %19 : vector<64x1xf32> to vector<64x128xf32>
    %21 = arith.mulf %18, %20 : vector<64x128xf32>
    %c0_11 = arith.constant 0 : index
    %c0_12 = arith.constant 0 : index
    %22 = vector.load %arg3[%c0_11, %c0_12] : memref<64x128xf32, #tpu.memory_space<vmem>>, vector<64x128xf32>
    %23 = arith.addf %21, %22 : vector<64x128xf32>
    %24 = arith.truncf %23 : vector<64x128xf32> to vector<64x128xbf16>
    %c0_13 = arith.constant 0 : index
    %c0_14 = arith.constant 0 : index
    %25 = vector.load %arg7[%c0_13, %c0_14] : memref<128x1024xbf16, #tpu.memory_space<vmem>>, vector<128x1024xbf16>
    %cst_15 = arith.constant dense<0.000000e+00> : vector<64x1024xf32>
    %26 = tpu.matmul %24, %25, %cst_15 {dimension_numbers = #tpu.dot_dimension_numbers<[1], [0], [0], [1], [0, 0, 1, 1], [], []>} : vector<64x128xbf16>, vector<128x1024xbf16>, vector<64x1024xf32> -> vector<64x1024xf32>
    %c0_16 = arith.constant 0 : index
    %c0_17 = arith.constant 0 : index
    %27 = vector.load %arg10[%c0_16, %c0_17] : memref<1x1024xf32, #tpu.memory_space<vmem>>, vector<1x1024xf32>
    %28 = vector.broadcast %27 : vector<1x1024xf32> to vector<64x1024xf32>
    %29 = arith.addf %26, %28 : vector<64x1024xf32>
    %c0_18 = arith.constant 0 : index
    %c0_19 = arith.constant 0 : index
    %30 = vector.load %arg15[%c0_18, %c0_19] : memref<64x1024xf32, #tpu.memory_space<vmem>>, vector<64x1024xf32>
    tpu.vector_store %arg15[%c0_18, %c0_19], %29 {strides = array<i32>} : memref<64x1024xf32, #tpu.memory_space<vmem>>, vector<64x1024xf32>,
    %c0_20 = arith.constant 0 : index
    %c0_21 = arith.constant 0 : index
    %31 = vector.load %arg1[%c0_20, %c0_21] : memref<8x1xi32, #tpu.memory_space<vmem>>, vector<8x1xi32>
    %c0_i32 = arith.constant 0 : i32
    %32 = vector.broadcast %c0_i32 : i32 to vector<8x1xi32>
    %33 = arith.cmpi sgt, %31, %32 : vector<8x1xi32>
    %c1_i32 = arith.constant 1 : i32
    %34 = vector.broadcast %c1_i32 : i32 to vector<8x1xi32>
    %35 = arith.cmpi sgt, %31, %34 : vector<8x1xi32>
    %c2_i32 = arith.constant 2 : i32
    %36 = vector.broadcast %c2_i32 : i32 to vector<8x1xi32>
    %37 = arith.cmpi sgt, %31, %36 : vector<8x1xi32>
    %c3_i32 = arith.constant 3 : i32
    %38 = vector.broadcast %c3_i32 : i32 to vector<8x1xi32>
    %39 = arith.cmpi sgt, %31, %38 : vector<8x1xi32>
    %c4_i32 = arith.constant 4 : i32
    %40 = vector.broadcast %c4_i32 : i32 to vector<8x1xi32>
    %41 = arith.cmpi sgt, %31, %40 : vector<8x1xi32>
    %c5_i32 = arith.constant 5 : i32
    %42 = vector.broadcast %c5_i32 : i32 to vector<8x1xi32>
    %43 = arith.cmpi sgt, %31, %42 : vector<8x1xi32>
    %c6_i32 = arith.constant 6 : i32
    %44 = vector.broadcast %c6_i32 : i32 to vector<8x1xi32>
    %45 = arith.cmpi sgt, %31, %44 : vector<8x1xi32>
    %c7_i32 = arith.constant 7 : i32
    %46 = vector.broadcast %c7_i32 : i32 to vector<8x1xi32>
    %47 = arith.cmpi sgt, %31, %46 : vector<8x1xi32>
    %cst_22 = arith.constant 0.000000e+00 : bf16
    %48 = vector.broadcast %cst_22 : bf16 to vector<8x128xbf16>
    %cst_23 = arith.constant 0.000000e+00 : f32
    %49 = vector.broadcast %cst_23 : f32 to vector<8x128xf32>
    %cst_24 = arith.constant 0.000000e+00 : bf16
    %50 = vector.broadcast %cst_24 : bf16 to vector<8x128xbf16>
    %cst_25 = arith.constant 0.000000e+00 : f32
    %51 = vector.broadcast %cst_25 : f32 to vector<8x128xf32>
    %c0_26 = arith.constant 0 : index
    %c0_27 = arith.constant 0 : index
    %52 = vector.load %arg8[%c0_26, %c0_27] : memref<128x512xbf16, #tpu.memory_space<vmem>>, vector<128x512xbf16>
    %cst_28 = arith.constant dense<0.000000e+00> : vector<8x512xf32>
    %53 = tpu.matmul %48, %52, %cst_28 {dimension_numbers = #tpu.dot_dimension_numbers<[1], [0], [0], [1], [0, 0, 1, 1], [], []>} : vector<8x128xbf16>, vector<128x512xbf16>, vector<8x512xf32> -> vector<8x512xf32>
    %c0_29 = arith.constant 0 : index
    %c0_30 = arith.constant 0 : index
    %54 = vector.load %arg9[%c0_29, %c0_30] : memref<128x512xbf16, #tpu.memory_space<vmem>>, vector<128x512xbf16>
    %cst_31 = arith.constant dense<0.000000e+00> : vector<8x512xf32>
    %55 = tpu.matmul %50, %54, %cst_31 {dimension_numbers = #tpu.dot_dimension_numbers<[1], [0], [0], [1], [0, 0, 1, 1], [], []>} : vector<8x128xbf16>, vector<128x512xbf16>, vector<8x512xf32> -> vector<8x512xf32>
    %c0_32 = arith.constant 0 : index
    %c0_33 = arith.constant 0 : index
    %56 = vector.load %arg15[%c0_32, %c0_33] : memref<64x1024xf32, #tpu.memory_space<vmem>>, vector<8x512xf32>
    %57 = arith.addf %56, %53 : vector<8x512xf32>
    %c56 = arith.constant 56 : index
    %c512 = arith.constant 512 : index
    %58 = vector.load %arg15[%c56, %c512] : memref<64x1024xf32, #tpu.memory_space<vmem>>, vector<8x512xf32>
    %59 = arith.addf %58, %55 : vector<8x512xf32>
    %60 = vector.extract_strided_slice %57 {offsets = [0, 0], sizes = [8, 128], strides = [1, 1]} : vector<8x512xf32> to vector<8x128xf32>
    %61 = arith.negf %60 : vector<8x128xf32>
    %62 = math.exp %61 : vector<8x128xf32>
    %cst_34 = arith.constant 1.000000e+00 : f32
    %63 = vector.broadcast %cst_34 : f32 to vector<8x128xf32>
    %64 = arith.addf %63, %62 : vector<8x128xf32>
    %65 = arith.divf %63, %64 : vector<8x128xf32>
    %66 = vector.extract_strided_slice %57 {offsets = [0, 128], sizes = [8, 128], strides = [1, 1]} : vector<8x512xf32> to vector<8x128xf32>
    %67 = arith.negf %66 : vector<8x128xf32>
    %68 = math.exp %67 : vector<8x128xf32>
    %cst_35 = arith.constant 1.000000e+00 : f32
    %69 = vector.broadcast %cst_35 : f32 to vector<8x128xf32>
    %70 = arith.addf %69, %68 : vector<8x128xf32>
    %71 = arith.divf %69, %70 : vector<8x128xf32>
    %72 = vector.extract_strided_slice %57 {offsets = [0, 256], sizes = [8, 128], strides = [1, 1]} : vector<8x512xf32> to vector<8x128xf32>
    %73 = math.tanh %72 : vector<8x128xf32>
    %74 = vector.extract_strided_slice %57 {offsets = [0, 384], sizes = [8, 128], strides = [1, 1]} : vector<8x512xf32> to vector<8x128xf32>
    %75 = arith.negf %74 : vector<8x128xf32>
    %76 = math.exp %75 : vector<8x128xf32>
    %cst_36 = arith.constant 1.000000e+00 : f32
    %77 = vector.broadcast %cst_36 : f32 to vector<8x128xf32>
    %78 = arith.addf %77, %76 : vector<8x128xf32>
    %79 = arith.divf %77, %78 : vector<8x128xf32>
    %80 = arith.mulf %71, %49 : vector<8x128xf32>
    %81 = arith.mulf %65, %73 : vector<8x128xf32>
    %82 = arith.addf %80, %81 : vector<8x128xf32>
    %83 = math.tanh %82 : vector<8x128xf32>
    %84 = arith.mulf %79, %83 : vector<8x128xf32>
    %85 = arith.truncf %84 : vector<8x128xf32> to vector<8x128xbf16>
    %86 = vector.extract_strided_slice %59 {offsets = [0, 0], sizes = [8, 128], strides = [1, 1]} : vector<8x512xf32> to vector<8x128xf32>
    %87 = arith.negf %86 : vector<8x128xf32>
    %88 = math.exp %87 : vector<8x128xf32>
    %cst_37 = arith.constant 1.000000e+00 : f32
    %89 = vector.broadcast %cst_37 : f32 to vector<8x128xf32>
    %90 = arith.addf %89, %88 : vector<8x128xf32>
    %91 = arith.divf %89, %90 : vector<8x128xf32>
    %92 = vector.extract_strided_slice %59 {offsets = [0, 128], sizes = [8, 128], strides = [1, 1]} : vector<8x512xf32> to vector<8x128xf32>
    %93 = arith.negf %92 : vector<8x128xf32>
    %94 = math.exp %93 : vector<8x128xf32>
    %cst_38 = arith.constant 1.000000e+00 : f32
    %95 = vector.broadcast %cst_38 : f32 to vector<8x128xf32>
    %96 = arith.addf %95, %94 : vector<8x128xf32>
    %97 = arith.divf %95, %96 : vector<8x128xf32>
    %98 = vector.extract_strided_slice %59 {offsets = [0, 256], sizes = [8, 128], strides = [1, 1]} : vector<8x512xf32> to vector<8x128xf32>
    %99 = math.tanh %98 : vector<8x128xf32>
    %100 = vector.extract_strided_slice %59 {offsets = [0, 384], sizes = [8, 128], strides = [1, 1]} : vector<8x512xf32> to vector<8x128xf32>
    %101 = arith.negf %100 : vector<8x128xf32>
    %102 = math.exp %101 : vector<8x128xf32>
    %cst_39 = arith.constant 1.000000e+00 : f32
    %103 = vector.broadcast %cst_39 : f32 to vector<8x128xf32>
    %104 = arith.addf %103, %102 : vector<8x128xf32>
    %105 = arith.divf %103, %104 : vector<8x128xf32>
    %106 = arith.mulf %97, %51 : vector<8x128xf32>
    %107 = arith.mulf %91, %99 : vector<8x128xf32>
    %108 = arith.addf %106, %107 : vector<8x128xf32>
    %109 = math.tanh %108 : vector<8x128xf32>
    %110 = arith.mulf %105, %109 : vector<8x128xf32>
    %111 = arith.truncf %110 : vector<8x128xf32> to vector<8x128xbf16>
    %112 = vector.shape_cast %33 : vector<8x1xi1> to vector<8x1xi1>
    %113 = vector.broadcast %112 : vector<8x1xi1> to vector<8x128xi1>
    %114 = arith.select %113, %85, %48 : vector<8x128xi1>, vector<8x128xbf16>
    %115 = vector.shape_cast %33 : vector<8x1xi1> to vector<8x1xi1>
    %116 = vector.broadcast %115 : vector<8x1xi1> to vector<8x128xi1>
    %117 = arith.select %116, %82, %49 : vector<8x128xi1>, vector<8x128xf32>
    %118 = vector.shape_cast %47 : vector<8x1xi1> to vector<8x1xi1>
    %119 = vector.broadcast %118 : vector<8x1xi1> to vector<8x128xi1>
    %120 = arith.select %119, %111, %50 : vector<8x128xi1>, vector<8x128xbf16>
    %121 = vector.shape_cast %47 : vector<8x1xi1> to vector<8x1xi1>
    %122 = vector.broadcast %121 : vector<8x1xi1> to vector<8x128xi1>
    %123 = arith.select %122, %108, %51 : vector<8x128xi1>, vector<8x128xf32>
    %cst_40 = arith.constant 0.000000e+00 : bf16
    %124 = vector.shape_cast %33 : vector<8x1xi1> to vector<8x1xi1>
    %125 = vector.broadcast %124 : vector<8x1xi1> to vector<8x128xi1>
    %126 = vector.broadcast %cst_40 : bf16 to vector<8x128xbf16>
    %127 = arith.select %125, %114, %126 : vector<8x128xi1>, vector<8x128xbf16>
    %128 = arith.extf %127 : vector<8x128xbf16> to vector<8x128xf32>
    %c0_41 = arith.constant 0 : index
    %c0_42 = arith.constant 0 : index
    %c0_43 = arith.constant 0 : index
    %129 = vector.load %arg12[%c0_41, %c0_42, %c0_43] : memref<8x8x256xf32, #tpu.memory_space<vmem>>, vector<1x8x128xf32>
    %130 = vector.shape_cast %129 : vector<1x8x128xf32> to vector<8x128xf32>
    %131 = vector.shape_cast %128 : vector<8x128xf32> to vector<1x8x128xf32>
    tpu.vector_store %arg12[%c0_41, %c0_42, %c0_43], %131 {strides = array<i32>} : memref<8x8x256xf32, #tpu.memory_space<vmem>>, vector<1x8x128xf32>,
    %cst_44 = arith.constant 0.000000e+00 : bf16
    %132 = vector.shape_cast %47 : vector<8x1xi1> to vector<8x1xi1>
    %133 = vector.broadcast %132 : vector<8x1xi1> to vector<8x128xi1>
    %134 = vector.broadcast %cst_44 : bf16 to vector<8x128xbf16>
    %135 = arith.select %133, %120, %134 : vector<8x128xi1>, vector<8x128xbf16>
    %136 = arith.extf %135 : vector<8x128xbf16> to vector<8x128xf32>
    %c7 = arith.constant 7 : index
    %c0_45 = arith.constant 0 : index
    %c128 = arith.constant 128 : index
    %137 = vector.load %arg12[%c7, %c0_45, %c128] : memref<8x8x256xf32, #tpu.memory_space<vmem>>, vector<1x8x128xf32>
    %138 = vector.shape_cast %137 : vector<1x8x128xf32> to vector<8x128xf32>
    %139 = vector.shape_cast %136 : vector<8x128xf32> to vector<1x8x128xf32>
    tpu.vector_store %arg12[%c7, %c0_45, %c128], %139 {strides = array<i32>} : memref<8x8x256xf32, #tpu.memory_space<vmem>>, vector<1x8x128xf32>,
    %c0_46 = arith.constant 0 : index
    %c0_47 = arith.constant 0 : index
    %140 = vector.load %arg8[%c0_46, %c0_47] : memref<128x512xbf16, #tpu.memory_space<vmem>>, vector<128x512xbf16>
    %cst_48 = arith.constant dense<0.000000e+00> : vector<8x512xf32>
    %141 = tpu.matmul %114, %140, %cst_48 {dimension_numbers = #tpu.dot_dimension_numbers<[1], [0], [0], [1], [0, 0, 1, 1], [], []>} : vector<8x128xbf16>, vector<128x512xbf16>, vector<8x512xf32> -> vector<8x512xf32>
    %c0_49 = arith.constant 0 : index
    %c0_50 = arith.constant 0 : index
    %142 = vector.load %arg9[%c0_49, %c0_50] : memref<128x512xbf16, #tpu.memory_space<vmem>>, vector<128x512xbf16>
    %cst_51 = arith.constant dense<0.000000e+00> : vector<8x512xf32>
    %143 = tpu.matmul %120, %142, %cst_51 {dimension_numbers = #tpu.dot_dimension_numbers<[1], [0], [0], [1], [0, 0, 1, 1], [], []>} : vector<8x128xbf16>, vector<128x512xbf16>, vector<8x512xf32> -> vector<8x512xf32>
    %c8 = arith.constant 8 : index
    %c0_52 = arith.constant 0 : index
    %144 = vector.load %arg15[%c8, %c0_52] : memref<64x1024xf32, #tpu.memory_space<vmem>>, vector<8x512xf32>
    %145 = arith.addf %144, %141 : vector<8x512xf32>
    %c48 = arith.constant 48 : index
    %c512_53 = arith.constant 512 : index
    %146 = vector.load %arg15[%c48, %c512_53] : memref<64x1024xf32, #tpu.memory_space<vmem>>, vector<8x512xf32>
    %147 = arith.addf %146, %143 : vector<8x512xf32>
    %148 = vector.extract_strided_slice %145 {offsets = [0, 0], sizes = [8, 128], strides = [1, 1]} : vector<8x512xf32> to vector<8x128xf32>
    %149 = arith.negf %148 : vector<8x128xf32>
    %150 = math.exp %149 : vector<8x128xf32>
    %cst_54 = arith.constant 1.000000e+00 : f32
    %151 = vector.broadcast %cst_54 : f32 to vector<8x128xf32>
    %152 = arith.addf %151, %150 : vector<8x128xf32>
    %153 = arith.divf %151, %152 : vector<8x128xf32>
    %154 = vector.extract_strided_slice %145 {offsets = [0, 128], sizes = [8, 128], strides = [1, 1]} : vector<8x512xf32> to vector<8x128xf32>
    %155 = arith.negf %154 : vector<8x128xf32>
    %156 = math.exp %155 : vector<8x128xf32>
    %cst_55 = arith.constant 1.000000e+00 : f32
    %157 = vector.broadcast %cst_55 : f32 to vector<8x128xf32>
    %158 = arith.addf %157, %156 : vector<8x128xf32>
    %159 = arith.divf %157, %158 : vector<8x128xf32>
    %160 = vector.extract_strided_slice %145 {offsets = [0, 256], sizes = [8, 128], strides = [1, 1]} : vector<8x512xf32> to vector<8x128xf32>
    %161 = math.tanh %160 : vector<8x128xf32>
    %162 = vector.extract_strided_slice %145 {offsets = [0, 384], sizes = [8, 128], strides = [1, 1]} : vector<8x512xf32> to vector<8x128xf32>
    %163 = arith.negf %162 : vector<8x128xf32>
    %164 = math.exp %163 : vector<8x128xf32>
    %cst_56 = arith.constant 1.000000e+00 : f32
    %165 = vector.broadcast %cst_56 : f32 to vector<8x128xf32>
    %166 = arith.addf %165, %164 : vector<8x128xf32>
    %167 = arith.divf %165, %166 : vector<8x128xf32>
    %168 = arith.mulf %159, %117 : vector<8x128xf32>
    %169 = arith.mulf %153, %161 : vector<8x128xf32>
    %170 = arith.addf %168, %169 : vector<8x128xf32>
    %171 = math.tanh %170 : vector<8x128xf32>
    %172 = arith.mulf %167, %171 : vector<8x128xf32>
    %173 = arith.truncf %172 : vector<8x128xf32> to vector<8x128xbf16>
    %174 = vector.extract_strided_slice %147 {offsets = [0, 0], sizes = [8, 128], strides = [1, 1]} : vector<8x512xf32> to vector<8x128xf32>
    %175 = arith.negf %174 : vector<8x128xf32>
    %176 = math.exp %175 : vector<8x128xf32>
    %cst_57 = arith.constant 1.000000e+00 : f32
    %177 = vector.broadcast %cst_57 : f32 to vector<8x128xf32>
    %178 = arith.addf %177, %176 : vector<8x128xf32>
    %179 = arith.divf %177, %178 : vector<8x128xf32>
    %180 = vector.extract_strided_slice %147 {offsets = [0, 128], sizes = [8, 128], strides = [1, 1]} : vector<8x512xf32> to vector<8x128xf32>
    %181 = arith.negf %180 : vector<8x128xf32>
    %182 = math.exp %181 : vector<8x128xf32>
    %cst_58 = arith.constant 1.000000e+00 : f32
    %183 = vector.broadcast %cst_58 : f32 to vector<8x128xf32>
    %184 = arith.addf %183, %182 : vector<8x128xf32>
    %185 = arith.divf %183, %184 : vector<8x128xf32>
    %186 = vector.extract_strided_slice %147 {offsets = [0, 256], sizes = [8, 128], strides = [1, 1]} : vector<8x512xf32> to vector<8x128xf32>
    %187 = math.tanh %186 : vector<8x128xf32>
    %188 = vector.extract_strided_slice %147 {offsets = [0, 384], sizes = [8, 128], strides = [1, 1]} : vector<8x512xf32> to vector<8x128xf32>
    %189 = arith.negf %188 : vector<8x128xf32>
    %190 = math.exp %189 : vector<8x128xf32>
    %cst_59 = arith.constant 1.000000e+00 : f32
    %191 = vector.broadcast %cst_59 : f32 to vector<8x128xf32>
    %192 = arith.addf %191, %190 : vector<8x128xf32>
    %193 = arith.divf %191, %192 : vector<8x128xf32>
    %194 = arith.mulf %185, %123 : vector<8x128xf32>
    %195 = arith.mulf %179, %187 : vector<8x128xf32>
    %196 = arith.addf %194, %195 : vector<8x128xf32>
    %197 = math.tanh %196 : vector<8x128xf32>
    %198 = arith.mulf %193, %197 : vector<8x128xf32>
    %199 = arith.truncf %198 : vector<8x128xf32> to vector<8x128xbf16>
    %200 = vector.shape_cast %35 : vector<8x1xi1> to vector<8x1xi1>
    %201 = vector.broadcast %200 : vector<8x1xi1> to vector<8x128xi1>
    %202 = arith.select %201, %173, %114 : vector<8x128xi1>, vector<8x128xbf16>
    %203 = vector.shape_cast %35 : vector<8x1xi1> to vector<8x1xi1>
    %204 = vector.broadcast %203 : vector<8x1xi1> to vector<8x128xi1>
    %205 = arith.select %204, %170, %117 : vector<8x128xi1>, vector<8x128xf32>
    %206 = vector.shape_cast %45 : vector<8x1xi1> to vector<8x1xi1>
    %207 = vector.broadcast %206 : vector<8x1xi1> to vector<8x128xi1>
    %208 = arith.select %207, %199, %120 : vector<8x128xi1>, vector<8x128xbf16>
    %209 = vector.shape_cast %45 : vector<8x1xi1> to vector<8x1xi1>
    %210 = vector.broadcast %209 : vector<8x1xi1> to vector<8x128xi1>
    %211 = arith.select %210, %196, %123 : vector<8x128xi1>, vector<8x128xf32>
    %cst_60 = arith.constant 0.000000e+00 : bf16
    %212 = vector.shape_cast %35 : vector<8x1xi1> to vector<8x1xi1>
    %213 = vector.broadcast %212 : vector<8x1xi1> to vector<8x128xi1>
    %214 = vector.broadcast %cst_60 : bf16 to vector<8x128xbf16>
    %215 = arith.select %213, %202, %214 : vector<8x128xi1>, vector<8x128xbf16>
    %216 = arith.extf %215 : vector<8x128xbf16> to vector<8x128xf32>
    %c1 = arith.constant 1 : index
    %c0_61 = arith.constant 0 : index
    %c0_62 = arith.constant 0 : index
    %217 = vector.load %arg12[%c1, %c0_61, %c0_62] : memref<8x8x256xf32, #tpu.memory_space<vmem>>, vector<1x8x128xf32>
    %218 = vector.shape_cast %217 : vector<1x8x128xf32> to vector<8x128xf32>
    %219 = vector.shape_cast %216 : vector<8x128xf32> to vector<1x8x128xf32>
    tpu.vector_store %arg12[%c1, %c0_61, %c0_62], %219 {strides = array<i32>} : memref<8x8x256xf32, #tpu.memory_space<vmem>>, vector<1x8x128xf32>,
    %cst_63 = arith.constant 0.000000e+00 : bf16
    %220 = vector.shape_cast %45 : vector<8x1xi1> to vector<8x1xi1>
    %221 = vector.broadcast %220 : vector<8x1xi1> to vector<8x128xi1>
    %222 = vector.broadcast %cst_63 : bf16 to vector<8x128xbf16>
    %223 = arith.select %221, %208, %222 : vector<8x128xi1>, vector<8x128xbf16>
    %224 = arith.extf %223 : vector<8x128xbf16> to vector<8x128xf32>
    %c6 = arith.constant 6 : index
    %c0_64 = arith.constant 0 : index
    %c128_65 = arith.constant 128 : index
    %225 = vector.load %arg12[%c6, %c0_64, %c128_65] : memref<8x8x256xf32, #tpu.memory_space<vmem>>, vector<1x8x128xf32>
    %226 = vector.shape_cast %225 : vector<1x8x128xf32> to vector<8x128xf32>
    %227 = vector.shape_cast %224 : vector<8x128xf32> to vector<1x8x128xf32>
    tpu.vector_store %arg12[%c6, %c0_64, %c128_65], %227 {strides = array<i32>} : memref<8x8x256xf32, #tpu.memory_space<vmem>>, vector<1x8x128xf32>,
    %c0_66 = arith.constant 0 : index
    %c0_67 = arith.constant 0 : index
    %228 = vector.load %arg8[%c0_66, %c0_67] : memref<128x512xbf16, #tpu.memory_space<vmem>>, vector<128x512xbf16>
    %cst_68 = arith.constant dense<0.000000e+00> : vector<8x512xf32>
    %229 = tpu.matmul %202, %228, %cst_68 {dimension_numbers = #tpu.dot_dimension_numbers<[1], [0], [0], [1], [0, 0, 1, 1], [], []>} : vector<8x128xbf16>, vector<128x512xbf16>, vector<8x512xf32> -> vector<8x512xf32>
    %c0_69 = arith.constant 0 : index
    %c0_70 = arith.constant 0 : index
    %230 = vector.load %arg9[%c0_69, %c0_70] : memref<128x512xbf16, #tpu.memory_space<vmem>>, vector<128x512xbf16>
    %cst_71 = arith.constant dense<0.000000e+00> : vector<8x512xf32>
    %231 = tpu.matmul %208, %230, %cst_71 {dimension_numbers = #tpu.dot_dimension_numbers<[1], [0], [0], [1], [0, 0, 1, 1], [], []>} : vector<8x128xbf16>, vector<128x512xbf16>, vector<8x512xf32> -> vector<8x512xf32>
    %c16 = arith.constant 16 : index
    %c0_72 = arith.constant 0 : index
    %232 = vector.load %arg15[%c16, %c0_72] : memref<64x1024xf32, #tpu.memory_space<vmem>>, vector<8x512xf32>
    %233 = arith.addf %232, %229 : vector<8x512xf32>
    %c40 = arith.constant 40 : index
    %c512_73 = arith.constant 512 : index
    %234 = vector.load %arg15[%c40, %c512_73] : memref<64x1024xf32, #tpu.memory_space<vmem>>, vector<8x512xf32>
    %235 = arith.addf %234, %231 : vector<8x512xf32>
    %236 = vector.extract_strided_slice %233 {offsets = [0, 0], sizes = [8, 128], strides = [1, 1]} : vector<8x512xf32> to vector<8x128xf32>
    %237 = arith.negf %236 : vector<8x128xf32>
    %238 = math.exp %237 : vector<8x128xf32>
    %cst_74 = arith.constant 1.000000e+00 : f32
    %239 = vector.broadcast %cst_74 : f32 to vector<8x128xf32>
    %240 = arith.addf %239, %238 : vector<8x128xf32>
    %241 = arith.divf %239, %240 : vector<8x128xf32>
    %242 = vector.extract_strided_slice %233 {offsets = [0, 128], sizes = [8, 128], strides = [1, 1]} : vector<8x512xf32> to vector<8x128xf32>
    %243 = arith.negf %242 : vector<8x128xf32>
    %244 = math.exp %243 : vector<8x128xf32>
    %cst_75 = arith.constant 1.000000e+00 : f32
    %245 = vector.broadcast %cst_75 : f32 to vector<8x128xf32>
    %246 = arith.addf %245, %244 : vector<8x128xf32>
    %247 = arith.divf %245, %246 : vector<8x128xf32>
    %248 = vector.extract_strided_slice %233 {offsets = [0, 256], sizes = [8, 128], strides = [1, 1]} : vector<8x512xf32> to vector<8x128xf32>
    %249 = math.tanh %248 : vector<8x128xf32>
    %250 = vector.extract_strided_slice %233 {offsets = [0, 384], sizes = [8, 128], strides = [1, 1]} : vector<8x512xf32> to vector<8x128xf32>
    %251 = arith.negf %250 : vector<8x128xf32>
    %252 = math.exp %251 : vector<8x128xf32>
    %cst_76 = arith.constant 1.000000e+00 : f32
    %253 = vector.broadcast %cst_76 : f32 to vector<8x128xf32>
    %254 = arith.addf %253, %252 : vector<8x128xf32>
    %255 = arith.divf %253, %254 : vector<8x128xf32>
    %256 = arith.mulf %247, %205 : vector<8x128xf32>
    %257 = arith.mulf %241, %249 : vector<8x128xf32>
    %258 = arith.addf %256, %257 : vector<8x128xf32>
    %259 = math.tanh %258 : vector<8x128xf32>
    %260 = arith.mulf %255, %259 : vector<8x128xf32>
    %261 = arith.truncf %260 : vector<8x128xf32> to vector<8x128xbf16>
    %262 = vector.extract_strided_slice %235 {offsets = [0, 0], sizes = [8, 128], strides = [1, 1]} : vector<8x512xf32> to vector<8x128xf32>
    %263 = arith.negf %262 : vector<8x128xf32>
    %264 = math.exp %263 : vector<8x128xf32>
    %cst_77 = arith.constant 1.000000e+00 : f32
    %265 = vector.broadcast %cst_77 : f32 to vector<8x128xf32>
    %266 = arith.addf %265, %264 : vector<8x128xf32>
    %267 = arith.divf %265, %266 : vector<8x128xf32>
    %268 = vector.extract_strided_slice %235 {offsets = [0, 128], sizes = [8, 128], strides = [1, 1]} : vector<8x512xf32> to vector<8x128xf32>
    %269 = arith.negf %268 : vector<8x128xf32>
    %270 = math.exp %269 : vector<8x128xf32>
    %cst_78 = arith.constant 1.000000e+00 : f32
    %271 = vector.broadcast %cst_78 : f32 to vector<8x128xf32>
    %272 = arith.addf %271, %270 : vector<8x128xf32>
    %273 = arith.divf %271, %272 : vector<8x128xf32>
    %274 = vector.extract_strided_slice %235 {offsets = [0, 256], sizes = [8, 128], strides = [1, 1]} : vector<8x512xf32> to vector<8x128xf32>
    %275 = math.tanh %274 : vector<8x128xf32>
    %276 = vector.extract_strided_slice %235 {offsets = [0, 384], sizes = [8, 128], strides = [1, 1]} : vector<8x512xf32> to vector<8x128xf32>
    %277 = arith.negf %276 : vector<8x128xf32>
    %278 = math.exp %277 : vector<8x128xf32>
    %cst_79 = arith.constant 1.000000e+00 : f32
    %279 = vector.broadcast %cst_79 : f32 to vector<8x128xf32>
    %280 = arith.addf %279, %278 : vector<8x128xf32>
    %281 = arith.divf %279, %280 : vector<8x128xf32>
    %282 = arith.mulf %273, %211 : vector<8x128xf32>
    %283 = arith.mulf %267, %275 : vector<8x128xf32>
    %284 = arith.addf %282, %283 : vector<8x128xf32>
    %285 = math.tanh %284 : vector<8x128xf32>
    %286 = arith.mulf %281, %285 : vector<8x128xf32>
    %287 = arith.truncf %286 : vector<8x128xf32> to vector<8x128xbf16>
    %288 = vector.shape_cast %37 : vector<8x1xi1> to vector<8x1xi1>
    %289 = vector.broadcast %288 : vector<8x1xi1> to vector<8x128xi1>
    %290 = arith.select %289, %261, %202 : vector<8x128xi1>, vector<8x128xbf16>
    %291 = vector.shape_cast %37 : vector<8x1xi1> to vector<8x1xi1>
    %292 = vector.broadcast %291 : vector<8x1xi1> to vector<8x128xi1>
    %293 = arith.select %292, %258, %205 : vector<8x128xi1>, vector<8x128xf32>
    %294 = vector.shape_cast %43 : vector<8x1xi1> to vector<8x1xi1>
    %295 = vector.broadcast %294 : vector<8x1xi1> to vector<8x128xi1>
    %296 = arith.select %295, %287, %208 : vector<8x128xi1>, vector<8x128xbf16>
    %297 = vector.shape_cast %43 : vector<8x1xi1> to vector<8x1xi1>
    %298 = vector.broadcast %297 : vector<8x1xi1> to vector<8x128xi1>
    %299 = arith.select %298, %284, %211 : vector<8x128xi1>, vector<8x128xf32>
    %cst_80 = arith.constant 0.000000e+00 : bf16
    %300 = vector.shape_cast %37 : vector<8x1xi1> to vector<8x1xi1>
    %301 = vector.broadcast %300 : vector<8x1xi1> to vector<8x128xi1>
    %302 = vector.broadcast %cst_80 : bf16 to vector<8x128xbf16>
    %303 = arith.select %301, %290, %302 : vector<8x128xi1>, vector<8x128xbf16>
    %304 = arith.extf %303 : vector<8x128xbf16> to vector<8x128xf32>
    %c2 = arith.constant 2 : index
    %c0_81 = arith.constant 0 : index
    %c0_82 = arith.constant 0 : index
    %305 = vector.load %arg12[%c2, %c0_81, %c0_82] : memref<8x8x256xf32, #tpu.memory_space<vmem>>, vector<1x8x128xf32>
    %306 = vector.shape_cast %305 : vector<1x8x128xf32> to vector<8x128xf32>
    %307 = vector.shape_cast %304 : vector<8x128xf32> to vector<1x8x128xf32>
    tpu.vector_store %arg12[%c2, %c0_81, %c0_82], %307 {strides = array<i32>} : memref<8x8x256xf32, #tpu.memory_space<vmem>>, vector<1x8x128xf32>,
    %cst_83 = arith.constant 0.000000e+00 : bf16
    %308 = vector.shape_cast %43 : vector<8x1xi1> to vector<8x1xi1>
    %309 = vector.broadcast %308 : vector<8x1xi1> to vector<8x128xi1>
    %310 = vector.broadcast %cst_83 : bf16 to vector<8x128xbf16>
    %311 = arith.select %309, %296, %310 : vector<8x128xi1>, vector<8x128xbf16>
    %312 = arith.extf %311 : vector<8x128xbf16> to vector<8x128xf32>
    %c5 = arith.constant 5 : index
    %c0_84 = arith.constant 0 : index
    %c128_85 = arith.constant 128 : index
    %313 = vector.load %arg12[%c5, %c0_84, %c128_85] : memref<8x8x256xf32, #tpu.memory_space<vmem>>, vector<1x8x128xf32>
    %314 = vector.shape_cast %313 : vector<1x8x128xf32> to vector<8x128xf32>
    %315 = vector.shape_cast %312 : vector<8x128xf32> to vector<1x8x128xf32>
    tpu.vector_store %arg12[%c5, %c0_84, %c128_85], %315 {strides = array<i32>} : memref<8x8x256xf32, #tpu.memory_space<vmem>>, vector<1x8x128xf32>,
    %c0_86 = arith.constant 0 : index
    %c0_87 = arith.constant 0 : index
    %316 = vector.load %arg8[%c0_86, %c0_87] : memref<128x512xbf16, #tpu.memory_space<vmem>>, vector<128x512xbf16>
    %cst_88 = arith.constant dense<0.000000e+00> : vector<8x512xf32>
    %317 = tpu.matmul %290, %316, %cst_88 {dimension_numbers = #tpu.dot_dimension_numbers<[1], [0], [0], [1], [0, 0, 1, 1], [], []>} : vector<8x128xbf16>, vector<128x512xbf16>, vector<8x512xf32> -> vector<8x512xf32>
    %c0_89 = arith.constant 0 : index
    %c0_90 = arith.constant 0 : index
    %318 = vector.load %arg9[%c0_89, %c0_90] : memref<128x512xbf16, #tpu.memory_space<vmem>>, vector<128x512xbf16>
    %cst_91 = arith.constant dense<0.000000e+00> : vector<8x512xf32>
    %319 = tpu.matmul %296, %318, %cst_91 {dimension_numbers = #tpu.dot_dimension_numbers<[1], [0], [0], [1], [0, 0, 1, 1], [], []>} : vector<8x128xbf16>, vector<128x512xbf16>, vector<8x512xf32> -> vector<8x512xf32>
    %c24 = arith.constant 24 : index
    %c0_92 = arith.constant 0 : index
    %320 = vector.load %arg15[%c24, %c0_92] : memref<64x1024xf32, #tpu.memory_space<vmem>>, vector<8x512xf32>
    %321 = arith.addf %320, %317 : vector<8x512xf32>
    %c32 = arith.constant 32 : index
    %c512_93 = arith.constant 512 : index
    %322 = vector.load %arg15[%c32, %c512_93] : memref<64x1024xf32, #tpu.memory_space<vmem>>, vector<8x512xf32>
    %323 = arith.addf %322, %319 : vector<8x512xf32>
    %324 = vector.extract_strided_slice %321 {offsets = [0, 0], sizes = [8, 128], strides = [1, 1]} : vector<8x512xf32> to vector<8x128xf32>
    %325 = arith.negf %324 : vector<8x128xf32>
    %326 = math.exp %325 : vector<8x128xf32>
    %cst_94 = arith.constant 1.000000e+00 : f32
    %327 = vector.broadcast %cst_94 : f32 to vector<8x128xf32>
    %328 = arith.addf %327, %326 : vector<8x128xf32>
    %329 = arith.divf %327, %328 : vector<8x128xf32>
    %330 = vector.extract_strided_slice %321 {offsets = [0, 128], sizes = [8, 128], strides = [1, 1]} : vector<8x512xf32> to vector<8x128xf32>
    %331 = arith.negf %330 : vector<8x128xf32>
    %332 = math.exp %331 : vector<8x128xf32>
    %cst_95 = arith.constant 1.000000e+00 : f32
    %333 = vector.broadcast %cst_95 : f32 to vector<8x128xf32>
    %334 = arith.addf %333, %332 : vector<8x128xf32>
    %335 = arith.divf %333, %334 : vector<8x128xf32>
    %336 = vector.extract_strided_slice %321 {offsets = [0, 256], sizes = [8, 128], strides = [1, 1]} : vector<8x512xf32> to vector<8x128xf32>
    %337 = math.tanh %336 : vector<8x128xf32>
    %338 = vector.extract_strided_slice %321 {offsets = [0, 384], sizes = [8, 128], strides = [1, 1]} : vector<8x512xf32> to vector<8x128xf32>
    %339 = arith.negf %338 : vector<8x128xf32>
    %340 = math.exp %339 : vector<8x128xf32>
    %cst_96 = arith.constant 1.000000e+00 : f32
    %341 = vector.broadcast %cst_96 : f32 to vector<8x128xf32>
    %342 = arith.addf %341, %340 : vector<8x128xf32>
    %343 = arith.divf %341, %342 : vector<8x128xf32>
    %344 = arith.mulf %335, %293 : vector<8x128xf32>
    %345 = arith.mulf %329, %337 : vector<8x128xf32>
    %346 = arith.addf %344, %345 : vector<8x128xf32>
    %347 = math.tanh %346 : vector<8x128xf32>
    %348 = arith.mulf %343, %347 : vector<8x128xf32>
    %349 = arith.truncf %348 : vector<8x128xf32> to vector<8x128xbf16>
    %350 = vector.extract_strided_slice %323 {offsets = [0, 0], sizes = [8, 128], strides = [1, 1]} : vector<8x512xf32> to vector<8x128xf32>
    %351 = arith.negf %350 : vector<8x128xf32>
    %352 = math.exp %351 : vector<8x128xf32>
    %cst_97 = arith.constant 1.000000e+00 : f32
    %353 = vector.broadcast %cst_97 : f32 to vector<8x128xf32>
    %354 = arith.addf %353, %352 : vector<8x128xf32>
    %355 = arith.divf %353, %354 : vector<8x128xf32>
    %356 = vector.extract_strided_slice %323 {offsets = [0, 128], sizes = [8, 128], strides = [1, 1]} : vector<8x512xf32> to vector<8x128xf32>
    %357 = arith.negf %356 : vector<8x128xf32>
    %358 = math.exp %357 : vector<8x128xf32>
    %cst_98 = arith.constant 1.000000e+00 : f32
    %359 = vector.broadcast %cst_98 : f32 to vector<8x128xf32>
    %360 = arith.addf %359, %358 : vector<8x128xf32>
    %361 = arith.divf %359, %360 : vector<8x128xf32>
    %362 = vector.extract_strided_slice %323 {offsets = [0, 256], sizes = [8, 128], strides = [1, 1]} : vector<8x512xf32> to vector<8x128xf32>
    %363 = math.tanh %362 : vector<8x128xf32>
    %364 = vector.extract_strided_slice %323 {offsets = [0, 384], sizes = [8, 128], strides = [1, 1]} : vector<8x512xf32> to vector<8x128xf32>
    %365 = arith.negf %364 : vector<8x128xf32>
    %366 = math.exp %365 : vector<8x128xf32>
    %cst_99 = arith.constant 1.000000e+00 : f32
    %367 = vector.broadcast %cst_99 : f32 to vector<8x128xf32>
    %368 = arith.addf %367, %366 : vector<8x128xf32>
    %369 = arith.divf %367, %368 : vector<8x128xf32>
    %370 = arith.mulf %361, %299 : vector<8x128xf32>
    %371 = arith.mulf %355, %363 : vector<8x128xf32>
    %372 = arith.addf %370, %371 : vector<8x128xf32>
    %373 = math.tanh %372 : vector<8x128xf32>
    %374 = arith.mulf %369, %373 : vector<8x128xf32>
    %375 = arith.truncf %374 : vector<8x128xf32> to vector<8x128xbf16>
    %376 = vector.shape_cast %39 : vector<8x1xi1> to vector<8x1xi1>
    %377 = vector.broadcast %376 : vector<8x1xi1> to vector<8x128xi1>
    %378 = arith.select %377, %349, %290 : vector<8x128xi1>, vector<8x128xbf16>
    %379 = vector.shape_cast %39 : vector<8x1xi1> to vector<8x1xi1>
    %380 = vector.broadcast %379 : vector<8x1xi1> to vector<8x128xi1>
    %381 = arith.select %380, %346, %293 : vector<8x128xi1>, vector<8x128xf32>
    %382 = vector.shape_cast %41 : vector<8x1xi1> to vector<8x1xi1>
    %383 = vector.broadcast %382 : vector<8x1xi1> to vector<8x128xi1>
    %384 = arith.select %383, %375, %296 : vector<8x128xi1>, vector<8x128xbf16>
    %385 = vector.shape_cast %41 : vector<8x1xi1> to vector<8x1xi1>
    %386 = vector.broadcast %385 : vector<8x1xi1> to vector<8x128xi1>
    %387 = arith.select %386, %372, %299 : vector<8x128xi1>, vector<8x128xf32>
    %cst_100 = arith.constant 0.000000e+00 : bf16
    %388 = vector.shape_cast %39 : vector<8x1xi1> to vector<8x1xi1>
    %389 = vector.broadcast %388 : vector<8x1xi1> to vector<8x128xi1>
    %390 = vector.broadcast %cst_100 : bf16 to vector<8x128xbf16>
    %391 = arith.select %389, %378, %390 : vector<8x128xi1>, vector<8x128xbf16>
    %392 = arith.extf %391 : vector<8x128xbf16> to vector<8x128xf32>
    %c3 = arith.constant 3 : index
    %c0_101 = arith.constant 0 : index
    %c0_102 = arith.constant 0 : index
    %393 = vector.load %arg12[%c3, %c0_101, %c0_102] : memref<8x8x256xf32, #tpu.memory_space<vmem>>, vector<1x8x128xf32>
    %394 = vector.shape_cast %393 : vector<1x8x128xf32> to vector<8x128xf32>
    %395 = vector.shape_cast %392 : vector<8x128xf32> to vector<1x8x128xf32>
    tpu.vector_store %arg12[%c3, %c0_101, %c0_102], %395 {strides = array<i32>} : memref<8x8x256xf32, #tpu.memory_space<vmem>>, vector<1x8x128xf32>,
    %cst_103 = arith.constant 0.000000e+00 : bf16
    %396 = vector.shape_cast %41 : vector<8x1xi1> to vector<8x1xi1>
    %397 = vector.broadcast %396 : vector<8x1xi1> to vector<8x128xi1>
    %398 = vector.broadcast %cst_103 : bf16 to vector<8x128xbf16>
    %399 = arith.select %397, %384, %398 : vector<8x128xi1>, vector<8x128xbf16>
    %400 = arith.extf %399 : vector<8x128xbf16> to vector<8x128xf32>
    %c4 = arith.constant 4 : index
    %c0_104 = arith.constant 0 : index
    %c128_105 = arith.constant 128 : index
    %401 = vector.load %arg12[%c4, %c0_104, %c128_105] : memref<8x8x256xf32, #tpu.memory_space<vmem>>, vector<1x8x128xf32>
    %402 = vector.shape_cast %401 : vector<1x8x128xf32> to vector<8x128xf32>
    %403 = vector.shape_cast %400 : vector<8x128xf32> to vector<1x8x128xf32>
    tpu.vector_store %arg12[%c4, %c0_104, %c128_105], %403 {strides = array<i32>} : memref<8x8x256xf32, #tpu.memory_space<vmem>>, vector<1x8x128xf32>,
    %c0_106 = arith.constant 0 : index
    %c0_107 = arith.constant 0 : index
    %404 = vector.load %arg8[%c0_106, %c0_107] : memref<128x512xbf16, #tpu.memory_space<vmem>>, vector<128x512xbf16>
    %cst_108 = arith.constant dense<0.000000e+00> : vector<8x512xf32>
    %405 = tpu.matmul %378, %404, %cst_108 {dimension_numbers = #tpu.dot_dimension_numbers<[1], [0], [0], [1], [0, 0, 1, 1], [], []>} : vector<8x128xbf16>, vector<128x512xbf16>, vector<8x512xf32> -> vector<8x512xf32>
    %c0_109 = arith.constant 0 : index
    %c0_110 = arith.constant 0 : index
    %406 = vector.load %arg9[%c0_109, %c0_110] : memref<128x512xbf16, #tpu.memory_space<vmem>>, vector<128x512xbf16>
    %cst_111 = arith.constant dense<0.000000e+00> : vector<8x512xf32>
    %407 = tpu.matmul %384, %406, %cst_111 {dimension_numbers = #tpu.dot_dimension_numbers<[1], [0], [0], [1], [0, 0, 1, 1], [], []>} : vector<8x128xbf16>, vector<128x512xbf16>, vector<8x512xf32> -> vector<8x512xf32>
    %c32_112 = arith.constant 32 : index
    %c0_113 = arith.constant 0 : index
    %408 = vector.load %arg15[%c32_112, %c0_113] : memref<64x1024xf32, #tpu.memory_space<vmem>>, vector<8x512xf32>
    %409 = arith.addf %408, %405 : vector<8x512xf32>
    %c24_114 = arith.constant 24 : index
    %c512_115 = arith.constant 512 : index
    %410 = vector.load %arg15[%c24_114, %c512_115] : memref<64x1024xf32, #tpu.memory_space<vmem>>, vector<8x512xf32>
    %411 = arith.addf %410, %407 : vector<8x512xf32>
    %412 = vector.extract_strided_slice %409 {offsets = [0, 0], sizes = [8, 128], strides = [1, 1]} : vector<8x512xf32> to vector<8x128xf32>
    %413 = arith.negf %412 : vector<8x128xf32>
    %414 = math.exp %413 : vector<8x128xf32>
    %cst_116 = arith.constant 1.000000e+00 : f32
    %415 = vector.broadcast %cst_116 : f32 to vector<8x128xf32>
    %416 = arith.addf %415, %414 : vector<8x128xf32>
    %417 = arith.divf %415, %416 : vector<8x128xf32>
    %418 = vector.extract_strided_slice %409 {offsets = [0, 128], sizes = [8, 128], strides = [1, 1]} : vector<8x512xf32> to vector<8x128xf32>
    %419 = arith.negf %418 : vector<8x128xf32>
    %420 = math.exp %419 : vector<8x128xf32>
    %cst_117 = arith.constant 1.000000e+00 : f32
    %421 = vector.broadcast %cst_117 : f32 to vector<8x128xf32>
    %422 = arith.addf %421, %420 : vector<8x128xf32>
    %423 = arith.divf %421, %422 : vector<8x128xf32>
    %424 = vector.extract_strided_slice %409 {offsets = [0, 256], sizes = [8, 128], strides = [1, 1]} : vector<8x512xf32> to vector<8x128xf32>
    %425 = math.tanh %424 : vector<8x128xf32>
    %426 = vector.extract_strided_slice %409 {offsets = [0, 384], sizes = [8, 128], strides = [1, 1]} : vector<8x512xf32> to vector<8x128xf32>
    %427 = arith.negf %426 : vector<8x128xf32>
    %428 = math.exp %427 : vector<8x128xf32>
    %cst_118 = arith.constant 1.000000e+00 : f32
    %429 = vector.broadcast %cst_118 : f32 to vector<8x128xf32>
    %430 = arith.addf %429, %428 : vector<8x128xf32>
    %431 = arith.divf %429, %430 : vector<8x128xf32>
    %432 = arith.mulf %423, %381 : vector<8x128xf32>
    %433 = arith.mulf %417, %425 : vector<8x128xf32>
    %434 = arith.addf %432, %433 : vector<8x128xf32>
    %435 = math.tanh %434 : vector<8x128xf32>
    %436 = arith.mulf %431, %435 : vector<8x128xf32>
    %437 = arith.truncf %436 : vector<8x128xf32> to vector<8x128xbf16>
    %438 = vector.extract_strided_slice %411 {offsets = [0, 0], sizes = [8, 128], strides = [1, 1]} : vector<8x512xf32> to vector<8x128xf32>
    %439 = arith.negf %438 : vector<8x128xf32>
    %440 = math.exp %439 : vector<8x128xf32>
    %cst_119 = arith.constant 1.000000e+00 : f32
    %441 = vector.broadcast %cst_119 : f32 to vector<8x128xf32>
    %442 = arith.addf %441, %440 : vector<8x128xf32>
    %443 = arith.divf %441, %442 : vector<8x128xf32>
    %444 = vector.extract_strided_slice %411 {offsets = [0, 128], sizes = [8, 128], strides = [1, 1]} : vector<8x512xf32> to vector<8x128xf32>
    %445 = arith.negf %444 : vector<8x128xf32>
    %446 = math.exp %445 : vector<8x128xf32>
    %cst_120 = arith.constant 1.000000e+00 : f32
    %447 = vector.broadcast %cst_120 : f32 to vector<8x128xf32>
    %448 = arith.addf %447, %446 : vector<8x128xf32>
    %449 = arith.divf %447, %448 : vector<8x128xf32>
    %450 = vector.extract_strided_slice %411 {offsets = [0, 256], sizes = [8, 128], strides = [1, 1]} : vector<8x512xf32> to vector<8x128xf32>
    %451 = math.tanh %450 : vector<8x128xf32>
    %452 = vector.extract_strided_slice %411 {offsets = [0, 384], sizes = [8, 128], strides = [1, 1]} : vector<8x512xf32> to vector<8x128xf32>
    %453 = arith.negf %452 : vector<8x128xf32>
    %454 = math.exp %453 : vector<8x128xf32>
    %cst_121 = arith.constant 1.000000e+00 : f32
    %455 = vector.broadcast %cst_121 : f32 to vector<8x128xf32>
    %456 = arith.addf %455, %454 : vector<8x128xf32>
    %457 = arith.divf %455, %456 : vector<8x128xf32>
    %458 = arith.mulf %449, %387 : vector<8x128xf32>
    %459 = arith.mulf %443, %451 : vector<8x128xf32>
    %460 = arith.addf %458, %459 : vector<8x128xf32>
    %461 = math.tanh %460 : vector<8x128xf32>
    %462 = arith.mulf %457, %461 : vector<8x128xf32>
    %463 = arith.truncf %462 : vector<8x128xf32> to vector<8x128xbf16>
    %464 = vector.shape_cast %41 : vector<8x1xi1> to vector<8x1xi1>
    %465 = vector.broadcast %464 : vector<8x1xi1> to vector<8x128xi1>
    %466 = arith.select %465, %437, %378 : vector<8x128xi1>, vector<8x128xbf16>
    %467 = vector.shape_cast %41 : vector<8x1xi1> to vector<8x1xi1>
    %468 = vector.broadcast %467 : vector<8x1xi1> to vector<8x128xi1>
    %469 = arith.select %468, %434, %381 : vector<8x128xi1>, vector<8x128xf32>
    %470 = vector.shape_cast %39 : vector<8x1xi1> to vector<8x1xi1>
    %471 = vector.broadcast %470 : vector<8x1xi1> to vector<8x128xi1>
    %472 = arith.select %471, %463, %384 : vector<8x128xi1>, vector<8x128xbf16>
    %473 = vector.shape_cast %39 : vector<8x1xi1> to vector<8x1xi1>
    %474 = vector.broadcast %473 : vector<8x1xi1> to vector<8x128xi1>
    %475 = arith.select %474, %460, %387 : vector<8x128xi1>, vector<8x128xf32>
    %cst_122 = arith.constant 0.000000e+00 : bf16
    %476 = vector.shape_cast %41 : vector<8x1xi1> to vector<8x1xi1>
    %477 = vector.broadcast %476 : vector<8x1xi1> to vector<8x128xi1>
    %478 = vector.broadcast %cst_122 : bf16 to vector<8x128xbf16>
    %479 = arith.select %477, %466, %478 : vector<8x128xi1>, vector<8x128xbf16>
    %480 = arith.extf %479 : vector<8x128xbf16> to vector<8x128xf32>
    %c4_123 = arith.constant 4 : index
    %c0_124 = arith.constant 0 : index
    %c0_125 = arith.constant 0 : index
    %481 = vector.load %arg12[%c4_123, %c0_124, %c0_125] : memref<8x8x256xf32, #tpu.memory_space<vmem>>, vector<1x8x128xf32>
    %482 = vector.shape_cast %481 : vector<1x8x128xf32> to vector<8x128xf32>
    %483 = vector.shape_cast %480 : vector<8x128xf32> to vector<1x8x128xf32>
    tpu.vector_store %arg12[%c4_123, %c0_124, %c0_125], %483 {strides = array<i32>} : memref<8x8x256xf32, #tpu.memory_space<vmem>>, vector<1x8x128xf32>,
    %cst_126 = arith.constant 0.000000e+00 : bf16
    %484 = vector.shape_cast %39 : vector<8x1xi1> to vector<8x1xi1>
    %485 = vector.broadcast %484 : vector<8x1xi1> to vector<8x128xi1>
    %486 = vector.broadcast %cst_126 : bf16 to vector<8x128xbf16>
    %487 = arith.select %485, %472, %486 : vector<8x128xi1>, vector<8x128xbf16>
    %488 = arith.extf %487 : vector<8x128xbf16> to vector<8x128xf32>
    %c3_127 = arith.constant 3 : index
    %c0_128 = arith.constant 0 : index
    %c128_129 = arith.constant 128 : index
    %489 = vector.load %arg12[%c3_127, %c0_128, %c128_129] : memref<8x8x256xf32, #tpu.memory_space<vmem>>, vector<1x8x128xf32>
    %490 = vector.shape_cast %489 : vector<1x8x128xf32> to vector<8x128xf32>
    %491 = vector.shape_cast %488 : vector<8x128xf32> to vector<1x8x128xf32>
    tpu.vector_store %arg12[%c3_127, %c0_128, %c128_129], %491 {strides = array<i32>} : memref<8x8x256xf32, #tpu.memory_space<vmem>>, vector<1x8x128xf32>,
    %c0_130 = arith.constant 0 : index
    %c0_131 = arith.constant 0 : index
    %492 = vector.load %arg8[%c0_130, %c0_131] : memref<128x512xbf16, #tpu.memory_space<vmem>>, vector<128x512xbf16>
    %cst_132 = arith.constant dense<0.000000e+00> : vector<8x512xf32>
    %493 = tpu.matmul %466, %492, %cst_132 {dimension_numbers = #tpu.dot_dimension_numbers<[1], [0], [0], [1], [0, 0, 1, 1], [], []>} : vector<8x128xbf16>, vector<128x512xbf16>, vector<8x512xf32> -> vector<8x512xf32>
    %c0_133 = arith.constant 0 : index
    %c0_134 = arith.constant 0 : index
    %494 = vector.load %arg9[%c0_133, %c0_134] : memref<128x512xbf16, #tpu.memory_space<vmem>>, vector<128x512xbf16>
    %cst_135 = arith.constant dense<0.000000e+00> : vector<8x512xf32>
    %495 = tpu.matmul %472, %494, %cst_135 {dimension_numbers = #tpu.dot_dimension_numbers<[1], [0], [0], [1], [0, 0, 1, 1], [], []>} : vector<8x128xbf16>, vector<128x512xbf16>, vector<8x512xf32> -> vector<8x512xf32>
    %c40_136 = arith.constant 40 : index
    %c0_137 = arith.constant 0 : index
    %496 = vector.load %arg15[%c40_136, %c0_137] : memref<64x1024xf32, #tpu.memory_space<vmem>>, vector<8x512xf32>
    %497 = arith.addf %496, %493 : vector<8x512xf32>
    %c16_138 = arith.constant 16 : index
    %c512_139 = arith.constant 512 : index
    %498 = vector.load %arg15[%c16_138, %c512_139] : memref<64x1024xf32, #tpu.memory_space<vmem>>, vector<8x512xf32>
    %499 = arith.addf %498, %495 : vector<8x512xf32>
    %500 = vector.extract_strided_slice %497 {offsets = [0, 0], sizes = [8, 128], strides = [1, 1]} : vector<8x512xf32> to vector<8x128xf32>
    %501 = arith.negf %500 : vector<8x128xf32>
    %502 = math.exp %501 : vector<8x128xf32>
    %cst_140 = arith.constant 1.000000e+00 : f32
    %503 = vector.broadcast %cst_140 : f32 to vector<8x128xf32>
    %504 = arith.addf %503, %502 : vector<8x128xf32>
    %505 = arith.divf %503, %504 : vector<8x128xf32>
    %506 = vector.extract_strided_slice %497 {offsets = [0, 128], sizes = [8, 128], strides = [1, 1]} : vector<8x512xf32> to vector<8x128xf32>
    %507 = arith.negf %506 : vector<8x128xf32>
    %508 = math.exp %507 : vector<8x128xf32>
    %cst_141 = arith.constant 1.000000e+00 : f32
    %509 = vector.broadcast %cst_141 : f32 to vector<8x128xf32>
    %510 = arith.addf %509, %508 : vector<8x128xf32>
    %511 = arith.divf %509, %510 : vector<8x128xf32>
    %512 = vector.extract_strided_slice %497 {offsets = [0, 256], sizes = [8, 128], strides = [1, 1]} : vector<8x512xf32> to vector<8x128xf32>
    %513 = math.tanh %512 : vector<8x128xf32>
    %514 = vector.extract_strided_slice %497 {offsets = [0, 384], sizes = [8, 128], strides = [1, 1]} : vector<8x512xf32> to vector<8x128xf32>
    %515 = arith.negf %514 : vector<8x128xf32>
    %516 = math.exp %515 : vector<8x128xf32>
    %cst_142 = arith.constant 1.000000e+00 : f32
    %517 = vector.broadcast %cst_142 : f32 to vector<8x128xf32>
    %518 = arith.addf %517, %516 : vector<8x128xf32>
    %519 = arith.divf %517, %518 : vector<8x128xf32>
    %520 = arith.mulf %511, %469 : vector<8x128xf32>
    %521 = arith.mulf %505, %513 : vector<8x128xf32>
    %522 = arith.addf %520, %521 : vector<8x128xf32>
    %523 = math.tanh %522 : vector<8x128xf32>
    %524 = arith.mulf %519, %523 : vector<8x128xf32>
    %525 = arith.truncf %524 : vector<8x128xf32> to vector<8x128xbf16>
    %526 = vector.extract_strided_slice %499 {offsets = [0, 0], sizes = [8, 128], strides = [1, 1]} : vector<8x512xf32> to vector<8x128xf32>
    %527 = arith.negf %526 : vector<8x128xf32>
    %528 = math.exp %527 : vector<8x128xf32>
    %cst_143 = arith.constant 1.000000e+00 : f32
    %529 = vector.broadcast %cst_143 : f32 to vector<8x128xf32>
    %530 = arith.addf %529, %528 : vector<8x128xf32>
    %531 = arith.divf %529, %530 : vector<8x128xf32>
    %532 = vector.extract_strided_slice %499 {offsets = [0, 128], sizes = [8, 128], strides = [1, 1]} : vector<8x512xf32> to vector<8x128xf32>
    %533 = arith.negf %532 : vector<8x128xf32>
    %534 = math.exp %533 : vector<8x128xf32>
    %cst_144 = arith.constant 1.000000e+00 : f32
    %535 = vector.broadcast %cst_144 : f32 to vector<8x128xf32>
    %536 = arith.addf %535, %534 : vector<8x128xf32>
    %537 = arith.divf %535, %536 : vector<8x128xf32>
    %538 = vector.extract_strided_slice %499 {offsets = [0, 256], sizes = [8, 128], strides = [1, 1]} : vector<8x512xf32> to vector<8x128xf32>
    %539 = math.tanh %538 : vector<8x128xf32>
    %540 = vector.extract_strided_slice %499 {offsets = [0, 384], sizes = [8, 128], strides = [1, 1]} : vector<8x512xf32> to vector<8x128xf32>
    %541 = arith.negf %540 : vector<8x128xf32>
    %542 = math.exp %541 : vector<8x128xf32>
    %cst_145 = arith.constant 1.000000e+00 : f32
    %543 = vector.broadcast %cst_145 : f32 to vector<8x128xf32>
    %544 = arith.addf %543, %542 : vector<8x128xf32>
    %545 = arith.divf %543, %544 : vector<8x128xf32>
    %546 = arith.mulf %537, %475 : vector<8x128xf32>
    %547 = arith.mulf %531, %539 : vector<8x128xf32>
    %548 = arith.addf %546, %547 : vector<8x128xf32>
    %549 = math.tanh %548 : vector<8x128xf32>
    %550 = arith.mulf %545, %549 : vector<8x128xf32>
    %551 = arith.truncf %550 : vector<8x128xf32> to vector<8x128xbf16>
    %552 = vector.shape_cast %43 : vector<8x1xi1> to vector<8x1xi1>
    %553 = vector.broadcast %552 : vector<8x1xi1> to vector<8x128xi1>
    %554 = arith.select %553, %525, %466 : vector<8x128xi1>, vector<8x128xbf16>
    %555 = vector.shape_cast %43 : vector<8x1xi1> to vector<8x1xi1>
    %556 = vector.broadcast %555 : vector<8x1xi1> to vector<8x128xi1>
    %557 = arith.select %556, %522, %469 : vector<8x128xi1>, vector<8x128xf32>
    %558 = vector.shape_cast %37 : vector<8x1xi1> to vector<8x1xi1>
    %559 = vector.broadcast %558 : vector<8x1xi1> to vector<8x128xi1>
    %560 = arith.select %559, %551, %472 : vector<8x128xi1>, vector<8x128xbf16>
    %561 = vector.shape_cast %37 : vector<8x1xi1> to vector<8x1xi1>
    %562 = vector.broadcast %561 : vector<8x1xi1> to vector<8x128xi1>
    %563 = arith.select %562, %548, %475 : vector<8x128xi1>, vector<8x128xf32>
    %cst_146 = arith.constant 0.000000e+00 : bf16
    %564 = vector.shape_cast %43 : vector<8x1xi1> to vector<8x1xi1>
    %565 = vector.broadcast %564 : vector<8x1xi1> to vector<8x128xi1>
    %566 = vector.broadcast %cst_146 : bf16 to vector<8x128xbf16>
    %567 = arith.select %565, %554, %566 : vector<8x128xi1>, vector<8x128xbf16>
    %568 = arith.extf %567 : vector<8x128xbf16> to vector<8x128xf32>
    %c5_147 = arith.constant 5 : index
    %c0_148 = arith.constant 0 : index
    %c0_149 = arith.constant 0 : index
    %569 = vector.load %arg12[%c5_147, %c0_148, %c0_149] : memref<8x8x256xf32, #tpu.memory_space<vmem>>, vector<1x8x128xf32>
    %570 = vector.shape_cast %569 : vector<1x8x128xf32> to vector<8x128xf32>
    %571 = vector.shape_cast %568 : vector<8x128xf32> to vector<1x8x128xf32>
    tpu.vector_store %arg12[%c5_147, %c0_148, %c0_149], %571 {strides = array<i32>} : memref<8x8x256xf32, #tpu.memory_space<vmem>>, vector<1x8x128xf32>,
    %cst_150 = arith.constant 0.000000e+00 : bf16
    %572 = vector.shape_cast %37 : vector<8x1xi1> to vector<8x1xi1>
    %573 = vector.broadcast %572 : vector<8x1xi1> to vector<8x128xi1>
    %574 = vector.broadcast %cst_150 : bf16 to vector<8x128xbf16>
    %575 = arith.select %573, %560, %574 : vector<8x128xi1>, vector<8x128xbf16>
    %576 = arith.extf %575 : vector<8x128xbf16> to vector<8x128xf32>
    %c2_151 = arith.constant 2 : index
    %c0_152 = arith.constant 0 : index
    %c128_153 = arith.constant 128 : index
    %577 = vector.load %arg12[%c2_151, %c0_152, %c128_153] : memref<8x8x256xf32, #tpu.memory_space<vmem>>, vector<1x8x128xf32>
    %578 = vector.shape_cast %577 : vector<1x8x128xf32> to vector<8x128xf32>
    %579 = vector.shape_cast %576 : vector<8x128xf32> to vector<1x8x128xf32>
    tpu.vector_store %arg12[%c2_151, %c0_152, %c128_153], %579 {strides = array<i32>} : memref<8x8x256xf32, #tpu.memory_space<vmem>>, vector<1x8x128xf32>,
    %c0_154 = arith.constant 0 : index
    %c0_155 = arith.constant 0 : index
    %580 = vector.load %arg8[%c0_154, %c0_155] : memref<128x512xbf16, #tpu.memory_space<vmem>>, vector<128x512xbf16>
    %cst_156 = arith.constant dense<0.000000e+00> : vector<8x512xf32>
    %581 = tpu.matmul %554, %580, %cst_156 {dimension_numbers = #tpu.dot_dimension_numbers<[1], [0], [0], [1], [0, 0, 1, 1], [], []>} : vector<8x128xbf16>, vector<128x512xbf16>, vector<8x512xf32> -> vector<8x512xf32>
    %c0_157 = arith.constant 0 : index
    %c0_158 = arith.constant 0 : index
    %582 = vector.load %arg9[%c0_157, %c0_158] : memref<128x512xbf16, #tpu.memory_space<vmem>>, vector<128x512xbf16>
    %cst_159 = arith.constant dense<0.000000e+00> : vector<8x512xf32>
    %583 = tpu.matmul %560, %582, %cst_159 {dimension_numbers = #tpu.dot_dimension_numbers<[1], [0], [0], [1], [0, 0, 1, 1], [], []>} : vector<8x128xbf16>, vector<128x512xbf16>, vector<8x512xf32> -> vector<8x512xf32>
    %c48_160 = arith.constant 48 : index
    %c0_161 = arith.constant 0 : index
    %584 = vector.load %arg15[%c48_160, %c0_161] : memref<64x1024xf32, #tpu.memory_space<vmem>>, vector<8x512xf32>
    %585 = arith.addf %584, %581 : vector<8x512xf32>
    %c8_162 = arith.constant 8 : index
    %c512_163 = arith.constant 512 : index
    %586 = vector.load %arg15[%c8_162, %c512_163] : memref<64x1024xf32, #tpu.memory_space<vmem>>, vector<8x512xf32>
    %587 = arith.addf %586, %583 : vector<8x512xf32>
    %588 = vector.extract_strided_slice %585 {offsets = [0, 0], sizes = [8, 128], strides = [1, 1]} : vector<8x512xf32> to vector<8x128xf32>
    %589 = arith.negf %588 : vector<8x128xf32>
    %590 = math.exp %589 : vector<8x128xf32>
    %cst_164 = arith.constant 1.000000e+00 : f32
    %591 = vector.broadcast %cst_164 : f32 to vector<8x128xf32>
    %592 = arith.addf %591, %590 : vector<8x128xf32>
    %593 = arith.divf %591, %592 : vector<8x128xf32>
    %594 = vector.extract_strided_slice %585 {offsets = [0, 128], sizes = [8, 128], strides = [1, 1]} : vector<8x512xf32> to vector<8x128xf32>
    %595 = arith.negf %594 : vector<8x128xf32>
    %596 = math.exp %595 : vector<8x128xf32>
    %cst_165 = arith.constant 1.000000e+00 : f32
    %597 = vector.broadcast %cst_165 : f32 to vector<8x128xf32>
    %598 = arith.addf %597, %596 : vector<8x128xf32>
    %599 = arith.divf %597, %598 : vector<8x128xf32>
    %600 = vector.extract_strided_slice %585 {offsets = [0, 256], sizes = [8, 128], strides = [1, 1]} : vector<8x512xf32> to vector<8x128xf32>
    %601 = math.tanh %600 : vector<8x128xf32>
    %602 = vector.extract_strided_slice %585 {offsets = [0, 384], sizes = [8, 128], strides = [1, 1]} : vector<8x512xf32> to vector<8x128xf32>
    %603 = arith.negf %602 : vector<8x128xf32>
    %604 = math.exp %603 : vector<8x128xf32>
    %cst_166 = arith.constant 1.000000e+00 : f32
    %605 = vector.broadcast %cst_166 : f32 to vector<8x128xf32>
    %606 = arith.addf %605, %604 : vector<8x128xf32>
    %607 = arith.divf %605, %606 : vector<8x128xf32>
    %608 = arith.mulf %599, %557 : vector<8x128xf32>
    %609 = arith.mulf %593, %601 : vector<8x128xf32>
    %610 = arith.addf %608, %609 : vector<8x128xf32>
    %611 = math.tanh %610 : vector<8x128xf32>
    %612 = arith.mulf %607, %611 : vector<8x128xf32>
    %613 = arith.truncf %612 : vector<8x128xf32> to vector<8x128xbf16>
    %614 = vector.extract_strided_slice %587 {offsets = [0, 0], sizes = [8, 128], strides = [1, 1]} : vector<8x512xf32> to vector<8x128xf32>
    %615 = arith.negf %614 : vector<8x128xf32>
    %616 = math.exp %615 : vector<8x128xf32>
    %cst_167 = arith.constant 1.000000e+00 : f32
    %617 = vector.broadcast %cst_167 : f32 to vector<8x128xf32>
    %618 = arith.addf %617, %616 : vector<8x128xf32>
    %619 = arith.divf %617, %618 : vector<8x128xf32>
    %620 = vector.extract_strided_slice %587 {offsets = [0, 128], sizes = [8, 128], strides = [1, 1]} : vector<8x512xf32> to vector<8x128xf32>
    %621 = arith.negf %620 : vector<8x128xf32>
    %622 = math.exp %621 : vector<8x128xf32>
    %cst_168 = arith.constant 1.000000e+00 : f32
    %623 = vector.broadcast %cst_168 : f32 to vector<8x128xf32>
    %624 = arith.addf %623, %622 : vector<8x128xf32>
    %625 = arith.divf %623, %624 : vector<8x128xf32>
    %626 = vector.extract_strided_slice %587 {offsets = [0, 256], sizes = [8, 128], strides = [1, 1]} : vector<8x512xf32> to vector<8x128xf32>
    %627 = math.tanh %626 : vector<8x128xf32>
    %628 = vector.extract_strided_slice %587 {offsets = [0, 384], sizes = [8, 128], strides = [1, 1]} : vector<8x512xf32> to vector<8x128xf32>
    %629 = arith.negf %628 : vector<8x128xf32>
    %630 = math.exp %629 : vector<8x128xf32>
    %cst_169 = arith.constant 1.000000e+00 : f32
    %631 = vector.broadcast %cst_169 : f32 to vector<8x128xf32>
    %632 = arith.addf %631, %630 : vector<8x128xf32>
    %633 = arith.divf %631, %632 : vector<8x128xf32>
    %634 = arith.mulf %625, %563 : vector<8x128xf32>
    %635 = arith.mulf %619, %627 : vector<8x128xf32>
    %636 = arith.addf %634, %635 : vector<8x128xf32>
    %637 = math.tanh %636 : vector<8x128xf32>
    %638 = arith.mulf %633, %637 : vector<8x128xf32>
    %639 = arith.truncf %638 : vector<8x128xf32> to vector<8x128xbf16>
    %640 = vector.shape_cast %45 : vector<8x1xi1> to vector<8x1xi1>
    %641 = vector.broadcast %640 : vector<8x1xi1> to vector<8x128xi1>
    %642 = arith.select %641, %613, %554 : vector<8x128xi1>, vector<8x128xbf16>
    %643 = vector.shape_cast %45 : vector<8x1xi1> to vector<8x1xi1>
    %644 = vector.broadcast %643 : vector<8x1xi1> to vector<8x128xi1>
    %645 = arith.select %644, %610, %557 : vector<8x128xi1>, vector<8x128xf32>
    %646 = vector.shape_cast %35 : vector<8x1xi1> to vector<8x1xi1>
    %647 = vector.broadcast %646 : vector<8x1xi1> to vector<8x128xi1>
    %648 = arith.select %647, %639, %560 : vector<8x128xi1>, vector<8x128xbf16>
    %649 = vector.shape_cast %35 : vector<8x1xi1> to vector<8x1xi1>
    %650 = vector.broadcast %649 : vector<8x1xi1> to vector<8x128xi1>
    %651 = arith.select %650, %636, %563 : vector<8x128xi1>, vector<8x128xf32>
    %cst_170 = arith.constant 0.000000e+00 : bf16
    %652 = vector.shape_cast %45 : vector<8x1xi1> to vector<8x1xi1>
    %653 = vector.broadcast %652 : vector<8x1xi1> to vector<8x128xi1>
    %654 = vector.broadcast %cst_170 : bf16 to vector<8x128xbf16>
    %655 = arith.select %653, %642, %654 : vector<8x128xi1>, vector<8x128xbf16>
    %656 = arith.extf %655 : vector<8x128xbf16> to vector<8x128xf32>
    %c6_171 = arith.constant 6 : index
    %c0_172 = arith.constant 0 : index
    %c0_173 = arith.constant 0 : index
    %657 = vector.load %arg12[%c6_171, %c0_172, %c0_173] : memref<8x8x256xf32, #tpu.memory_space<vmem>>, vector<1x8x128xf32>
    %658 = vector.shape_cast %657 : vector<1x8x128xf32> to vector<8x128xf32>
    %659 = vector.shape_cast %656 : vector<8x128xf32> to vector<1x8x128xf32>
    tpu.vector_store %arg12[%c6_171, %c0_172, %c0_173], %659 {strides = array<i32>} : memref<8x8x256xf32, #tpu.memory_space<vmem>>, vector<1x8x128xf32>,
    %cst_174 = arith.constant 0.000000e+00 : bf16
    %660 = vector.shape_cast %35 : vector<8x1xi1> to vector<8x1xi1>
    %661 = vector.broadcast %660 : vector<8x1xi1> to vector<8x128xi1>
    %662 = vector.broadcast %cst_174 : bf16 to vector<8x128xbf16>
    %663 = arith.select %661, %648, %662 : vector<8x128xi1>, vector<8x128xbf16>
    %664 = arith.extf %663 : vector<8x128xbf16> to vector<8x128xf32>
    %c1_175 = arith.constant 1 : index
    %c0_176 = arith.constant 0 : index
    %c128_177 = arith.constant 128 : index
    %665 = vector.load %arg12[%c1_175, %c0_176, %c128_177] : memref<8x8x256xf32, #tpu.memory_space<vmem>>, vector<1x8x128xf32>
    %666 = vector.shape_cast %665 : vector<1x8x128xf32> to vector<8x128xf32>
    %667 = vector.shape_cast %664 : vector<8x128xf32> to vector<1x8x128xf32>
    tpu.vector_store %arg12[%c1_175, %c0_176, %c128_177], %667 {strides = array<i32>} : memref<8x8x256xf32, #tpu.memory_space<vmem>>, vector<1x8x128xf32>,
    %c0_178 = arith.constant 0 : index
    %c0_179 = arith.constant 0 : index
    %668 = vector.load %arg8[%c0_178, %c0_179] : memref<128x512xbf16, #tpu.memory_space<vmem>>, vector<128x512xbf16>
    %cst_180 = arith.constant dense<0.000000e+00> : vector<8x512xf32>
    %669 = tpu.matmul %642, %668, %cst_180 {dimension_numbers = #tpu.dot_dimension_numbers<[1], [0], [0], [1], [0, 0, 1, 1], [], []>} : vector<8x128xbf16>, vector<128x512xbf16>, vector<8x512xf32> -> vector<8x512xf32>
    %c0_181 = arith.constant 0 : index
    %c0_182 = arith.constant 0 : index
    %670 = vector.load %arg9[%c0_181, %c0_182] : memref<128x512xbf16, #tpu.memory_space<vmem>>, vector<128x512xbf16>
    %cst_183 = arith.constant dense<0.000000e+00> : vector<8x512xf32>
    %671 = tpu.matmul %648, %670, %cst_183 {dimension_numbers = #tpu.dot_dimension_numbers<[1], [0], [0], [1], [0, 0, 1, 1], [], []>} : vector<8x128xbf16>, vector<128x512xbf16>, vector<8x512xf32> -> vector<8x512xf32>
    %c56_184 = arith.constant 56 : index
    %c0_185 = arith.constant 0 : index
    %672 = vector.load %arg15[%c56_184, %c0_185] : memref<64x1024xf32, #tpu.memory_space<vmem>>, vector<8x512xf32>
    %673 = arith.addf %672, %669 : vector<8x512xf32>
    %c0_186 = arith.constant 0 : index
    %c512_187 = arith.constant 512 : index
    %674 = vector.load %arg15[%c0_186, %c512_187] : memref<64x1024xf32, #tpu.memory_space<vmem>>, vector<8x512xf32>
    %675 = arith.addf %674, %671 : vector<8x512xf32>
    %676 = vector.extract_strided_slice %673 {offsets = [0, 0], sizes = [8, 128], strides = [1, 1]} : vector<8x512xf32> to vector<8x128xf32>
    %677 = arith.negf %676 : vector<8x128xf32>
    %678 = math.exp %677 : vector<8x128xf32>
    %cst_188 = arith.constant 1.000000e+00 : f32
    %679 = vector.broadcast %cst_188 : f32 to vector<8x128xf32>
    %680 = arith.addf %679, %678 : vector<8x128xf32>
    %681 = arith.divf %679, %680 : vector<8x128xf32>
    %682 = vector.extract_strided_slice %673 {offsets = [0, 128], sizes = [8, 128], strides = [1, 1]} : vector<8x512xf32> to vector<8x128xf32>
    %683 = arith.negf %682 : vector<8x128xf32>
    %684 = math.exp %683 : vector<8x128xf32>
    %cst_189 = arith.constant 1.000000e+00 : f32
    %685 = vector.broadcast %cst_189 : f32 to vector<8x128xf32>
    %686 = arith.addf %685, %684 : vector<8x128xf32>
    %687 = arith.divf %685, %686 : vector<8x128xf32>
    %688 = vector.extract_strided_slice %673 {offsets = [0, 256], sizes = [8, 128], strides = [1, 1]} : vector<8x512xf32> to vector<8x128xf32>
    %689 = math.tanh %688 : vector<8x128xf32>
    %690 = vector.extract_strided_slice %673 {offsets = [0, 384], sizes = [8, 128], strides = [1, 1]} : vector<8x512xf32> to vector<8x128xf32>
    %691 = arith.negf %690 : vector<8x128xf32>
    %692 = math.exp %691 : vector<8x128xf32>
    %cst_190 = arith.constant 1.000000e+00 : f32
    %693 = vector.broadcast %cst_190 : f32 to vector<8x128xf32>
    %694 = arith.addf %693, %692 : vector<8x128xf32>
    %695 = arith.divf %693, %694 : vector<8x128xf32>
    %696 = arith.mulf %687, %645 : vector<8x128xf32>
    %697 = arith.mulf %681, %689 : vector<8x128xf32>
    %698 = arith.addf %696, %697 : vector<8x128xf32>
    %699 = math.tanh %698 : vector<8x128xf32>
    %700 = arith.mulf %695, %699 : vector<8x128xf32>
    %701 = arith.truncf %700 : vector<8x128xf32> to vector<8x128xbf16>
    %702 = vector.extract_strided_slice %675 {offsets = [0, 0], sizes = [8, 128], strides = [1, 1]} : vector<8x512xf32> to vector<8x128xf32>
    %703 = arith.negf %702 : vector<8x128xf32>
    %704 = math.exp %703 : vector<8x128xf32>
    %cst_191 = arith.constant 1.000000e+00 : f32
    %705 = vector.broadcast %cst_191 : f32 to vector<8x128xf32>
    %706 = arith.addf %705, %704 : vector<8x128xf32>
    %707 = arith.divf %705, %706 : vector<8x128xf32>
    %708 = vector.extract_strided_slice %675 {offsets = [0, 128], sizes = [8, 128], strides = [1, 1]} : vector<8x512xf32> to vector<8x128xf32>
    %709 = arith.negf %708 : vector<8x128xf32>
    %710 = math.exp %709 : vector<8x128xf32>
    %cst_192 = arith.constant 1.000000e+00 : f32
    %711 = vector.broadcast %cst_192 : f32 to vector<8x128xf32>
    %712 = arith.addf %711, %710 : vector<8x128xf32>
    %713 = arith.divf %711, %712 : vector<8x128xf32>
    %714 = vector.extract_strided_slice %675 {offsets = [0, 256], sizes = [8, 128], strides = [1, 1]} : vector<8x512xf32> to vector<8x128xf32>
    %715 = math.tanh %714 : vector<8x128xf32>
    %716 = vector.extract_strided_slice %675 {offsets = [0, 384], sizes = [8, 128], strides = [1, 1]} : vector<8x512xf32> to vector<8x128xf32>
    %717 = arith.negf %716 : vector<8x128xf32>
    %718 = math.exp %717 : vector<8x128xf32>
    %cst_193 = arith.constant 1.000000e+00 : f32
    %719 = vector.broadcast %cst_193 : f32 to vector<8x128xf32>
    %720 = arith.addf %719, %718 : vector<8x128xf32>
    %721 = arith.divf %719, %720 : vector<8x128xf32>
    %722 = arith.mulf %713, %651 : vector<8x128xf32>
    %723 = arith.mulf %707, %715 : vector<8x128xf32>
    %724 = arith.addf %722, %723 : vector<8x128xf32>
    %725 = math.tanh %724 : vector<8x128xf32>
    %726 = arith.mulf %721, %725 : vector<8x128xf32>
    %727 = arith.truncf %726 : vector<8x128xf32> to vector<8x128xbf16>
    %728 = vector.shape_cast %47 : vector<8x1xi1> to vector<8x1xi1>
    %729 = vector.broadcast %728 : vector<8x1xi1> to vector<8x128xi1>
    %730 = arith.select %729, %701, %642 : vector<8x128xi1>, vector<8x128xbf16>
    %731 = vector.shape_cast %47 : vector<8x1xi1> to vector<8x1xi1>
    %732 = vector.broadcast %731 : vector<8x1xi1> to vector<8x128xi1>
    %733 = arith.select %732, %698, %645 : vector<8x128xi1>, vector<8x128xf32>
    %734 = vector.shape_cast %33 : vector<8x1xi1> to vector<8x1xi1>
    %735 = vector.broadcast %734 : vector<8x1xi1> to vector<8x128xi1>
    %736 = arith.select %735, %727, %648 : vector<8x128xi1>, vector<8x128xbf16>
    %737 = vector.shape_cast %33 : vector<8x1xi1> to vector<8x1xi1>
    %738 = vector.broadcast %737 : vector<8x1xi1> to vector<8x128xi1>
    %739 = arith.select %738, %724, %651 : vector<8x128xi1>, vector<8x128xf32>
    %cst_194 = arith.constant 0.000000e+00 : bf16
    %740 = vector.shape_cast %47 : vector<8x1xi1> to vector<8x1xi1>
    %741 = vector.broadcast %740 : vector<8x1xi1> to vector<8x128xi1>
    %742 = vector.broadcast %cst_194 : bf16 to vector<8x128xbf16>
    %743 = arith.select %741, %730, %742 : vector<8x128xi1>, vector<8x128xbf16>
    %744 = arith.extf %743 : vector<8x128xbf16> to vector<8x128xf32>
    %c7_195 = arith.constant 7 : index
    %c0_196 = arith.constant 0 : index
    %c0_197 = arith.constant 0 : index
    %745 = vector.load %arg12[%c7_195, %c0_196, %c0_197] : memref<8x8x256xf32, #tpu.memory_space<vmem>>, vector<1x8x128xf32>
    %746 = vector.shape_cast %745 : vector<1x8x128xf32> to vector<8x128xf32>
    %747 = vector.shape_cast %744 : vector<8x128xf32> to vector<1x8x128xf32>
    tpu.vector_store %arg12[%c7_195, %c0_196, %c0_197], %747 {strides = array<i32>} : memref<8x8x256xf32, #tpu.memory_space<vmem>>, vector<1x8x128xf32>,
    %cst_198 = arith.constant 0.000000e+00 : bf16
    %748 = vector.shape_cast %33 : vector<8x1xi1> to vector<8x1xi1>
    %749 = vector.broadcast %748 : vector<8x1xi1> to vector<8x128xi1>
    %750 = vector.broadcast %cst_198 : bf16 to vector<8x128xbf16>
    %751 = arith.select %749, %736, %750 : vector<8x128xi1>, vector<8x128xbf16>
    %752 = arith.extf %751 : vector<8x128xbf16> to vector<8x128xf32>
    %c0_199 = arith.constant 0 : index
    %c0_200 = arith.constant 0 : index
    %c128_201 = arith.constant 128 : index
    %753 = vector.load %arg12[%c0_199, %c0_200, %c128_201] : memref<8x8x256xf32, #tpu.memory_space<vmem>>, vector<1x8x128xf32>
    %754 = vector.shape_cast %753 : vector<1x8x128xf32> to vector<8x128xf32>
    %755 = vector.shape_cast %752 : vector<8x128xf32> to vector<1x8x128xf32>
    tpu.vector_store %arg12[%c0_199, %c0_200, %c128_201], %755 {strides = array<i32>} : memref<8x8x256xf32, #tpu.memory_space<vmem>>, vector<1x8x128xf32>,
    %756 = tpu.concatenate %733, %739 in 1 : vector<8x128xf32>, vector<8x128xf32> -> vector<8x256xf32>
    %757 = arith.truncf %756 : vector<8x256xf32> to vector<8x256xbf16>
    %c0_202 = arith.constant 0 : index
    %c0_203 = arith.constant 0 : index
    %758 = vector.load %arg11[%c0_202, %c0_203] : memref<256x128xbf16, #tpu.memory_space<vmem>>, vector<256x128xbf16>
    %cst_204 = arith.constant dense<0.000000e+00> : vector<8x128xf32>
    %759 = tpu.matmul %757, %758, %cst_204 {dimension_numbers = #tpu.dot_dimension_numbers<[1], [0], [0], [1], [0, 0, 1, 1], [], []>} : vector<8x256xbf16>, vector<256x128xbf16>, vector<8x128xf32> -> vector<8x128xf32>
    %c0_205 = arith.constant 0 : index
    %c0_206 = arith.constant 0 : index
    %760 = vector.load %arg13[%c0_205, %c0_206] : memref<8x128xf32, #tpu.memory_space<vmem>>, vector<8x128xf32>
    tpu.vector_store %arg13[%c0_205, %c0_206], %759 {strides = array<i32>} : memref<8x128xf32, #tpu.memory_space<vmem>>, vector<8x128xf32>,
    %761 = math.tanh %759 : vector<8x128xf32>
    %c0_207 = arith.constant 0 : index
    %c0_208 = arith.constant 0 : index
    %762 = vector.load %arg14[%c0_207, %c0_208] : memref<8x128xf32, #tpu.memory_space<vmem>>, vector<8x128xf32>
    tpu.vector_store %arg14[%c0_207, %c0_208], %761 {strides = array<i32>} : memref<8x128xf32, #tpu.memory_space<vmem>>, vector<8x128xf32>,
    return
  }
  func.func @transform_0(%arg0: i32) -> (i32, i32) {
    %c0_i32 = arith.constant 0 : i32
    %c0_i32_0 = arith.constant 0 : i32
    %c0_i32_1 = arith.constant 0 : i32
    return %c0_i32, %c0_i32_0 : i32, i32
  }
  func.func @transform_1(%arg0: i32) -> (i32, i32) {
    %c0_i32 = arith.constant 0 : i32
    %c0_i32_0 = arith.constant 0 : i32
    %c0_i32_1 = arith.constant 0 : i32
    return %c0_i32, %c0_i32_0 : i32, i32
  }
  func.func @transform_2(%arg0: i32) -> (i32, i32) {
    %c0_i32 = arith.constant 0 : i32
    %c0_i32_0 = arith.constant 0 : i32
    %c0_i32_1 = arith.constant 0 : i32
    return %c0_i32, %c0_i32_0 : i32, i32
  }
  func.func @transform_3(%arg0: i32) -> (i32, i32) {
    %c0_i32 = arith.constant 0 : i32
    %c0_i32_0 = arith.constant 0 : i32
    %c0_i32_1 = arith.constant 0 : i32
    return %c0_i32, %c0_i32_0 : i32, i32
  }
  func.func @transform_4(%arg0: i32) -> (i32, i32) {
    %c0_i32 = arith.constant 0 : i32
    %c0_i32_0 = arith.constant 0 : i32
    %c0_i32_1 = arith.constant 0 : i32
    return %c0_i32, %c0_i32_0 : i32, i32
  }
  func.func @transform_5(%arg0: i32) -> (i32, i32) {
    %c0_i32 = arith.constant 0 : i32
    %c0_i32_0 = arith.constant 0 : i32
    %c0_i32_1 = arith.constant 0 : i32
    return %c0_i32, %c0_i32_0 : i32, i32
  }
  func.func @transform_6(%arg0: i32) -> (i32, i32) {
    %c0_i32 = arith.constant 0 : i32
    %c0_i32_0 = arith.constant 0 : i32
    %c0_i32_1 = arith.constant 0 : i32
    return %c0_i32, %c0_i32_0 : i32, i32
  }
  func.func @transform_7(%arg0: i32) -> (i32, i32) {
    %c0_i32 = arith.constant 0 : i32
    %c0_i32_0 = arith.constant 0 : i32
    %c0_i32_1 = arith.constant 0 : i32
    return %c0_i32, %c0_i32_0 : i32, i32
  }
  func.func @transform_8(%arg0: i32) -> (i32, i32) {
    %c0_i32 = arith.constant 0 : i32
    %c0_i32_0 = arith.constant 0 : i32
    %c0_i32_1 = arith.constant 0 : i32
    return %c0_i32, %c0_i32_0 : i32, i32
  }
  func.func @transform_9(%arg0: i32) -> (i32, i32) {
    %c0_i32 = arith.constant 0 : i32
    %c0_i32_0 = arith.constant 0 : i32
    %c0_i32_1 = arith.constant 0 : i32
    return %c0_i32, %c0_i32_0 : i32, i32
  }
  func.func @transform_10(%arg0: i32) -> (i32, i32) {
    %c0_i32 = arith.constant 0 : i32
    %c0_i32_0 = arith.constant 0 : i32
    %c0_i32_1 = arith.constant 0 : i32
    return %c0_i32, %c0_i32_0 : i32, i32
  }
  func.func @transform_11(%arg0: i32) -> (i32, i32, i32) {
    %c0_i32 = arith.constant 0 : i32
    %c0_i32_0 = arith.constant 0 : i32
    %c0_i32_1 = arith.constant 0 : i32
    %c0_i32_2 = arith.constant 0 : i32
    return %c0_i32, %c0_i32_0, %c0_i32_1 : i32, i32, i32
  }
  func.func @transform_12(%arg0: i32) -> (i32, i32) {
    %c0_i32 = arith.constant 0 : i32
    %c0_i32_0 = arith.constant 0 : i32
    %c0_i32_1 = arith.constant 0 : i32
    return %c0_i32, %c0_i32_0 : i32, i32
  }
  func.func @transform_13(%arg0: i32) -> (i32, i32) {
    %c0_i32 = arith.constant 0 : i32
    %c0_i32_0 = arith.constant 0 : i32
    %c0_i32_1 = arith.constant 0 : i32
    return %c0_i32, %c0_i32_0 : i32, i32
  }
}

</mosaic_0001>

<bundles_post_ra>
// kernel: encoder_forward.1
= control target key start
LH: loop header
LB: loop body
LE: loop exit
PB: predicated region body
PF: predicated region fallthrough
CT: control target
= control target key end

     0   :  { %19 = vsyncpa [#allocation4], 0  ;;  %s11044_s0 = inlined_call_operand.vmem [shape: s32[8,1], index: 0, kind: input, shape index: {}]   ;;  %s11045_s1 = inlined_call_operand.vmem [shape: f32[64,128], index: 1, kind: input, shape index: {}]   ;;  %s11046_s2 = inlined_call_operand.vmem [shape: f32[64,128], index: 2, kind: input, shape index: {}]   ;;  %s11047_s3 = inlined_call_operand.vmem [shape: f32[64,1], index: 3, kind: input, shape index: {}]   ;;  %s11048_s4 = inlined_call_operand.vmem [shape: bf16[128,128], index: 4, kind: input, shape index: {}]   ;;  %s11049_s5 = inlined_call_operand.vmem [shape: bf16[128,128], index: 5, kind: input, shape index: {}]   ;;  %s11050_s6 = inlined_call_operand.vmem [shape: bf16[128,1024], index: 6, kind: input, shape index: {}]   ;;  %s11051_s7 = inlined_call_operand.vmem [shape: bf16[128,512], index: 7, kind: input, shape index: {}]   ;;  %s11052_s8 = inlined_call_operand.vmem [shape: bf16[128,512], index: 8, kind: input, shape index: {}]   ;;  %s11053_s9 = inlined_call_operand.vmem [shape: f32[1,1024], index: 9, kind: input, shape index: {}]   ;;  %s11054_s10 = inlined_call_operand.vmem [shape: bf16[256,128], index: 10, kind: input, shape index: {}]   ;;  %s11055_s11 = inlined_call_operand.vmem [shape: f32[8,8,256], index: 11, kind: output, shape index: {0}]   ;;  %s11056_s12 = inlined_call_operand.hbm [shape: f32[8,128], index: 12, kind: output, shape index: {1}]   ;;  %s11057_s13 = inlined_call_operand.hbm [shape: f32[8,128], index: 13, kind: output, shape index: {2}]  }
   0x1   :  { %v7282_v0 = vld [vmem:[%s11048_s4] sm:$0xff]   ;;  %v7283_v1 = vld [vmem:[%s11048_s4 + $0x8] sm:$0xff]   ;;  %v7284_v2 = vld [vmem:[%s11048_s4 + $0x10] sm:$0xff]  }
   0x2   :  { %7229 = vmatprep.subr.bf16.mxu0 %v7282_v0  ;;  %v7285_v3 = vld [vmem:[%s11048_s4 + $0x18] sm:$0xff]   ;;  %v44_v4 = vld [vmem:[%s11045_s1] sm:$0xff]  ;;  %v45_v5 = vld [vmem:[%s11045_s1 + $0x8] sm:$0xff] }
   0x3   :  { %7230 = vmatpush3.bf16.msra.mxu0 %v7282_v0  ;;  %v52_v6 = vpack.c.bf16 %v45_v5, %v44_v4  ;;  %v7286_v7 = vld [vmem:[%s11048_s4 + $0x20] sm:$0xff]   ;;  %v7287_v8 = vld [vmem:[%s11048_s4 + $0x28] sm:$0xff]   ;;  %v7288_v9 = vld [vmem:[%s11048_s4 + $0x30] sm:$0xff]  }
   0x4   :  { %7231 = vmatprep.subr.bf16.mxu0 %v7283_v1  ;;  %v7289_v10 = vld [vmem:[%s11048_s4 + $0x38] sm:$0xff]   ;;  %v46_v11 = vld [vmem:[%s11045_s1 + $0x10] sm:$0xff]  ;;  %v48_v13 = vld [vmem:[%s11045_s1 + $0x20] sm:$0xff] }
   0x5   :  { %7245 = vmatprep.mubr.bf16.mxu0 %v52_v6  ;;  %v47_v12 = vld [vmem:[%s11045_s1 + $0x18] sm:$0xff]  ;;  %v49_v14 = vld [vmem:[%s11045_s1 + $0x28] sm:$0xff]  ;;  %v50_v17 = vld [vmem:[%s11045_s1 + $0x30] sm:$0xff] }
   0x6   :  { %v53_v15 = vpack.c.bf16 %v47_v12, %v46_v11  ;;  %v54_v16 = vpack.c.bf16 %v49_v14, %v48_v13  ;;  %v51_v18 = vld [vmem:[%s11045_s1 + $0x38] sm:$0xff] }
   0x7   :  { %7232 = vmatpush3.bf16.msra.mxu0 %v7283_v1  ;;  %v55_v19 = vpack.c.bf16 %v51_v18, %v50_v17 }
   0x8   :  { %7233 = vmatprep.subr.bf16.mxu0 %v7284_v2 }
   0xb   :  { %7234 = vmatpush3.bf16.msra.mxu0 %v7284_v2 }
   0xc   :  { %7235 = vmatprep.subr.bf16.mxu0 %v7285_v3 }
   0xf   :  { %7236 = vmatpush3.bf16.msra.mxu0 %v7285_v3 }
  0x10   :  { %7237 = vmatprep.subr.bf16.mxu0 %v7286_v7 }
  0x13   :  { %7238 = vmatpush3.bf16.msra.mxu0 %v7286_v7 }
  0x14   :  { %7239 = vmatprep.subr.bf16.mxu0 %v7287_v8 }
  0x17   :  { %7240 = vmatpush3.bf16.msra.mxu0 %v7287_v8 }
  0x18   :  { %7241 = vmatprep.subr.bf16.mxu0 %v7288_v9 }
  0x1b   :  { %7242 = vmatpush3.bf16.msra.mxu0 %v7288_v9 }
  0x1c   :  { %7243 = vmatprep.subr.bf16.mxu0 %v7289_v10 }
  0x1f   :  { %7244 = vmatpush3.bf16.msra.mxu0 %v7289_v10 }
  0x22   :  { %7246 = vmatmul.mubr.bf16.vlgmr.msra.gmra.mrb[0].mxu0 %v53_v15 }
  0x23   :  { %7249 = vmatprep.mubr.bf16.mxu0 %v54_v16 }
  0x2a   :  { %7250 = vmatmul.mubr.bf16.gmra.mrb[4].mxu0 %v55_v19 }
  0x2b   :  { %20 = vsyncpa [#allocation6], 0  ;;  %v7290_v36 = vld [vmem:[%s11049_s5] sm:$0xff]   ;;  %v7291_v37 = vld [vmem:[%s11049_s5 + $0x8] sm:$0xff]   ;;  %v11058_v13 = vmov 0  }
  0x2c   :  { %7253 = vmatprep.subr.bf16.mxu1 %v7290_v36  ;;  %v7292_v38 = vld [vmem:[%s11049_s5 + $0x10] sm:$0xff]   ;;  %v7293_v6 = vld [vmem:[%s11049_s5 + $0x18] sm:$0xff]   ;;  %v7294_v8 = vld [vmem:[%s11049_s5 + $0x20] sm:$0xff]   ;;  %7281 = vset.pattern.permute.xlu1 %v11058_v13 }
  0x2d   :  { %7254 = vmatpush3.bf16.msra.mxu1 %v7290_v36  ;;  %v7295_v9 = vld [vmem:[%s11049_s5 + $0x28] sm:$0xff]   ;;  %v7296_v10 = vld [vmem:[%s11049_s5 + $0x30] sm:$0xff]   ;;  %v7297_v11 = vld [vmem:[%s11049_s5 + $0x38] sm:$0xff]   ;;  %7280 = vset.pattern.permute.xlu0 %v11058_v13 }
  0x2e   :  { %7255 = vmatprep.subr.bf16.mxu1 %v7291_v37  ;;  %v399_v12 = vld [vmem:[%s11047_s3 + $0x8] sm:$0xff]  ;;  %v398_v14 = vld [vmem:[%s11047_s3] sm:$0xff]  ;;  %932 = vmatprep.mubr.bf16.mxu0 %v11058_v13  ;;  %v400_v16 = vld [vmem:[%s11047_s3 + $0x10] sm:$0xff] }
  0x2f   :  { %v8216_v15 = vld [vmem:[%s11044_s0] sm:$0xff]  ;;  %v401_v18 = vld [vmem:[%s11047_s3 + $0x18] sm:$0xff]  ;;  %v404_v36 = vld [vmem:[%s11047_s3 + $0x30] sm:$0xff] }
  0x30   :  { %vm1264_vm0 = vcmp.gt.s32.totalorder %v8216_v15, 7  ;;  %vm1263_vm1 = vcmp.gt.s32.totalorder %v8216_v15, 6  ;;  %vm1262_vm2 = vcmp.gt.s32.totalorder %v8216_v15, 5  ;;  %vm1261_vm3 = vcmp.gt.s32.totalorder %v8216_v15, 4 }
  0x31   :  { %7256 = vmatpush3.bf16.msra.mxu1 %v7291_v37  ;;  %v1887_v17 = vsel %vm1264_vm0, 1, %v11058_v13  ;;  %v2522_v19 = vsel %vm1263_vm1, 1, %v11058_v13  ;;  %v490_v37 = vld [vmem:[%s11050_s6 + $0x80] sm:$0xff]  ;;  %vm1257_vm4 = vcmp.gt.s32.totalorder %v8216_v15, 0  ;;  %vm1258_vm5 = vcmp.gt.s32.totalorder %v8216_v15, 1 }
  0x32   :  { %7257 = vmatprep.subr.bf16.mxu1 %v7292_v38  ;;  %vm1259_vm6 = vcmp.gt.s32.totalorder %v8216_v15, 2  ;;  %vm1260_vm7 = vcmp.gt.s32.totalorder %v8216_v15, 3 }
  0x35   :  { %7258 = vmatpush3.bf16.msra.mxu1 %v7292_v38  ;;  %v494_v38 = vld [vmem:[%s11050_s6 + $0xa0] sm:$0xff] }
  0x36   :  { %7259 = vmatprep.subr.bf16.mxu1 %v7293_v6 }
  0x39   :  { %7260 = vmatpush3.bf16.msra.mxu1 %v7293_v6 }
  0x3a   :  { %7261 = vmatprep.subr.bf16.mxu1 %v7294_v8 }
  0x3d   :  { %7262 = vmatpush3.bf16.msra.mxu1 %v7294_v8 }
  0x3e   :  { %7263 = vmatprep.subr.bf16.mxu1 %v7295_v9 }
  0x41   :  { %7264 = vmatpush3.bf16.msra.mxu1 %v7295_v9 }
  0x42   :  { %7265 = vmatprep.subr.bf16.mxu1 %v7296_v10 }
  0x45   :  { %7266 = vmatpush3.bf16.msra.mxu1 %v7296_v10 }
  0x46   :  { %7267 = vmatprep.subr.bf16.mxu1 %v7297_v11 }
  0x49   :  { %7268 = vmatpush3.bf16.msra.mxu1 %v7297_v11 }
  0xf5   :  { %v7247_v20 = vpop.f32.mrb[0].mxu0 }
  0xf6   :  { %v187_v21 = vmul.f32 20.0, %v7247_v20  ;;  %v154_v22 = vpop.f32.mrb[1].mxu0  ;;  %v402_v20 = vld [vmem:[%s11047_s3 + $0x20] sm:$0xff] }
  0xf7   :  { %v185_v23 = vmul.f32 20.0, %v154_v22  ;;  %v7248_v24 = vpop.f32.mrb[2].mxu0  ;;  %v474_v22 = vld [vmem:[%s11050_s6] sm:$0xff] }
  0xf8   :  { %197 = vmax.xlane.f32.xlu1 %v187_v21  ;;  %v157_v25 = vpop.f32.mrb[3].mxu0  ;;  %v188_v26 = vmul.f32 20.0, %v7248_v24  ;;  %v8244_v24 = vld [vmem:[%s11050_s6 + $0x8] sm:$0xff] }
  0xf9   :  { %193 = vmax.xlane.f32.xlu0 %v185_v23  ;;  %v186_v27 = vmul.f32 20.0, %v157_v25 }
  0xfc   :  { %199 = vmax.xlane.f32.xlu1 %v188_v26 }
  0xfd   :  { %195 = vmax.xlane.f32.xlu0 %v186_v27  ;;  %v7251_v28 = vpop.f32.mrb[4].mxu0 }
  0xfe   :  { %v170_v29 = vpop.f32.mrb[5].mxu0  ;;  %v191_v33 = vmul.f32 20.0, %v7251_v28  ;;  %v403_v28 = vld [vmem:[%s11047_s3 + $0x28] sm:$0xff] }
  0xff   :  { %v189_v30 = vmul.f32 20.0, %v170_v29  ;;  %v7252_v31 = vpop.f32.mrb[6].mxu0 }
 0x100   :  { %v173_v32 = vpop.f32.mrb[7].mxu0  ;;  %v192_v35 = vmul.f32 20.0, %v7252_v31  ;;  %v3798_v31 = vsel %vm1261_vm3, 1, %v11058_v13 }
 0x101   :  { %v190_v34 = vmul.f32 20.0, %v173_v32  ;;  %201 = vmax.xlane.f32.xlu0 %v189_v30  ;;  %v482_v32 = vld [vmem:[%s11050_s6 + $0x40] sm:$0xff] }
 0x103   :  { %203 = vmax.xlane.f32.xlu1 %v190_v34 }
 0x105   :  { %205 = vmax.xlane.f32.xlu0 %v191_v33 }
 0x107   :  { %207 = vmax.xlane.f32.xlu1 %v192_v35 }
 0x185   :  { %v198_v39 = vpop.xlane.xlu1 %197 }
 0x186   :  { %v211_v40 = vsub.f32 %v187_v21, %v198_v39  ;;  %v194_v41 = vpop.xlane.xlu0 %193  ;;  %v3160_v21 = vsel %vm1262_vm2, 1, %v11058_v13  ;;  %v6545_v39 = vcombine.low %v490_v37, %v494_v38 }
 0x187   :  { %v209_v42 = vsub.f32 %v185_v23, %v194_v41  ;;  %v478_v23 = vld [vmem:[%s11050_s6 + $0x20] sm:$0xff]  ;;  %v405_v41 = vld [vmem:[%s11047_s3 + $0x38] sm:$0xff] }
 0x188   :  { %v221_v45 = vmul.f32 1.442695, %v211_v40  ;;  %v6529_v25 = vcombine.low %v474_v22, %v478_v23  ;;  %v6546_v40 = vcombine.high %v490_v37, %v494_v38  ;;  %v515_v38 = vld [vmem:[%s11050_s6 + $0x148] sm:$0xff] }
 0x189   :  { %v217_v43 = vmul.f32 1.442695, %v209_v42  ;;  %v200_v44 = vpop.xlane.xlu1 %199  ;;  %v498_v42 = vld [vmem:[%s11050_s6 + $0xc0] sm:$0xff] }
 0x18a   :  { %v212_v46 = vsub.f32 %v188_v26, %v200_v44  ;;  %v196_v47 = vpop.xlane.xlu0 %195  ;;  %v6530_v26 = vcombine.high %v474_v22, %v478_v23 }
 0x18b   :  { %7698 = vpow2.f32 %v217_v43  ;;  %v210_v48 = vsub.f32 %v186_v27, %v196_v47  ;;  %v8249_v27 = vld [vmem:[%s11050_s6 + $0x28] sm:$0xff]  ;;  %v502_v43 = vld [vmem:[%s11050_s6 + $0xe0] sm:$0xff]  ;;  %v2514_v47 = vsel %vm1258_vm5, 1, %v11058_v13 }
 0x18c   :  { %7700 = vpow2.f32 %v221_v45  ;;  %v223_v50 = vmul.f32 1.442695, %v212_v46  ;;  %v6531_v29 = vcombine.low %v8244_v24, %v8249_v27  ;;  %900 = vmatprep.subr.bf16.mxu0 %v6530_v26  ;;  %v6553_v44 = vcombine.low %v498_v42, %v502_v43  ;;  %v495_v26 = vld [vmem:[%s11050_s6 + $0xa8] sm:$0xff] }
 0x18d   :  { %v219_v49 = vmul.f32 1.442695, %v210_v48  ;;  %901 = vmatpush1.bf16.msra.mxu0 %v6529_v25  ;;  %v6554_v45 = vcombine.high %v498_v42, %v502_v43  ;;  %v1879_v46 = vsel %vm1257_vm4, 1, %v11058_v13  ;;  %v506_v48 = vld [vmem:[%s11050_s6 + $0x100] sm:$0xff]  ;;  %v491_v25 = vld [vmem:[%s11050_s6 + $0x88] sm:$0xff] }
 0x18e   :  { %v202_v51 = vpop.xlane.xlu0 %201  ;;  %v522_v43 = vld [vmem:[%s11050_s6 + $0x180] sm:$0xff] }
 0x18f   :  { %7702 = vpow2.f32 %v219_v49  ;;  %v213_v52 = vsub.f32 %v189_v30, %v202_v51  ;;  %v6532_v30 = vcombine.high %v8244_v24, %v8249_v27  ;;  %v510_v49 = vld [vmem:[%s11050_s6 + $0x120] sm:$0xff]  ;;  %v6547_v24 = vcombine.low %v491_v25, %v495_v26 }
 0x190   :  { %v204_v53 = vpop.xlane.xlu1 %203  ;;  %7704 = vpow2.f32 %v223_v50  ;;  %v6561_v50 = vcombine.low %v506_v48, %v510_v49  ;;  %v6562_v51 = vcombine.high %v506_v48, %v510_v49 }
 0x191   :  { %v225_v54 = vmul.f32 1.442695, %v213_v52  ;;  %v214_v55 = vsub.f32 %v190_v34, %v204_v53  ;;  %973 = vmatprep.subr.bf16.mxu1 %v6532_v30  ;;  %v3152_v52 = vsel %vm1259_vm6, 1, %v11058_v13  ;;  %v514_v53 = vld [vmem:[%s11050_s6 + $0x140] sm:$0xff] }
 0x192   :  { %v206_v56 = vpop.xlane.xlu0 %205 }
 0x193   :  { %7706 = vpow2.f32 %v225_v54  ;;  %v227_v57 = vmul.f32 1.442695, %v214_v55  ;;  %v215_v58 = vsub.f32 %v191_v33, %v206_v56  ;;  %v486_v33 = vld [vmem:[%s11050_s6 + $0x60] sm:$0xff] }
 0x194   :  { %v208_v59 = vpop.xlane.xlu1 %207  ;;  %v6537_v34 = vcombine.low %v482_v32, %v486_v33  ;;  %v518_v54 = vld [vmem:[%s11050_s6 + $0x160] sm:$0xff] }
 0x195   :  { %v8166_v60 = vpop.eup %7698  ;;  %v229_v61 = vmul.f32 1.442695, %v215_v58  ;;  %v216_v62 = vsub.f32 %v192_v35, %v208_v59  ;;  %7708 = vpow2.f32 %v227_v57  ;;  %v6538_v35 = vcombine.high %v482_v32, %v486_v33 }
 0x196   :  { %233 = vadd.xlane.f32.xlu0 %v8166_v60  ;;  %v8169_v0 = vpop.eup %7700  ;;  %v6569_v55 = vcombine.low %v514_v53, %v518_v54  ;;  %v6570_v56 = vcombine.high %v514_v53, %v518_v54  ;;  %v3790_v57 = vsel %vm1260_vm7, 1, %v11058_v13  ;;  %v6548_v33 = vcombine.high %v491_v25, %v495_v26  ;;  %v531_v53 = vld [vmem:[%s11050_s6 + $0x1c8] sm:$0xff] }
 0x197   :  { %7710 = vpow2.f32 %v229_v61  ;;  %v231_v63 = vmul.f32 1.442695, %v216_v62  ;;  %902 = vmatprep.subr.bf16.mxu0 %v6538_v35 }
 0x198   :  { %903 = vmatpush1.bf16.msra.mxu0 %v6537_v34 }
 0x199   :  { %v8171_v1 = vpop.eup %7702  ;;  %7712 = vpow2.f32 %v231_v63  ;;  %904 = vmatprep.subr.bf16.mxu0 %v6546_v40 }
 0x19a   :  { %237 = vadd.xlane.f32.xlu0 %v8169_v0  ;;  %235 = vadd.xlane.f32.xlu1 %v8171_v1  ;;  %v8175_v2 = vpop.eup %7704 }
 0x19c   :  { %905 = vmatpush1.bf16.msra.mxu0 %v6545_v39  ;;  %v519_v39 = vld [vmem:[%s11050_s6 + $0x168] sm:$0xff] }
 0x19d   :  { %v8177_v3 = vpop.eup %7706  ;;  %906 = vmatprep.subr.bf16.mxu0 %v6554_v45  ;;  %v6571_v42 = vcombine.low %v515_v38, %v519_v39  ;;  %v523_v45 = vld [vmem:[%s11050_s6 + $0x188] sm:$0xff] }
 0x19e   :  { %241 = vadd.xlane.f32.xlu0 %v8177_v3  ;;  %239 = vadd.xlane.f32.xlu1 %v8175_v2 }
 0x19f   :  { %v8181_v4 = vpop.eup %7708 }
 0x1a0   :  { %907 = vmatpush1.bf16.msra.mxu0 %v6553_v44  ;;  %v526_v44 = vld [vmem:[%s11050_s6 + $0x1a0] sm:$0xff] }
 0x1a1   :  { %v8183_v5 = vpop.eup %7710  ;;  %908 = vmatprep.subr.bf16.mxu0 %v6562_v51  ;;  %v6577_v48 = vcombine.low %v522_v43, %v526_v44  ;;  %v530_v51 = vld [vmem:[%s11050_s6 + $0x1c0] sm:$0xff] }
 0x1a2   :  { %245 = vadd.xlane.f32.xlu0 %v8183_v5  ;;  %243 = vadd.xlane.f32.xlu1 %v8181_v4 }
 0x1a3   :  { %v8190_v7 = vpop.eup %7712 }
 0x1a4   :  { %909 = vmatpush1.bf16.msra.mxu0 %v6561_v50 }
 0x1a5   :  { %910 = vmatprep.subr.bf16.mxu0 %v6570_v56 }
 0x1a6   :  { %247 = vadd.xlane.f32.xlu1 %v8190_v7 }
 0x1a8   :  { %911 = vmatpush1.bf16.msra.mxu0 %v6569_v55  ;;  %v535_v55 = vld [vmem:[%s11050_s6 + $0x1e8] sm:$0xff] }
 0x1b7   :  { %413 = vperm.xlu1 %7281, %v399_v12  }
 0x1b8   :  { %408 = vperm.xlu0 %7280, %v398_v14  }
 0x1bb   :  { %418 = vperm.xlu1 %7281, %v400_v16  }
 0x1bc   :  { %1889 = vperm.xlu0 %7280, %v1887_v17  }
 0x1bf   :  { %423 = vperm.xlu1 %7281, %v401_v18   ;;  %v483_v18 = vld [vmem:[%s11050_s6 + $0x48] sm:$0xff] }
 0x1c0   :  { %2524 = vperm.xlu0 %7280, %v2522_v19   ;;  %v487_v19 = vld [vmem:[%s11050_s6 + $0x68] sm:$0xff] }
 0x1c1   :  { %v6540_v23 = vcombine.high %v483_v18, %v487_v19 }
 0x1c3   :  { %428 = vperm.xlu1 %7281, %v402_v20  }
 0x1c4   :  { %3162 = vperm.xlu0 %7280, %v3160_v21  }
 0x1c7   :  { %433 = vperm.xlu1 %7281, %v403_v28  }
 0x1c8   :  { %3800 = vperm.xlu0 %7280, %v3798_v31  }
 0x1cb   :  { %438 = vperm.xlu1 %7281, %v404_v36   ;;  %v499_v36 = vld [vmem:[%s11050_s6 + $0xc8] sm:$0xff] }
 0x1cf   :  { %443 = vperm.xlu1 %7281, %v405_v41   ;;  %v6572_v41 = vcombine.high %v515_v38, %v519_v39  ;;  %v496_v39 = vld [vmem:[%s11050_s6 + $0xb0] sm:$0xff] }
 0x1d3   :  { %1881 = vperm.xlu1 %7281, %v1879_v46   ;;  %v6578_v46 = vcombine.high %v522_v43, %v526_v44  ;;  %v460_v43 = vld [vmem:[%s11046_s2 + $0x30] sm:$0xff] }
 0x1d5   :  { %912 = vmatprep.subr.bf16.mxu0 %v6578_v46  ;;  %v461_v46 = vld [vmem:[%s11046_s2 + $0x38] sm:$0xff] }
 0x1d6   :  { %913 = vmatpush1.bf16.msra.mxu0 %v6577_v48 }
 0x1d7   :  { %2516 = vperm.xlu1 %7281, %v2514_v47   ;;  %v527_v47 = vld [vmem:[%s11050_s6 + $0x1a8] sm:$0xff] }
 0x1d8   :  { %v6579_v49 = vcombine.low %v523_v45, %v527_v47  ;;  %v6580_v50 = vcombine.high %v523_v45, %v527_v47  ;;  %v458_v47 = vld [vmem:[%s11046_s2 + $0x20] sm:$0xff] }
 0x1db   :  { %3154 = vperm.xlu1 %7281, %v3152_v52   ;;  %v534_v52 = vld [vmem:[%s11050_s6 + $0x1e0] sm:$0xff] }
 0x1dc   :  { %v6586_v54 = vcombine.high %v530_v51, %v534_v52  ;;  %v6585_v56 = vcombine.low %v530_v51, %v534_v52 }
 0x1de   :  { %914 = vmatprep.subr.bf16.mxu0 %v6586_v54 }
 0x1df   :  { %3792 = vperm.xlu1 %7281, %v3790_v57   ;;  %v6587_v57 = vcombine.low %v531_v53, %v535_v55  ;;  %915 = vmatpush1.bf16.msra.mxu0 %v6585_v56  ;;  %v500_v56 = vld [vmem:[%s11050_s6 + $0xd0] sm:$0xff] }
 0x223   :  { %v234_v58 = vpop.xlane.xlu0 %233 }
 0x224   :  { %7714 = vrcp.f32 %v234_v58  ;;  %v6588_v58 = vcombine.high %v531_v53, %v535_v55 }
 0x227   :  { %v238_v59 = vpop.xlane.xlu0 %237  ;;  %v236_v61 = vpop.xlane.xlu1 %235 }
 0x228   :  { %7716 = vrcp.f32 %v236_v61  ;;  %v480_v61 = vld [vmem:[%s11050_s6 + $0x30] sm:$0xff] }
 0x229   :  { %7718 = vrcp.f32 %v238_v59  ;;  %v476_v59 = vld [vmem:[%s11050_s6 + $0x10] sm:$0xff] }
 0x22b   :  { %v242_v62 = vpop.xlane.xlu0 %241  ;;  %v240_v63 = vpop.xlane.xlu1 %239 }
 0x22c   :  { %7720 = vrcp.f32 %v240_v63  ;;  %v477_v63 = vld [vmem:[%s11050_s6 + $0x18] sm:$0xff] }
 0x22d   :  { %7722 = vrcp.f32 %v242_v62  ;;  %v6534_v62 = vcombine.high %v476_v59, %v480_v61 }
 0x22e   :  { %v7715_v9 = vpop.eup %7714 }
 0x22f   :  { %v246_v6 = vpop.xlane.xlu0 %245  ;;  %v244_v8 = vpop.xlane.xlu1 %243  ;;  %v257_v12 = vmul.f32 %v7715_v9, %v8166_v60  ;;  %1046 = vmatprep.subr.bf16.mxu0 %v6534_v62  ;;  %v505_v62 = vld [vmem:[%s11050_s6 + $0xf8] sm:$0xff] }
 0x230   :  { %7724 = vrcp.f32 %v244_v8  ;;  %v6533_v8 = vcombine.low %v476_v59, %v480_v61  ;;  %v504_v59 = vld [vmem:[%s11050_s6 + $0xf0] sm:$0xff]  ;;  %v501_v61 = vld [vmem:[%s11050_s6 + $0xd8] sm:$0xff] }
 0x231   :  { %7726 = vrcp.f32 %v246_v6  ;;  %v481_v6 = vld [vmem:[%s11050_s6 + $0x38] sm:$0xff] }
 0x232   :  { %v7717_v10 = vpop.eup %7716  ;;  %v6535_v9 = vcombine.low %v477_v63, %v481_v6 }
 0x233   :  { %v248_v11 = vpop.xlane.xlu1 %247  ;;  %v258_v14 = vmul.f32 %v7717_v10, %v8171_v1  ;;  %v7719_v15 = vpop.eup %7718  ;;  %v6536_v10 = vcombine.high %v477_v63, %v481_v6 }
 0x234   :  { %7728 = vrcp.f32 %v248_v11  ;;  %v259_v20 = vmul.f32 %v7719_v15, %v8169_v0 }
 0x235   :  { %v265_v16 = vpack.c.bf16 %v258_v14, %v257_v12 }
 0x236   :  { %v7721_v17 = vpop.eup %7720 }
 0x237   :  { %7269 = vmatprep.mubr.bf16.mxu1 %v265_v16  ;;  %v260_v21 = vmul.f32 %v7721_v17, %v8175_v2  ;;  %v7723_v22 = vpop.eup %7722  ;;  %v6539_v2 = vcombine.low %v483_v18, %v487_v19  ;;  %v414_v11 = vpop.permute.xlu1 %413 }
 0x238   :  { %v261_v30 = vmul.f32 %v7723_v22, %v8177_v3  ;;  %v503_v3 = vld [vmem:[%s11050_s6 + $0xe8] sm:$0xff]  ;;  %v409_v18 = vpop.permute.xlu0 %408 }
 0x239   :  { %v266_v60 = vpack.c.bf16 %v260_v21, %v259_v20  ;;  %v6556_v27 = vcombine.high %v499_v36, %v503_v3  ;;  %v456_v21 = vld [vmem:[%s11046_s2 + $0x10] sm:$0xff] }
 0x23a   :  { %v7725_v1 = vpop.eup %7724 }
 0x23b   :  { %v7727_v28 = vpop.eup %7726  ;;  %7270 = vmatmul.mubr.bf16.vlgmr.msra.gmra.mrb[0].mxu1 %v266_v60  ;;  %v262_v0 = vmul.f32 %v7725_v1, %v8181_v4  ;;  %v419_v12 = vpop.permute.xlu1 %418  ;;  %v454_v1 = vld [vmem:[%s11046_s2] sm:$0xff] }
 0x23c   :  { %974 = vmatpush1.bf16.msra.mxu1 %v6531_v29  ;;  %v263_v34 = vmul.f32 %v7727_v28, %v8183_v5  ;;  %v507_v5 = vld [vmem:[%s11050_s6 + $0x108] sm:$0xff]  ;;  %v6555_v29 = vcombine.low %v499_v36, %v503_v3 }
 0x23d   :  { %v267_v32 = vpack.c.bf16 %v262_v0, %v261_v30  ;;  %975 = vmatprep.subr.bf16.mxu1 %v6540_v23  ;;  %v457_v23 = vld [vmem:[%s11046_s2 + $0x18] sm:$0xff]  ;;  %v455_v28 = vld [vmem:[%s11046_s2 + $0x8] sm:$0xff] }
 0x23e   :  { %v7729_v31 = vpop.eup %7728 }
 0x23f   :  { %v264_v35 = vmul.f32 %v7729_v31, %v8190_v7  ;;  %7273 = vmatprep.mubr.bf16.mxu1 %v267_v32  ;;  %v511_v7 = vld [vmem:[%s11050_s6 + $0x128] sm:$0xff]  ;;  %v424_v14 = vpop.permute.xlu1 %423 }
 0x240   :  { %976 = vmatpush1.bf16.msra.mxu1 %v6539_v2  ;;  %v6564_v37 = vcombine.high %v507_v5, %v511_v7  ;;  %v6563_v40 = vcombine.low %v507_v5, %v511_v7  ;;  %v484_v2 = vld [vmem:[%s11050_s6 + $0x50] sm:$0xff] }
 0x241   :  { %v268_v4 = vpack.c.bf16 %v264_v35, %v263_v34  ;;  %977 = vmatprep.subr.bf16.mxu1 %v6548_v33  ;;  %v488_v33 = vld [vmem:[%s11050_s6 + $0x70] sm:$0xff]  ;;  %v485_v34 = vld [vmem:[%s11050_s6 + $0x58] sm:$0xff] }
 0x242   :  { %v489_v35 = vld [vmem:[%s11050_s6 + $0x78] sm:$0xff]  ;;  %v6542_v5 = vcombine.high %v484_v2, %v488_v33  ;;  %v6541_v51 = vcombine.low %v484_v2, %v488_v33  ;;  %v524_v2 = vld [vmem:[%s11050_s6 + $0x190] sm:$0xff] }
 0x243   :  { %7274 = vmatmul.mubr.bf16.gmra.mrb[4].mxu1 %v268_v4  ;;  %v429_v15 = vpop.permute.xlu1 %428  ;;  %v6544_v7 = vcombine.high %v485_v34, %v489_v35  ;;  %v6543_v52 = vcombine.low %v485_v34, %v489_v35  ;;  %v529_v33 = vld [vmem:[%s11050_s6 + $0x1b8] sm:$0xff] }
 0x244   :  { %978 = vmatpush1.bf16.msra.mxu1 %v6547_v24  ;;  %1005 = vmatprep.mubr.bf16.mxu1 %v11058_v13 }
 0x245   :  { %979 = vmatprep.subr.bf16.mxu1 %v6556_v27 }
 0x247   :  { %v434_v16 = vpop.permute.xlu1 %433 }
 0x248   :  { %980 = vmatpush1.bf16.msra.mxu1 %v6555_v29  ;;  %v492_v29 = vld [vmem:[%s11050_s6 + $0x90] sm:$0xff] }
 0x249   :  { %981 = vmatprep.subr.bf16.mxu1 %v6564_v37  ;;  %v6550_v54 = vcombine.high %v492_v29, %v496_v39 }
 0x24b   :  { %v439_v30 = vpop.permute.xlu1 %438 }
 0x24c   :  { %982 = vmatpush1.bf16.msra.mxu1 %v6563_v40  ;;  %v493_v40 = vld [vmem:[%s11050_s6 + $0x98] sm:$0xff] }
 0x24d   :  { %983 = vmatprep.subr.bf16.mxu1 %v6572_v41  ;;  %v497_v41 = vld [vmem:[%s11050_s6 + $0xb8] sm:$0xff] }
 0x24e   :  { %v6552_v55 = vcombine.high %v493_v40, %v497_v41 }
 0x250   :  { %984 = vmatpush1.bf16.msra.mxu1 %v6571_v42  ;;  %v444_v42 = vpop.permute.xlu1 %443 }
 0x251   :  { %985 = vmatprep.subr.bf16.mxu1 %v6580_v50  ;;  %v459_v50 = vld [vmem:[%s11046_s2 + $0x28] sm:$0xff] }
 0x254   :  { %986 = vmatpush1.bf16.msra.mxu1 %v6579_v49 }
 0x255   :  { %987 = vmatprep.subr.bf16.mxu1 %v6588_v58 }
 0x258   :  { %988 = vmatpush1.bf16.msra.mxu1 %v6587_v57 }
 0x259   :  { %1119 = vmatprep.subr.bf16.mxu1 %v6536_v10  ;;  %v6551_v10 = vcombine.low %v493_v40, %v497_v41 }
 0x30e   :  { %v7271_v17 = vpop.f32.mrb[0].mxu1 }
 0x30f   :  { %v448_v19 = vmul.f32 %v7271_v17, %v419_v12  ;;  %v367_v20 = vpop.f32.mrb[1].mxu1  ;;  %v6558_v12 = vcombine.high %v500_v56, %v504_v59  ;;  %v509_v17 = vld [vmem:[%s11050_s6 + $0x118] sm:$0xff] }
 0x310   :  { %v446_v22 = vmul.f32 %v409_v18, %v367_v20  ;;  %v7272_v60 = vpop.f32.mrb[2].mxu1  ;;  %v513_v18 = vld [vmem:[%s11050_s6 + $0x138] sm:$0xff]  ;;  %v6559_v20 = vcombine.low %v501_v61, %v505_v62 }
 0x311   :  { %v449_v25 = vmul.f32 %v7272_v60, %v424_v14  ;;  %v370_v26 = vpop.f32.mrb[3].mxu1  ;;  %v464_v31 = vadd.f32 %v456_v21, %v448_v19  ;;  %v6560_v14 = vcombine.high %v501_v61, %v505_v62  ;;  %v6557_v19 = vcombine.low %v500_v56, %v504_v59  ;;  %v516_v60 = vld [vmem:[%s11050_s6 + $0x150] sm:$0xff]  ;;  %v8635_v61 = vld [vmem:[%s11051_s7 + $0x88] ss:$16 sps:$4 sm:$0xff]  }
 0x312   :  { %v447_v0 = vmul.f32 %v414_v11, %v370_v26  ;;  %v462_v36 = vadd.f32 %v454_v1, %v446_v22  ;;  %v6568_v22 = vcombine.high %v509_v17, %v513_v18  ;;  %v517_v1 = vld [vmem:[%s11050_s6 + $0x158] sm:$0xff]  ;;  %v8604_v56 = vld [vmem:[%s11051_s7 + $0x60] ss:$16 sps:$4 sm:$0xff]   ;;  %v8642_v62 = vld [vmem:[%s11051_s7 + $0xa4] ss:$16 sps:$4 sm:$0xff]  }
 0x313   :  { %v465_v32 = vadd.f32 %v457_v23, %v449_v25  ;;  %v520_v23 = vld [vmem:[%s11050_s6 + $0x170] sm:$0xff]  ;;  %v521_v25 = vld [vmem:[%s11050_s6 + $0x178] sm:$0xff] }
 0x314   :  { %v463_v3 = vadd.f32 %v455_v28, %v447_v0  ;;  %v6567_v28 = vcombine.low %v509_v17, %v513_v18  ;;  %v6576_v0 = vcombine.high %v517_v1, %v521_v25  ;;  %v6573_v34 = vcombine.low %v516_v60, %v520_v23  ;;  %v8630_v59 = vld [vmem:[%s11051_s7 + $0x80] ss:$16 sps:$4 sm:$0xff]   ;;  %v8713_v18 = vld [vmem:[%s11051_s7 + $0xe8] ss:$16 sps:$4 sm:$0xff]  }
 0x315   :  { %v8405_v4 = vpack.c.bf16 %v465_v32, %v464_v31  ;;  %v528_v31 = vld [vmem:[%s11050_s6 + $0x1b0] sm:$0xff]  ;;  %v525_v32 = vld [vmem:[%s11050_s6 + $0x198] sm:$0xff]  ;;  %v6575_v35 = vcombine.low %v517_v1, %v521_v25 }
 0x316   :  { %v8407_v24 = vpack.c.bf16 %v463_v3, %v462_v36  ;;  %v7275_v27 = vpop.f32.mrb[4].mxu1  ;;  %v6582_v36 = vcombine.high %v524_v2, %v528_v31  ;;  %v6584_v3 = vcombine.high %v525_v32, %v529_v33  ;;  %v8708_v17 = vld [vmem:[%s11051_s7 + $0xe0] ss:$16 sps:$4 sm:$0xff]   ;;  %v8765_v1 = vld [vmem:[%s11052_s8 + $0x28] ss:$16 sps:$4 sm:$0xff]  }
 0x317   :  { %v452_v37 = vmul.f32 %v7275_v27, %v439_v30  ;;  %v383_v38 = vpop.f32.mrb[5].mxu1  ;;  %v6574_v30 = vcombine.high %v516_v60, %v520_v23  ;;  %v532_v27 = vld [vmem:[%s11050_s6 + $0x1d0] sm:$0xff]  ;;  %v8751_v60 = vld [vmem:[%s11052_s8 + $0x2c] ss:$16 sps:$4 sm:$0xff]  }
 0x318   :  { %v450_v44 = vmul.f32 %v429_v15, %v383_v38  ;;  %v7276_v45 = vpop.f32.mrb[6].mxu1  ;;  %933 = vmatmul.mubr.bf16.vlgmr.msra.gmra.mrb[8].mxu0 %v8407_v24  ;;  %1006 = vmatmul.mubr.bf16.vlgmr.msra.gmra.mrb[8].mxu1 %v8407_v24  ;;  %v508_v15 = vld [vmem:[%s11050_s6 + $0x110] sm:$0xff]  ;;  %v6583_v38 = vcombine.low %v525_v32, %v529_v33  ;;  %v8815_v32 = vld [vmem:[%s11052_s8 + $0x68] ss:$16 sps:$4 sm:$0xff]  }
 0x319   :  { %v453_v48 = vmul.f32 %v7276_v45, %v444_v42  ;;  %1047 = vmatpush1.bf16.msra.mxu0 %v6533_v8  ;;  %1120 = vmatpush1.bf16.msra.mxu1 %v6535_v9  ;;  %v386_v49 = vpop.f32.mrb[7].mxu1  ;;  %v468_v57 = vadd.f32 %v460_v43, %v452_v37  ;;  %v6549_v9 = vcombine.low %v492_v29, %v496_v39  ;;  %v537_v29 = vld [vmem:[%s11050_s6 + $0x1f8] sm:$0xff]  ;;  %v8514_v43 = vld [vmem:[%s11051_s7 + $0x4] ss:$16 sps:$4 sm:$0xff]   ;;  %v8526_v45 = vld [vmem:[%s11051_s7] ss:$16 sps:$4 sm:$0xff]  }
 0x31a   :  { %v451_v53 = vmul.f32 %v434_v16, %v386_v49  ;;  %1048 = vmatprep.subr.bf16.mxu0 %v6542_v5  ;;  %1121 = vmatprep.subr.bf16.mxu1 %v6544_v7  ;;  %v466_v63 = vadd.f32 %v458_v47, %v450_v44  ;;  %v512_v16 = vld [vmem:[%s11050_s6 + $0x130] sm:$0xff]  ;;  %v533_v7 = vld [vmem:[%s11050_s6 + $0x1d8] sm:$0xff]  ;;  %v6581_v37 = vcombine.low %v524_v2, %v528_v31 }
 0x31b   :  { %v469_v58 = vadd.f32 %v461_v46, %v453_v48  ;;  %942 = vmatprep.mubr.bf16.mxu0 %v11058_v13  ;;  %1015 = vmatprep.mubr.bf16.mxu1 %v11058_v13  ;;  %v6566_v21 = vcombine.high %v508_v15, %v512_v16  ;;  %v6565_v26 = vcombine.low %v508_v15, %v512_v16  ;;  %v536_v5 = vld [vmem:[%s11050_s6 + $0x1f0] sm:$0xff]  ;;  %v8519_v44 = vld [vmem:[%s11051_s7 + $0xc] ss:$16 sps:$4 sm:$0xff]   ;;  %v8531_v46 = vld [vmem:[%s11051_s7 + $0x8] ss:$16 sps:$4 sm:$0xff]   ;;  %s8037_s6 = smov [#allocation3]  }
 0x31c   :  { %v467_v6 = vadd.f32 %v459_v50, %v451_v53  ;;  %v6590_v39 = vcombine.high %v532_v27, %v536_v5  ;;  %v6592_v40 = vcombine.high %v533_v7, %v537_v29  ;;  %v6589_v41 = vcombine.low %v532_v27, %v536_v5  ;;  %v8538_v47 = vld [vmem:[%s11051_s7 + $0x24] ss:$16 sps:$4 sm:$0xff]   ;;  %v8543_v48 = vld [vmem:[%s11051_s7 + $0x2c] ss:$16 sps:$4 sm:$0xff]   ;;  %v8552_v49 = vld [vmem:[%s11051_s7 + $0x20] ss:$16 sps:$4 sm:$0xff]  }
 0x31d   :  { %v8449_v8 = vpack.c.bf16 %v469_v58, %v468_v57  ;;  %1049 = vmatpush1.bf16.msra.mxu0 %v6541_v51  ;;  %1122 = vmatpush1.bf16.msra.mxu1 %v6543_v52  ;;  %v6591_v42 = vcombine.low %v533_v7, %v537_v29  ;;  %v8557_v50 = vld [vmem:[%s11051_s7 + $0x28] ss:$16 sps:$4 sm:$0xff]   ;;  %v8569_v51 = vld [vmem:[%s11051_s7 + $0x4c] ss:$16 sps:$4 sm:$0xff]   ;;  %v8578_v52 = vld [vmem:[%s11051_s7 + $0x40] ss:$16 sps:$4 sm:$0xff]  }
 0x31e   :  { %v8451_v11 = vpack.c.bf16 %v467_v6, %v466_v63  ;;  %1050 = vmatprep.subr.bf16.mxu0 %v6550_v54  ;;  %1123 = vmatprep.subr.bf16.mxu1 %v6552_v55  ;;  %v8583_v53 = vld [vmem:[%s11051_s7 + $0x48] ss:$16 sps:$4 sm:$0xff]   ;;  %v8590_v54 = vld [vmem:[%s11051_s7 + $0x64] ss:$16 sps:$4 sm:$0xff]   ;;  %v8595_v55 = vld [vmem:[%s11051_s7 + $0x6c] ss:$16 sps:$4 sm:$0xff]  }
 0x31f   :  { %v8609_v57 = vld [vmem:[%s11051_s7 + $0x68] ss:$16 sps:$4 sm:$0xff]   ;;  %v8621_v58 = vld [vmem:[%s11051_s7 + $0x8c] ss:$16 sps:$4 sm:$0xff]   ;;  %v8656_v6 = vld [vmem:[%s11051_s7 + $0xa0] ss:$16 sps:$4 sm:$0xff]  }
 0x320   :  { %943 = vmatmul.mubr.bf16.gmra.mrb[12].mxu0 %v8405_v4  ;;  %1016 = vmatmul.mubr.bf16.gmra.mrb[12].mxu1 %v8405_v4  ;;  %v8647_v63 = vld [vmem:[%s11051_s7 + $0xac] ss:$16 sps:$4 sm:$0xff]   ;;  %v8694_v15 = vld [vmem:[%s11051_s7 + $0xe4] ss:$16 sps:$4 sm:$0xff]   ;;  %v8760_v23 = vld [vmem:[%s11052_s8 + $0x20] ss:$16 sps:$4 sm:$0xff]  }
 0x321   :  { %1051 = vmatpush1.bf16.msra.mxu0 %v6549_v9  ;;  %1124 = vmatpush1.bf16.msra.mxu1 %v6551_v10  ;;  %v8661_v9 = vld [vmem:[%s11051_s7 + $0xa8] ss:$16 sps:$4 sm:$0xff]   ;;  %v8668_v10 = vld [vmem:[%s11051_s7 + $0xc4] ss:$16 sps:$4 sm:$0xff]   ;;  %v8699_v16 = vld [vmem:[%s11051_s7 + $0xec] ss:$16 sps:$4 sm:$0xff]  }
 0x322   :  { %1052 = vmatprep.subr.bf16.mxu0 %v6558_v12  ;;  %1125 = vmatprep.subr.bf16.mxu1 %v6560_v14  ;;  %v8682_v12 = vld [vmem:[%s11051_s7 + $0xc0] ss:$16 sps:$4 sm:$0xff]   ;;  %v8687_v14 = vld [vmem:[%s11051_s7 + $0xc8] ss:$16 sps:$4 sm:$0xff]   ;;  %v8772_v25 = vld [vmem:[%s11052_s8 + $0x44] ss:$16 sps:$4 sm:$0xff]  }
 0x323   :  { %952 = vmatprep.mubr.bf16.mxu0 %v11058_v13  ;;  %1025 = vmatprep.mubr.bf16.mxu1 %v11058_v13  ;;  %v8803_v2 = vld [vmem:[%s11052_s8 + $0x6c] ss:$16 sps:$4 sm:$0xff]   ;;  %v8810_v31 = vld [vmem:[%s11052_s8 + $0x60] ss:$16 sps:$4 sm:$0xff]   ;;  %v8822_v33 = vld [vmem:[%s11052_s8 + $0x84] ss:$16 sps:$4 sm:$0xff]  }
 0x324   :  { %v8851_v27 = vld [vmem:[%s11052_s8 + $0xac] ss:$16 sps:$4 sm:$0xff]   ;;  %v8858_v5 = vld [vmem:[%s11052_s8 + $0xa0] ss:$16 sps:$4 sm:$0xff]   ;;  %v8863_v7 = vld [vmem:[%s11052_s8 + $0xa8] ss:$16 sps:$4 sm:$0xff]  }
 0x325   :  { %1053 = vmatpush1.bf16.msra.mxu0 %v6557_v19  ;;  %1126 = vmatpush1.bf16.msra.mxu1 %v6559_v20  ;;  %v8725_v19 = vld [vmem:[%s11052_s8 + $0xc] ss:$16 sps:$4 sm:$0xff]   ;;  %v8734_v20 = vld [vmem:[%s11052_s8] ss:$16 sps:$4 sm:$0xff]   ;;  %v8870_v29 = vld [vmem:[%s11052_s8 + $0xc4] ss:$16 sps:$4 sm:$0xff]  }
 0x326   :  { %1054 = vmatprep.subr.bf16.mxu0 %v6566_v21  ;;  %1127 = vmatprep.subr.bf16.mxu1 %v6568_v22  ;;  %v8739_v21 = vld [vmem:[%s11052_s8 + $0x8] ss:$16 sps:$4 sm:$0xff]   ;;  %v8746_v22 = vld [vmem:[%s11052_s8 + $0x24] ss:$16 sps:$4 sm:$0xff]   ;;  %s6489_s25 = sshll.u32 %s8037_s6, 4  ;;  %s6490_s25 = int_to_ptr.vmem [resolvable:$true] %s6489_s25 }
 0x327   :  { %s7988_s26 = scalar_lea.vmem %s6490_s25, 128  ;;  %p7993_p1 = scmp.lt.s32.totalorder %s6490_s25, %s6490_s25 }
 0x328   :  { %953 = vmatmul.mubr.bf16.gmra.mrb[16].mxu0 %v8451_v11  ;;  %1026 = vmatmul.mubr.bf16.gmra.mrb[16].mxu1 %v8451_v11  ;;  %p7989_p0 = scmp.ne.s32.totalorder %s6490_s25, %s7988_s26  ;;  %p7994_p2 = scmp.lt.s32.totalorder %s7988_s26, %s7988_s26 }
 0x329   :  { %1055 = vmatpush1.bf16.msra.mxu0 %v6565_v26  ;;  %1128 = vmatpush1.bf16.msra.mxu1 %v6567_v28  ;;  %v8777_v26 = vld [vmem:[%s11052_s8 + $0x4c] ss:$16 sps:$4 sm:$0xff]   ;;  %v8786_v28 = vld [vmem:[%s11052_s8 + $0x40] ss:$16 sps:$4 sm:$0xff]  }
 0x32a   :  { %1056 = vmatprep.subr.bf16.mxu0 %v6574_v30  ;;  %1129 = vmatprep.subr.bf16.mxu1 %v6576_v0  ;;  %v8791_v30 = vld [vmem:[%s11052_s8 + $0x48] ss:$16 sps:$4 sm:$0xff]   ;;  %v8798_v0 = vld [vmem:[%s11052_s8 + $0x64] ss:$16 sps:$4 sm:$0xff]   ;;  %p7995_p3 = por %p7994_p2, %p7993_p1 }
 0x32b   :  { %962 = vmatprep.mubr.bf16.mxu0 %v11058_v13  ;;  %1035 = vmatprep.mubr.bf16.mxu1 %v11058_v13 }
 0x32c   :  { %p7996_p4 = pnand %p7995_p3, %p7989_p0 }
 0x32d   :  { %1057 = vmatpush1.bf16.msra.mxu0 %v6573_v34  ;;  %1130 = vmatpush1.bf16.msra.mxu1 %v6575_v35  ;;  %v8827_v34 = vld [vmem:[%s11052_s8 + $0x8c] ss:$16 sps:$4 sm:$0xff]   ;;  %v8834_v35 = vld [vmem:[%s11052_s8 + $0x80] ss:$16 sps:$4 sm:$0xff]  }
 0x32e   :  { %1058 = vmatprep.subr.bf16.mxu0 %v6582_v36  ;;  %1131 = vmatprep.subr.bf16.mxu1 %v6584_v3  ;;  %v8839_v36 = vld [vmem:[%s11052_s8 + $0x88] ss:$16 sps:$4 sm:$0xff]   ;;  %v8846_v3 = vld [vmem:[%s11052_s8 + $0xa4] ss:$16 sps:$4 sm:$0xff]  }
 0x330   :  { %963 = vmatmul.mubr.bf16.gmra.mrb[20].mxu0 %v8449_v8  ;;  %1036 = vmatmul.mubr.bf16.gmra.mrb[20].mxu1 %v8449_v8 }
 0x331   :  { %1059 = vmatpush1.bf16.msra.mxu0 %v6581_v37  ;;  %1132 = vmatpush1.bf16.msra.mxu1 %v6583_v38  ;;  %v8875_v37 = vld [vmem:[%s11052_s8 + $0xcc] ss:$16 sps:$4 sm:$0xff]   ;;  %v8882_v38 = vld [vmem:[%s11052_s8 + $0xc0] ss:$16 sps:$4 sm:$0xff]  }
 0x332   :  { %1060 = vmatprep.subr.bf16.mxu0 %v6590_v39  ;;  %1133 = vmatprep.subr.bf16.mxu1 %v6592_v40  ;;  %v8887_v39 = vld [vmem:[%s11052_s8 + $0xc8] ss:$16 sps:$4 sm:$0xff]   ;;  %v8894_v40 = vld [vmem:[%s11052_s8 + $0xe4] ss:$16 sps:$4 sm:$0xff]  }
 0x333   :  { %1078 = vmatprep.mubr.bf16.mxu0 %v11058_v13  ;;  %1151 = vmatprep.mubr.bf16.mxu1 %v11058_v13  ;;  %11115 = vst [vmem:[#allocation9_spill] sm:$0xff] %v8887_v39 }
 0x335   :  { %1061 = vmatpush1.bf16.msra.mxu0 %v6589_v41  ;;  %1134 = vmatpush1.bf16.msra.mxu1 %v6591_v42  ;;  %v8899_v41 = vld [vmem:[%s11052_s8 + $0xec] ss:$16 sps:$4 sm:$0xff]   ;;  %v8906_v42 = vld [vmem:[%s11052_s8 + $0xe0] ss:$16 sps:$4 sm:$0xff]  }
 0x336   :  { %1457 = vmatprep.subr.bf16.mxu0 %v8514_v43  ;;  %1498 = vmatprep.subr.bf16.mxu1 %v8519_v44 }
 0x338   :  { %1079 = vmatmul.mubr.bf16.vlgmr.msra.gmra.mrb[24].mxu0 %v8407_v24  ;;  %1152 = vmatmul.mubr.bf16.vlgmr.msra.gmra.mrb[24].mxu1 %v8407_v24  ;;  %v8564_v24 = vld [vmem:[%s11051_s7 + $0x44] ss:$16 sps:$4 sm:$0xff]  }
 0x339   :  { %1458 = vmatpush1.bf16.msra.mxu0 %v8526_v45  ;;  %1499 = vmatpush1.bf16.msra.mxu1 %v8531_v46 }
 0x33a   :  { %1459 = vmatprep.subr.bf16.mxu0 %v8538_v47  ;;  %1500 = vmatprep.subr.bf16.mxu1 %v8543_v48 }
 0x33b   :  { %1088 = vmatprep.mubr.bf16.mxu0 %v11058_v13  ;;  %1161 = vmatprep.mubr.bf16.mxu1 %v11058_v13 }
 0x33d   :  { %1460 = vmatpush1.bf16.msra.mxu0 %v8552_v49  ;;  %1501 = vmatpush1.bf16.msra.mxu1 %v8557_v50 }
 0x33e   :  { %1461 = vmatprep.subr.bf16.mxu0 %v8564_v24  ;;  %1502 = vmatprep.subr.bf16.mxu1 %v8569_v51 }
 0x340   :  { %1089 = vmatmul.mubr.bf16.gmra.mrb[28].mxu0 %v8405_v4  ;;  %1162 = vmatmul.mubr.bf16.gmra.mrb[28].mxu1 %v8405_v4  ;;  %v8616_v4 = vld [vmem:[%s11051_s7 + $0x84] ss:$16 sps:$4 sm:$0xff]  }
 0x341   :  { %1462 = vmatpush1.bf16.msra.mxu0 %v8578_v52  ;;  %1503 = vmatpush1.bf16.msra.mxu1 %v8583_v53 }
 0x342   :  { %1463 = vmatprep.subr.bf16.mxu0 %v8590_v54  ;;  %1504 = vmatprep.subr.bf16.mxu1 %v8595_v55 }
 0x343   :  { %1098 = vmatprep.mubr.bf16.mxu0 %v11058_v13  ;;  %1171 = vmatprep.mubr.bf16.mxu1 %v11058_v13 }
 0x345   :  { %1464 = vmatpush1.bf16.msra.mxu0 %v8604_v56  ;;  %1505 = vmatpush1.bf16.msra.mxu1 %v8609_v57 }
 0x346   :  { %1465 = vmatprep.subr.bf16.mxu0 %v8616_v4  ;;  %1506 = vmatprep.subr.bf16.mxu1 %v8621_v58 }
 0x348   :  { %1099 = vmatmul.mubr.bf16.gmra.mrb[32].mxu0 %v8451_v11  ;;  %1172 = vmatmul.mubr.bf16.gmra.mrb[32].mxu1 %v8451_v11  ;;  %v8673_v11 = vld [vmem:[%s11051_s7 + $0xcc] ss:$16 sps:$4 sm:$0xff]  }
 0x349   :  { %1466 = vmatpush1.bf16.msra.mxu0 %v8630_v59  ;;  %1507 = vmatpush1.bf16.msra.mxu1 %v8635_v61 }
 0x34a   :  { %1467 = vmatprep.subr.bf16.mxu0 %v8642_v62  ;;  %1508 = vmatprep.subr.bf16.mxu1 %v8647_v63 }
 0x34b   :  { %1108 = vmatprep.mubr.bf16.mxu0 %v11058_v13  ;;  %1181 = vmatprep.mubr.bf16.mxu1 %v11058_v13 }
 0x34d   :  { %1468 = vmatpush1.bf16.msra.mxu0 %v8656_v6  ;;  %1509 = vmatpush1.bf16.msra.mxu1 %v8661_v9 }
 0x34e   :  { %1469 = vmatprep.subr.bf16.mxu0 %v8668_v10  ;;  %1510 = vmatprep.subr.bf16.mxu1 %v8673_v11 }
 0x350   :  { %1109 = vmatmul.mubr.bf16.gmra.mrb[36].mxu0 %v8449_v8  ;;  %1182 = vmatmul.mubr.bf16.gmra.mrb[36].mxu1 %v8449_v8  ;;  %v8720_v8 = vld [vmem:[%s11052_s8 + $0x4] ss:$16 sps:$4 sm:$0xff]  }
 0x351   :  { %1470 = vmatpush1.bf16.msra.mxu0 %v8682_v12  ;;  %1511 = vmatpush1.bf16.msra.mxu1 %v8687_v14 }
 0x352   :  { %1471 = vmatprep.subr.bf16.mxu0 %v8694_v15  ;;  %1512 = vmatprep.subr.bf16.mxu1 %v8699_v16 }
 0x353   :  { %1489 = vmatprep.mubr.bf16.mxu0 %v11058_v13  ;;  %1530 = vmatprep.mubr.bf16.mxu1 %v11058_v13 }
 0x355   :  { %1472 = vmatpush1.bf16.msra.mxu0 %v8708_v17  ;;  %1513 = vmatpush1.bf16.msra.mxu1 %v8713_v18 }
 0x356   :  { %1731 = vmatprep.subr.bf16.mxu0 %v8720_v8  ;;  %1772 = vmatprep.subr.bf16.mxu1 %v8725_v19 }
 0x358   :  { %1490 = vmatmul.mubr.bf16.vlgmr.msra.gmra.mrb[40].mxu0 %v11058_v13  ;;  %1531 = vmatmul.mubr.bf16.vlgmr.msra.gmra.mrb[40].mxu1 %v11058_v13 }
 0x359   :  { %1732 = vmatpush1.bf16.msra.mxu0 %v8734_v20  ;;  %1773 = vmatpush1.bf16.msra.mxu1 %v8739_v21 }
 0x35a   :  { %1733 = vmatprep.subr.bf16.mxu0 %v8746_v22  ;;  %1774 = vmatprep.subr.bf16.mxu1 %v8751_v60 }
 0x35b   :  { %1763 = vmatprep.mubr.bf16.mxu0 %v11058_v13  ;;  %1804 = vmatprep.mubr.bf16.mxu1 %v11058_v13  ;;  %v8911_v13 = vld [vmem:[%s11052_s8 + $0xe8] ss:$16 sps:$4 sm:$0xff]  }
 0x35d   :  { %1734 = vmatpush1.bf16.msra.mxu0 %v8760_v23  ;;  %1775 = vmatpush1.bf16.msra.mxu1 %v8765_v1 }
 0x35e   :  { %1735 = vmatprep.subr.bf16.mxu0 %v8772_v25  ;;  %1776 = vmatprep.subr.bf16.mxu1 %v8777_v26 }
 0x361   :  { %1736 = vmatpush1.bf16.msra.mxu0 %v8786_v28  ;;  %1777 = vmatpush1.bf16.msra.mxu1 %v8791_v30 }
 0x362   :  { %1737 = vmatprep.subr.bf16.mxu0 %v8798_v0  ;;  %1778 = vmatprep.subr.bf16.mxu1 %v8803_v2 }
 0x365   :  { %1738 = vmatpush1.bf16.msra.mxu0 %v8810_v31  ;;  %1779 = vmatpush1.bf16.msra.mxu1 %v8815_v32 }
 0x366   :  { %1739 = vmatprep.subr.bf16.mxu0 %v8822_v33  ;;  %1780 = vmatprep.subr.bf16.mxu1 %v8827_v34 }
 0x369   :  { %1740 = vmatpush1.bf16.msra.mxu0 %v8834_v35  ;;  %1781 = vmatpush1.bf16.msra.mxu1 %v8839_v36 }
 0x36a   :  { %1741 = vmatprep.subr.bf16.mxu0 %v8846_v3  ;;  %1782 = vmatprep.subr.bf16.mxu1 %v8851_v27 }
 0x36d   :  { %1742 = vmatpush1.bf16.msra.mxu0 %v8858_v5  ;;  %1783 = vmatpush1.bf16.msra.mxu1 %v8863_v7 }
 0x36e   :  { %1743 = vmatprep.subr.bf16.mxu0 %v8870_v29  ;;  %1784 = vmatprep.subr.bf16.mxu1 %v8875_v37 }
 0x371   :  { %1744 = vmatpush1.bf16.msra.mxu0 %v8882_v38  ;;  %1785 = vmatpush1.bf16.msra.mxu1 %v8887_v39  ;;  %v11116_v39 = vmov 0  }
 0x372   :  { %1745 = vmatprep.subr.bf16.mxu0 %v8894_v40  ;;  %1786 = vmatprep.subr.bf16.mxu1 %v8899_v41 }
 0x375   :  { %1746 = vmatpush1.bf16.msra.mxu0 %v8906_v42  ;;  %1787 = vmatpush1.bf16.msra.mxu1 %v8911_v13 }
 0x376   :  { %2092 = vmatprep.subr.bf16.mxu0 %v8514_v43  ;;  %2133 = vmatprep.subr.bf16.mxu1 %v8519_v44  ;;  %v540_v43 = vlaneseq }
 0x378   :  { %1764 = vmatmul.mubr.bf16.vlgmr.msra.gmra.mrb[44].mxu0 %v11116_v39  ;;  %1805 = vmatmul.mubr.bf16.vlgmr.msra.gmra.mrb[44].mxu1 %v11116_v39  ;;  %v8955_v44 = vshrl.u32 %v540_v43, 7 }
 0x379   :  { %2093 = vmatpush1.bf16.msra.mxu0 %v8526_v45  ;;  %2134 = vmatpush1.bf16.msra.mxu1 %v8531_v46 }
 0x37a   :  { %2094 = vmatprep.subr.bf16.mxu0 %v8538_v47  ;;  %2135 = vmatprep.subr.bf16.mxu1 %v8543_v48  ;;  %v542_v45 = vsub.s32 0, %v8955_v44  ;;  %v550_v46 = vsub.s32 2, %v8955_v44  ;;  %v8962_v47 = vld [vmem:[%s11053_s9] sm:$0xff]  ;;  %v546_v48 = vsub.s32 1, %v8955_v44 }
 0x37b   :  { %2124 = vmatprep.mubr.bf16.mxu0 %v11116_v39  ;;  %2165 = vmatprep.mubr.bf16.mxu1 %v11116_v39 }
 0x37d   :  { %2095 = vmatpush1.bf16.msra.mxu0 %v8552_v49  ;;  %2136 = vmatpush1.bf16.msra.mxu1 %v8557_v50  ;;  %v554_v49 = vsub.s32 3, %v8955_v44 }
 0x37e   :  { %2096 = vmatprep.subr.bf16.mxu0 %v8564_v24  ;;  %2137 = vmatprep.subr.bf16.mxu1 %v8569_v51  ;;  %v8971_v51 = vrot.slane %v8962_v47, %v542_v45 }
 0x381   :  { %2097 = vmatpush1.bf16.msra.mxu0 %v8578_v52  ;;  %2138 = vmatpush1.bf16.msra.mxu1 %v8583_v53  ;;  %v8974_v52 = vrot.slane %v8962_v47, %v550_v46 }
 0x382   :  { %2098 = vmatprep.subr.bf16.mxu0 %v8590_v54  ;;  %2139 = vmatprep.subr.bf16.mxu1 %v8595_v55  ;;  %v8981_v55 = vrot.slane %v8962_v47, %v546_v48 }
 0x385   :  { %2099 = vmatpush1.bf16.msra.mxu0 %v8604_v56  ;;  %2140 = vmatpush1.bf16.msra.mxu1 %v8609_v57  ;;  %v8984_v56 = vrot.slane %v8962_v47, %v554_v49 }
 0x386   :  { %2100 = vmatprep.subr.bf16.mxu0 %v8616_v4  ;;  %2141 = vmatprep.subr.bf16.mxu1 %v8621_v58 }
 0x389   :  { %2101 = vmatpush1.bf16.msra.mxu0 %v8630_v59  ;;  %2142 = vmatpush1.bf16.msra.mxu1 %v8635_v61 }
 0x38a   :  { %2102 = vmatprep.subr.bf16.mxu0 %v8642_v62  ;;  %2143 = vmatprep.subr.bf16.mxu1 %v8647_v63 }
 0x38d   :  { %2103 = vmatpush1.bf16.msra.mxu0 %v8656_v6  ;;  %2144 = vmatpush1.bf16.msra.mxu1 %v8661_v9 }
 0x38e   :  { %2104 = vmatprep.subr.bf16.mxu0 %v8668_v10  ;;  %2145 = vmatprep.subr.bf16.mxu1 %v8673_v11 }
 0x391   :  { %2105 = vmatpush1.bf16.msra.mxu0 %v8682_v12  ;;  %2146 = vmatpush1.bf16.msra.mxu1 %v8687_v14 }
 0x392   :  { %2106 = vmatprep.subr.bf16.mxu0 %v8694_v15  ;;  %2147 = vmatprep.subr.bf16.mxu1 %v8699_v16 }
 0x395   :  { %2107 = vmatpush1.bf16.msra.mxu0 %v8708_v17  ;;  %2148 = vmatpush1.bf16.msra.mxu1 %v8713_v18 }
 0x396   :  { %2366 = vmatprep.subr.bf16.mxu0 %v8720_v8  ;;  %2407 = vmatprep.subr.bf16.mxu1 %v8725_v19 }
 0x3eb   :  { %v8966_v50 = vpop.f32.mrb[8].mxu0  ;;  %v8968_v24 = vpop.f32.mrb[8].mxu1 }
 0x3ec   :  { %v8976_v53 = vpop.f32.mrb[9].mxu0  ;;  %v8978_v54 = vpop.f32.mrb[9].mxu1 }
 0x3ed   :  { %v938_v57 = vpop.f32.mrb[10].mxu0  ;;  %v1011_v4 = vpop.f32.mrb[10].mxu1 }
 0x3ee   :  { %v8987_v58 = vadd.f32 %v938_v57, %v8971_v51  ;;  %v8990_v59 = vadd.f32 %v1011_v4, %v8974_v52  ;;  %v940_v61 = vpop.f32.mrb[11].mxu0  ;;  %v1013_v62 = vpop.f32.mrb[11].mxu1 }
 0x3ef   :  { %v8993_v63 = vadd.f32 %v940_v61, %v8981_v55  ;;  %v8996_v6 = vadd.f32 %v1013_v62, %v8984_v56 }
 0x3f1   :  { %11117 = vst [vmem:[#allocation10_spill] sm:$0xff] %v8996_v6 }
 0x3f3   :  { %v944_v9 = vpop.f32.mrb[12].mxu0  ;;  %v1017_v10 = vpop.f32.mrb[12].mxu1 }
 0x3f4   :  { %v8999_v11 = vadd.f32 %v944_v9, %v8971_v51  ;;  %v9002_v12 = vadd.f32 %v1017_v10, %v8974_v52  ;;  %v946_v14 = vpop.f32.mrb[13].mxu0  ;;  %v1019_v15 = vpop.f32.mrb[13].mxu1 }
 0x3f5   :  { %v9005_v16 = vadd.f32 %v946_v14, %v8981_v55  ;;  %v9008_v17 = vadd.f32 %v1019_v15, %v8984_v56  ;;  %v948_v18 = vpop.f32.mrb[14].mxu0  ;;  %v1021_v8 = vpop.f32.mrb[14].mxu1 }
 0x3f6   :  { %11118 = vst [vmem:[#allocation11_spill] sm:$0xff] %v8999_v11  ;;  %11119 = vst [vmem:[#allocation12_spill] sm:$0xff] %v9002_v12  ;;  %v9011_v19 = vadd.f32 %v948_v18, %v8971_v51  ;;  %v9014_v43 = vadd.f32 %v1021_v8, %v8974_v52  ;;  %v950_v45 = vpop.f32.mrb[15].mxu0  ;;  %v1023_v46 = vpop.f32.mrb[15].mxu1 }
 0x3f7   :  { %11120 = vst [vmem:[#allocation13_spill] sm:$0xff] %v9005_v16  ;;  %11121 = vst [vmem:[#allocation14_spill] sm:$0xff] %v9008_v17  ;;  %v9017_v48 = vadd.f32 %v950_v45, %v8981_v55  ;;  %v9020_v49 = vadd.f32 %v1023_v46, %v8984_v56 }
 0x3f8   :  { %11122 = vst [vmem:[#allocation15_spill] sm:$0xff] %v9011_v19  ;;  %11123 = vst [vmem:[#allocation16_spill] sm:$0xff] %v9014_v43 }
 0x3f9   :  { %11124 = vst [vmem:[#allocation17_spill] sm:$0xff] %v9017_v48  ;;  %11125 = vst [vmem:[#allocation18_spill] sm:$0xff] %v9020_v49 }
 0x3fb   :  { %v954_v57 = vpop.f32.mrb[16].mxu0  ;;  %v1027_v4 = vpop.f32.mrb[16].mxu1 }
 0x3fc   :  { %v9023_v61 = vadd.f32 %v954_v57, %v8971_v51  ;;  %v9026_v62 = vadd.f32 %v1027_v4, %v8974_v52  ;;  %v956_v9 = vpop.f32.mrb[17].mxu0  ;;  %v1029_v10 = vpop.f32.mrb[17].mxu1 }
 0x3fd   :  { %v9029_v14 = vadd.f32 %v956_v9, %v8981_v55  ;;  %v9032_v15 = vadd.f32 %v1029_v10, %v8984_v56  ;;  %v958_v18 = vpop.f32.mrb[18].mxu0  ;;  %v1031_v8 = vpop.f32.mrb[18].mxu1 }
 0x3fe   :  { %11126 = vst [vmem:[#allocation19_spill] sm:$0xff] %v9023_v61  ;;  %11127 = vst [vmem:[#allocation20_spill] sm:$0xff] %v9026_v62  ;;  %v9035_v45 = vadd.f32 %v958_v18, %v8971_v51  ;;  %v9038_v46 = vadd.f32 %v1031_v8, %v8974_v52  ;;  %v960_v57 = vpop.f32.mrb[19].mxu0  ;;  %v1033_v61 = vpop.f32.mrb[19].mxu1  ;;  %v558_v8 = vsub.s32 4, %v8955_v44 }
 0x3ff   :  { %11128 = vst [vmem:[#allocation21_spill] sm:$0xff] %v9029_v14  ;;  %11129 = vst [vmem:[#allocation22_spill] sm:$0xff] %v9032_v15  ;;  %v9041_v4 = vadd.f32 %v960_v57, %v8981_v55  ;;  %v9044_v62 = vadd.f32 %v1033_v61, %v8984_v56 }
 0x400   :  { %11130 = vst [vmem:[#allocation23_spill] sm:$0xff] %v9035_v45  ;;  %11131 = vst [vmem:[#allocation24_spill] sm:$0xff] %v9038_v46  ;;  %v566_v46 = vsub.s32 6, %v8955_v44 }
 0x401   :  { %11132 = vst [vmem:[#allocation25_spill] sm:$0xff] %v9041_v4  ;;  %11133 = vst [vmem:[#allocation26_spill] sm:$0xff] %v9044_v62 }
 0x403   :  { %v964_v9 = vpop.f32.mrb[20].mxu0  ;;  %v1037_v14 = vpop.f32.mrb[20].mxu1 }
 0x404   :  { %v9047_v10 = vadd.f32 %v964_v9, %v8971_v51  ;;  %v9050_v15 = vadd.f32 %v1037_v14, %v8974_v52  ;;  %v966_v18 = vpop.f32.mrb[21].mxu0  ;;  %v1039_v45 = vpop.f32.mrb[21].mxu1  ;;  %v562_v9 = vsub.s32 5, %v8955_v44 }
 0x405   :  { %v9055_v57 = vadd.f32 %v966_v18, %v8981_v55  ;;  %v9058_v61 = vadd.f32 %v1039_v45, %v8984_v56  ;;  %v968_v62 = vpop.f32.mrb[22].mxu0  ;;  %v1041_v4 = vpop.f32.mrb[22].mxu1 }
 0x406   :  { %11134 = vst [vmem:[#allocation27_spill] sm:$0xff] %v9047_v10  ;;  %11135 = vst [vmem:[#allocation28_spill] sm:$0xff] %v9050_v15  ;;  %v570_v10 = vsub.s32 7, %v8955_v44  ;;  %v9063_v14 = vadd.f32 %v968_v62, %v8971_v51  ;;  %v9066_v15 = vadd.f32 %v1041_v4, %v8974_v52  ;;  %v970_v49 = vpop.f32.mrb[23].mxu0  ;;  %v1043_v48 = vpop.f32.mrb[23].mxu1  ;;  %v9081_v44 = vrot.slane %v8962_v47, %v562_v9 }
 0x407   :  { %11136 = vst [vmem:[#allocation29_spill] sm:$0xff] %v9055_v57  ;;  %11137 = vst [vmem:[#allocation30_spill] sm:$0xff] %v9058_v61  ;;  %v9069_v18 = vadd.f32 %v970_v49, %v8981_v55  ;;  %v9072_v45 = vadd.f32 %v1043_v48, %v8984_v56  ;;  %v9075_v61 = vrot.slane %v8962_v47, %v558_v8 }
 0x408   :  { %11138 = vst [vmem:[#allocation31_spill] sm:$0xff] %v9063_v14  ;;  %11139 = vst [vmem:[#allocation32_spill] sm:$0xff] %v9066_v15  ;;  %v9078_v57 = vrot.slane %v8962_v47, %v566_v46  ;;  %v9084_v62 = vrot.slane %v8962_v47, %v570_v10 }
 0x409   :  { %11140 = vst [vmem:[#allocation33_spill] sm:$0xff] %v9069_v18  ;;  %11141 = vst [vmem:[#allocation34_spill] sm:$0xff] %v9072_v45 }
 0x40b   :  { %v1080_v4 = vpop.f32.mrb[24].mxu0  ;;  %v1153_v15 = vpop.f32.mrb[24].mxu1 }
 0x40c   :  { %v9087_v49 = vadd.f32 %v1080_v4, %v9075_v61  ;;  %v9090_v48 = vadd.f32 %v1153_v15, %v9078_v57  ;;  %v1082_v45 = vpop.f32.mrb[25].mxu0  ;;  %v1155_v8 = vpop.f32.mrb[25].mxu1 }
 0x40d   :  { %v9093_v18 = vadd.f32 %v1082_v45, %v9081_v44  ;;  %v9096_v46 = vadd.f32 %v1155_v8, %v9084_v62  ;;  %v1084_v9 = vpop.f32.mrb[26].mxu0  ;;  %v1157_v14 = vpop.f32.mrb[26].mxu1 }
 0x40e   :  { %11142 = vst [vmem:[#allocation35_spill] sm:$0xff] %v9087_v49  ;;  %11143 = vst [vmem:[#allocation36_spill] sm:$0xff] %v9090_v48  ;;  %v9099_v47 = vadd.f32 %v1084_v9, %v9075_v61  ;;  %v9102_v10 = vadd.f32 %v1157_v14, %v9078_v57  ;;  %v1086_v4 = vpop.f32.mrb[27].mxu0  ;;  %v1159_v49 = vpop.f32.mrb[27].mxu1 }
 0x40f   :  { %11144 = vst [vmem:[#allocation37_spill] sm:$0xff] %v9093_v18  ;;  %11145 = vst [vmem:[#allocation38_spill] sm:$0xff] %v9096_v46  ;;  %v9105_v15 = vadd.f32 %v1086_v4, %v9081_v44  ;;  %v9108_v48 = vadd.f32 %v1159_v49, %v9084_v62 }
 0x410   :  { %11146 = vst [vmem:[#allocation39_spill] sm:$0xff] %v9099_v47  ;;  %11147 = vst [vmem:[#allocation40_spill] sm:$0xff] %v9102_v10 }
 0x411   :  { %11148 = vst [vmem:[#allocation41_spill] sm:$0xff] %v9105_v15  ;;  %11149 = vst [vmem:[#allocation42_spill] sm:$0xff] %v9108_v48 }
 0x413   :  { %v1090_v45 = vpop.f32.mrb[28].mxu0  ;;  %v1163_v18 = vpop.f32.mrb[28].mxu1 }
 0x414   :  { %v9111_v8 = vadd.f32 %v1090_v45, %v9075_v61  ;;  %v9114_v46 = vadd.f32 %v1163_v18, %v9078_v57  ;;  %v1092_v9 = vpop.f32.mrb[29].mxu0  ;;  %v1165_v47 = vpop.f32.mrb[29].mxu1 }
 0x415   :  { %v9117_v14 = vadd.f32 %v1092_v9, %v9081_v44  ;;  %v9120_v10 = vadd.f32 %v1165_v47, %v9084_v62  ;;  %v1094_v4 = vpop.f32.mrb[30].mxu0  ;;  %v1167_v15 = vpop.f32.mrb[30].mxu1 }
 0x416   :  { %11150 = vst [vmem:[#allocation43_spill] sm:$0xff] %v9111_v8  ;;  %11151 = vst [vmem:[#allocation44_spill] sm:$0xff] %v9114_v46  ;;  %v9123_v49 = vadd.f32 %v1094_v4, %v9075_v61  ;;  %v9126_v48 = vadd.f32 %v1167_v15, %v9078_v57  ;;  %v1096_v45 = vpop.f32.mrb[31].mxu0  ;;  %v1169_v8 = vpop.f32.mrb[31].mxu1 }
 0x417   :  { %11152 = vst [vmem:[#allocation45_spill] sm:$0xff] %v9117_v14  ;;  %11153 = vst [vmem:[#allocation46_spill] sm:$0xff] %v9120_v10  ;;  %v9129_v18 = vadd.f32 %v1096_v45, %v9081_v44  ;;  %v9132_v46 = vadd.f32 %v1169_v8, %v9084_v62 }
 0x418   :  { %11154 = vst [vmem:[#allocation47_spill] sm:$0xff] %v9123_v49  ;;  %11155 = vst [vmem:[#allocation48_spill] sm:$0xff] %v9126_v48 }
 0x419   :  { %11156 = vst [vmem:[#allocation49_spill] sm:$0xff] %v9129_v18  ;;  %11157 = vst [vmem:[#allocation50_spill] sm:$0xff] %v9132_v46 }
 0x41b   :  { %v1100_v9 = vpop.f32.mrb[32].mxu0  ;;  %v1173_v14 = vpop.f32.mrb[32].mxu1 }
 0x41c   :  { %v9135_v47 = vadd.f32 %v1100_v9, %v9075_v61  ;;  %v9138_v10 = vadd.f32 %v1173_v14, %v9078_v57  ;;  %v1102_v4 = vpop.f32.mrb[33].mxu0  ;;  %v1175_v49 = vpop.f32.mrb[33].mxu1 }
 0x41d   :  { %v9141_v15 = vadd.f32 %v1102_v4, %v9081_v44  ;;  %v9144_v48 = vadd.f32 %v1175_v49, %v9084_v62  ;;  %v1104_v45 = vpop.f32.mrb[34].mxu0  ;;  %v1177_v18 = vpop.f32.mrb[34].mxu1 }
 0x41e   :  { %11158 = vst [vmem:[#allocation51_spill] sm:$0xff] %v9135_v47  ;;  %11159 = vst [vmem:[#allocation52_spill] sm:$0xff] %v9138_v10  ;;  %v9147_v8 = vadd.f32 %v1104_v45, %v9075_v61  ;;  %v9150_v46 = vadd.f32 %v1177_v18, %v9078_v57  ;;  %v1106_v9 = vpop.f32.mrb[35].mxu0  ;;  %v1179_v47 = vpop.f32.mrb[35].mxu1 }
 0x41f   :  { %11160 = vst [vmem:[#allocation53_spill] sm:$0xff] %v9141_v15  ;;  %11161 = vst [vmem:[#allocation54_spill] sm:$0xff] %v9144_v48  ;;  %v9153_v14 = vadd.f32 %v1106_v9, %v9081_v44  ;;  %v9156_v10 = vadd.f32 %v1179_v47, %v9084_v62 }
 0x420   :  { %11162 = vst [vmem:[#allocation55_spill] sm:$0xff] %v9147_v8  ;;  %11163 = vst [vmem:[#allocation56_spill] sm:$0xff] %v9150_v46  ;;  %v935_v46 = vadd.f32 %v8966_v50, %v8971_v51 }
 0x421   :  { %11164 = vst [vmem:[#allocation57_spill] sm:$0xff] %v9153_v14  ;;  %11165 = vst [vmem:[#allocation58_spill] sm:$0xff] %v9156_v10 }
 0x423   :  { %v1110_v4 = vpop.f32.mrb[36].mxu0  ;;  %v1183_v15 = vpop.f32.mrb[36].mxu1 }
 0x424   :  { %v9159_v49 = vadd.f32 %v1110_v4, %v9075_v61  ;;  %v9162_v48 = vadd.f32 %v1183_v15, %v9078_v57  ;;  %v1112_v45 = vpop.f32.mrb[37].mxu0  ;;  %v1185_v43 = vpop.f32.mrb[37].mxu1  ;;  %v1008_v4 = vadd.f32 %v8968_v24, %v8974_v52  ;;  %v937_v15 = vadd.f32 %v8976_v53, %v8981_v55 }
 0x425   :  { %v9165_v18 = vadd.f32 %v1112_v45, %v9081_v44  ;;  %v9168_v19 = vadd.f32 %v1185_v43, %v9084_v62  ;;  %v1114_v9 = vpop.f32.mrb[38].mxu0  ;;  %v1187_v14 = vpop.f32.mrb[38].mxu1  ;;  %v1010_v45 = vadd.f32 %v8978_v54, %v8984_v56 }
 0x426   :  { %11166 = vst [vmem:[#allocation59_spill] sm:$0xff] %v9159_v49  ;;  %11167 = vst [vmem:[#allocation60_spill] sm:$0xff] %v9162_v48  ;;  %v1116_v47 = vpop.f32.mrb[39].mxu0  ;;  %v1189_v10 = vpop.f32.mrb[39].mxu1 }
 0x427   :  { %11168 = vst [vmem:[#allocation61_spill] sm:$0xff] %v9165_v18  ;;  %11169 = vst [vmem:[#allocation62_spill] sm:$0xff] %v9168_v19 }
 0x42b   :  { %v1491_v8 = vpop.f32.mrb[40].mxu0  ;;  %v1532_v17 = vpop.f32.mrb[40].mxu1 }
 0x42c   :  { %v1817_v43 = vadd.f32 %v1491_v8, %v935_v46  ;;  %v1819_v16 = vadd.f32 %v1532_v17, %v1008_v4  ;;  %v1493_v12 = vpop.f32.mrb[41].mxu0  ;;  %v1534_v11 = vpop.f32.mrb[41].mxu1  ;;  %v1190_v4 = vadd.f32 %v1189_v10, %v9084_v62 }
 0x42d   :  { %v1818_v19 = vadd.f32 %v1493_v12, %v937_v15  ;;  %v1820_v18 = vadd.f32 %v1534_v11, %v1010_v45  ;;  %v1495_v48 = vpop.f32.mrb[42].mxu0  ;;  %v1536_v49 = vpop.f32.mrb[42].mxu1 }
 0x42e   :  { %v6657_v50 = vmul.f32 -1.442695, %v1817_v43  ;;  %v1496_v51 = vpop.f32.mrb[43].mxu0  ;;  %v1537_v6 = vpop.f32.mrb[43].mxu1 }
 0x42f   :  { %v6658_v24 = vmul.f32 -1.442695, %v1818_v19  ;;  %v6659_v52 = vmul.f32 -1.442695, %v1820_v18  ;;  %v1115_v6 = vadd.f32 %v1114_v9, %v9075_v61  ;;  %v1188_v19 = vadd.f32 %v1187_v14, %v9078_v57 }
 0x430   :  { %7730 = vpow2.f32 %v6657_v50  ;;  %v1117_v18 = vadd.f32 %v1116_v47, %v9081_v44 }
 0x431   :  { %7732 = vpow2.f32 %v6658_v24 }
 0x432   :  { %7734 = vpow2.f32 %v6659_v52 }
 0x433   :  { %7736 = vtanh.f32 %v1819_v16 }
 0x43a   :  { %v7731_v53 = vpop.eup %7730 }
 0x43b   :  { %v7733_v55 = vpop.eup %7732  ;;  %v1832_v54 = vadd.f32 1.0, %v7731_v53 }
 0x43c   :  { %v1838_v56 = vadd.f32 1.0, %v7733_v55  ;;  %v7735_v17 = vpop.eup %7734  ;;  %v9185_v55 = vpop.permute.xlu1 %1881 }
 0x43d   :  { %7738 = vrcp.f32 %v1832_v54  ;;  %v7737_v12 = vpop.eup %7736  ;;  %v1845_v8 = vadd.f32 1.0, %v7735_v17  ;;  %11170 = vst [vmem:[#allocation63_spill] sm:$0xff] %v9185_v55  ;;  %vm1883_vm8 = vcmp.eq.s32.totalorder %v9185_v55, 1 }
 0x43e   :  { %7740 = vrcp.f32 %v1838_v56  ;;  %vm9191_vm9 = vmpackc.low %vm1883_vm8, %vm1883_vm8 }
 0x43f   :  { %7742 = vrcp.f32 %v1845_v8 }
 0x447   :  { %v7739_v11 = vpop.eup %7738 }
 0x448   :  { %v7741_v48 = vpop.eup %7740  ;;  %v1849_v46 = vmul.f32 %v7739_v11, %v7737_v12 }
 0x449   :  { %v1848_v49 = vmul.f32 0.0, %v7741_v48  ;;  %v7743_v62 = vpop.eup %7742  ;;  %v11171_v48 = vmov 0 }
 0x44a   :  { %v11172_v48 = vsel %vm9191_vm9, 4294967295, %v11171_v48 }
 0x44b   :  { %v9182_v15 = vadd.f32 %v1849_v46, %v1848_v49  ;;  %v1765_v16 = vpop.f32.mrb[44].mxu0  ;;  %v1806_v45 = vpop.f32.mrb[44].mxu1  ;;  %11173 = vst [vmem:[#allocation64_spill] sm:$0xff] %v11172_v48 }
 0x44c   :  { %v1825_v43 = vadd.f32 %v1765_v16, %v1115_v6  ;;  %v1827_v50 = vadd.f32 %v1806_v45, %v1188_v19  ;;  %v1767_v51 = vpop.f32.mrb[45].mxu0  ;;  %v1808_v24 = vpop.f32.mrb[45].mxu1  ;;  %v9352_v16 = vld [vmem:[%s11051_s7 + $0x68] ss:$16 sps:$4 sm:$0xff]   ;;  %v9361_v45 = vld [vmem:[%s11051_s7 + $0x84] ss:$16 sps:$4 sm:$0xff]  }
 0x44d   :  { %7744 = vtanh.f32 %v9182_v15  ;;  %v1826_v52 = vadd.f32 %v1767_v51, %v1117_v18  ;;  %v1828_v53 = vadd.f32 %v1808_v24, %v1190_v4  ;;  %v1769_v61 = vpop.f32.mrb[46].mxu0  ;;  %v1810_v9 = vpop.f32.mrb[46].mxu1  ;;  %v9347_v4 = vld [vmem:[%s11051_s7 + $0x60] ss:$16 sps:$4 sm:$0xff]   ;;  %v9376_v51 = vld [vmem:[%s11051_s7 + $0x88] ss:$16 sps:$4 sm:$0xff]  }
 0x44e   :  { %v6660_v57 = vmul.f32 -1.442695, %v1825_v43  ;;  %v1770_v14 = vpop.f32.mrb[47].mxu0  ;;  %v1811_v44 = vpop.f32.mrb[47].mxu1  ;;  %v9366_v43 = vld [vmem:[%s11051_s7 + $0x8c] ss:$16 sps:$4 sm:$0xff]  }
 0x44f   :  { %v6661_v47 = vmul.f32 -1.442695, %v1826_v52  ;;  %v6662_v54 = vmul.f32 -1.442695, %v1828_v53  ;;  %v9385_v24 = vld [vmem:[%s11051_s7 + $0xa4] ss:$16 sps:$4 sm:$0xff]  }
 0x450   :  { %7746 = vpow2.f32 %v6660_v57  ;;  %v9390_v52 = vld [vmem:[%s11051_s7 + $0xac] ss:$16 sps:$4 sm:$0xff]   ;;  %v9395_v53 = vld [vmem:[%s11051_s7 + $0xa0] ss:$16 sps:$4 sm:$0xff]   ;;  %v9400_v61 = vld [vmem:[%s11051_s7 + $0xa8] ss:$16 sps:$4 sm:$0xff]  }
 0x451   :  { %7748 = vpow2.f32 %v6661_v47  ;;  %v9409_v9 = vld [vmem:[%s11051_s7 + $0xc4] ss:$16 sps:$4 sm:$0xff]   ;;  %v9414_v57 = vld [vmem:[%s11051_s7 + $0xcc] ss:$16 sps:$4 sm:$0xff]   ;;  %v9419_v14 = vld [vmem:[%s11051_s7 + $0xc0] ss:$16 sps:$4 sm:$0xff]  }
 0x452   :  { %7750 = vpow2.f32 %v6662_v54  ;;  %v9424_v44 = vld [vmem:[%s11051_s7 + $0xc8] ss:$16 sps:$4 sm:$0xff]   ;;  %v9433_v47 = vld [vmem:[%s11051_s7 + $0xe4] ss:$16 sps:$4 sm:$0xff]  }
 0x453   :  { %7752 = vtanh.f32 %v1827_v50  ;;  %v9371_v50 = vld [vmem:[%s11051_s7 + $0x80] ss:$16 sps:$4 sm:$0xff]   ;;  %v9448_v54 = vld [vmem:[%s11051_s7 + $0xe8] ss:$16 sps:$4 sm:$0xff]  }
 0x457   :  { %v7745_v10 = vpop.eup %7744 }
 0x458   :  { %v1852_v56 = vmul.f32 %v7745_v10, %v7743_v62  ;;  %v9438_v62 = vld [vmem:[%s11051_s7 + $0xec] ss:$16 sps:$4 sm:$0xff]   ;;  %v9443_v10 = vld [vmem:[%s11051_s7 + $0xe0] ss:$16 sps:$4 sm:$0xff]  }
 0x45a   :  { %v7747_v17 = vpop.eup %7746  ;;  %v1853_v12 = vpack.c.bf16 %v1852_v56, %v1852_v56  ;;  %v9457_v56 = vld [vmem:[%s11052_s8 + $0x4] ss:$16 sps:$4 sm:$0xff]  }
 0x45b   :  { %v7749_v11 = vpop.eup %7748  ;;  %v1857_v46 = vadd.f32 1.0, %v7747_v17  ;;  %v9462_v17 = vld [vmem:[%s11052_s8 + $0xc] ss:$16 sps:$4 sm:$0xff]  }
 0x45c   :  { %v1863_v8 = vadd.f32 1.0, %v7749_v11  ;;  %v9197_v49 = vsel %vm9191_vm9, %v1853_v12, 0 }
 0x45d   :  { %7754 = vrcp.f32 %v1857_v46  ;;  %v1895_v6 = vunpack.c.l.bf16 %v9197_v49  ;;  %2125 = vmatmul.mubr.bf16.vlgmr.msra.gmra.mrb[48].mxu0 %v9197_v49  ;;  %2166 = vmatmul.mubr.bf16.vlgmr.msra.gmra.mrb[48].mxu1 %v9197_v49 }
 0x45e   :  { %7756 = vrcp.f32 %v1863_v8  ;;  %2367 = vmatpush1.bf16.msra.mxu0 %v8734_v20  ;;  %2408 = vmatpush1.bf16.msra.mxu1 %v8739_v21  ;;  %v7751_v20 = vpop.eup %7750 }
 0x45f   :  { %1896 = vst [vmem:[%s11055_s11] sm:$0xff] %v1895_v6  ;;  %2368 = vmatprep.subr.bf16.mxu0 %v8746_v22  ;;  %2409 = vmatprep.subr.bf16.mxu1 %v8751_v60  ;;  %v7753_v21 = vpop.eup %7752 }
 0x460   :  { %2398 = vmatprep.mubr.bf16.mxu0 %v11116_v39  ;;  %2439 = vmatprep.mubr.bf16.mxu1 %v11116_v39 }
 0x462   :  { %2369 = vmatpush1.bf16.msra.mxu0 %v8760_v23  ;;  %2410 = vmatpush1.bf16.msra.mxu1 %v8765_v1  ;;  %v1870_v23 = vadd.f32 1.0, %v7751_v20 }
 0x463   :  { %2370 = vmatprep.subr.bf16.mxu0 %v8772_v25  ;;  %2411 = vmatprep.subr.bf16.mxu1 %v8777_v26  ;;  %v11174_v26 = vld [vmem:[#allocation9_spill] sm:$0xff] }
 0x464   :  { %7758 = vrcp.f32 %v1870_v23 }
 0x466   :  { %2371 = vmatpush1.bf16.msra.mxu0 %v8786_v28  ;;  %2412 = vmatpush1.bf16.msra.mxu1 %v8791_v30  ;;  %v9236_v30 = vpop.permute.xlu0 %1889 }
 0x467   :  { %v7755_v22 = vpop.eup %7754  ;;  %2372 = vmatprep.subr.bf16.mxu0 %v8798_v0  ;;  %2413 = vmatprep.subr.bf16.mxu1 %v8803_v2  ;;  %11175 = vst [vmem:[#allocation9_spill] sm:$0xff] %v9236_v30  ;;  %vm1891_vm10 = vcmp.eq.s32.totalorder %v9236_v30, 1  ;;  %v9672_v30 = vld [vmem:[%s11052_s8 + $0xe4] ss:$16 sps:$4 sm:$0xff]  }
 0x468   :  { %v7757_v60 = vpop.eup %7756  ;;  %v1874_v19 = vmul.f32 %v7755_v22, %v7753_v21  ;;  %vm9246_vm11 = vmpackc.low %vm1891_vm10, %vm1891_vm10  ;;  %v11179_v22 = vld [vmem:[#allocation10_spill] sm:$0xff] }
 0x469   :  { %v1873_v18 = vmul.f32 0.0, %v7757_v60 }
 0x46a   :  { %2373 = vmatpush1.bf16.msra.mxu0 %v8810_v31  ;;  %2414 = vmatpush1.bf16.msra.mxu1 %v8815_v32  ;;  %v11176_v31 = vmov 0 }
 0x46b   :  { %v9221_v1 = vadd.f32 %v1874_v19, %v1873_v18  ;;  %2374 = vmatprep.subr.bf16.mxu0 %v8822_v33  ;;  %2415 = vmatprep.subr.bf16.mxu1 %v8827_v34  ;;  %v11177_v31 = vsel %vm9246_vm11, 4294967295, %v11176_v31  ;;  %v9270_v34 = vld [vmem:[%s11051_s7 + $0xc] ss:$16 sps:$4 sm:$0xff]  }
 0x46c   :  { %11178 = vst [vmem:[#allocation65_spill] sm:$0xff] %v11177_v31 }
 0x46d   :  { %7760 = vtanh.f32 %v9221_v1  ;;  %v1894_v55 = vsel %vm1891_vm10, %v9221_v1, 0.0 }
 0x46e   :  { %2375 = vmatpush1.bf16.msra.mxu0 %v8834_v35  ;;  %2416 = vmatpush1.bf16.msra.mxu1 %v8839_v36  ;;  %v7759_v25 = vpop.eup %7758  ;;  %v9275_v35 = vld [vmem:[%s11051_s7] ss:$16 sps:$4 sm:$0xff]   ;;  %v9280_v36 = vld [vmem:[%s11051_s7 + $0x8] ss:$16 sps:$4 sm:$0xff]  }
 0x46f   :  { %2376 = vmatprep.subr.bf16.mxu0 %v8846_v3  ;;  %2417 = vmatprep.subr.bf16.mxu1 %v8851_v27  ;;  %v9289_v3 = vld [vmem:[%s11051_s7 + $0x24] ss:$16 sps:$4 sm:$0xff]   ;;  %v9294_v27 = vld [vmem:[%s11051_s7 + $0x2c] ss:$16 sps:$4 sm:$0xff]  }
 0x472   :  { %2377 = vmatpush1.bf16.msra.mxu0 %v8858_v5  ;;  %2418 = vmatpush1.bf16.msra.mxu1 %v8863_v7  ;;  %v9299_v5 = vld [vmem:[%s11051_s7 + $0x20] ss:$16 sps:$4 sm:$0xff]   ;;  %v9304_v7 = vld [vmem:[%s11051_s7 + $0x28] ss:$16 sps:$4 sm:$0xff]  }
 0x473   :  { %2378 = vmatprep.subr.bf16.mxu0 %v8870_v29  ;;  %2419 = vmatprep.subr.bf16.mxu1 %v8875_v37  ;;  %v9313_v29 = vld [vmem:[%s11051_s7 + $0x44] ss:$16 sps:$4 sm:$0xff]   ;;  %v9318_v37 = vld [vmem:[%s11051_s7 + $0x4c] ss:$16 sps:$4 sm:$0xff]  }
 0x476   :  { %2379 = vmatpush1.bf16.msra.mxu0 %v8882_v38  ;;  %2420 = vmatpush1.bf16.msra.mxu1 %v11174_v26  ;;  %v9323_v38 = vld [vmem:[%s11051_s7 + $0x40] ss:$16 sps:$4 sm:$0xff]  }
 0x477   :  { %v7761_v28 = vpop.eup %7760  ;;  %2380 = vmatprep.subr.bf16.mxu0 %v8894_v40  ;;  %2421 = vmatprep.subr.bf16.mxu1 %v8899_v41  ;;  %v9328_v40 = vld [vmem:[%s11051_s7 + $0x48] ss:$16 sps:$4 sm:$0xff]   ;;  %v9337_v41 = vld [vmem:[%s11051_s7 + $0x64] ss:$16 sps:$4 sm:$0xff]  }
 0x478   :  { %v1877_v0 = vmul.f32 %v7761_v28, %v7759_v25 }
 0x47a   :  { %2381 = vmatpush1.bf16.msra.mxu0 %v8906_v42  ;;  %2422 = vmatpush1.bf16.msra.mxu1 %v8911_v13  ;;  %v1878_v2 = vpack.c.bf16 %v1877_v0, %v1877_v0  ;;  %v9265_v13 = vld [vmem:[%s11051_s7 + $0x4] ss:$16 sps:$4 sm:$0xff]   ;;  %v9342_v42 = vld [vmem:[%s11051_s7 + $0x6c] ss:$16 sps:$4 sm:$0xff]  }
 0x47b   :  { %2730 = vmatprep.subr.bf16.mxu0 %v9265_v13  ;;  %2771 = vmatprep.subr.bf16.mxu1 %v9270_v34 }
 0x47c   :  { %v9252_v32 = vsel %vm9246_vm11, %v1878_v2, 0 }
 0x47d   :  { %v1897_v33 = vunpack.c.l.bf16 %v9252_v32  ;;  %2399 = vmatmul.mubr.bf16.vlgmr.msra.gmra.mrb[52].mxu0 %v9252_v32  ;;  %2440 = vmatmul.mubr.bf16.vlgmr.msra.gmra.mrb[52].mxu1 %v9252_v32 }
 0x47e   :  { %2762 = vmatprep.mubr.bf16.mxu0 %v11116_v39  ;;  %2803 = vmatprep.mubr.bf16.mxu1 %v11116_v39 }
 0x47f   :  { %6663 = vst [vmem:[%s11055_s11 + $0x78] sm:$0xff] %v1897_v33  ;;  %2731 = vmatpush1.bf16.msra.mxu0 %v9275_v35  ;;  %2772 = vmatpush1.bf16.msra.mxu1 %v9280_v36 }
 0x480   :  { %2732 = vmatprep.subr.bf16.mxu0 %v9289_v3  ;;  %2773 = vmatprep.subr.bf16.mxu1 %v9294_v27 }
 0x483   :  { %2733 = vmatpush1.bf16.msra.mxu0 %v9299_v5  ;;  %2774 = vmatpush1.bf16.msra.mxu1 %v9304_v7 }
 0x484   :  { %2734 = vmatprep.subr.bf16.mxu0 %v9313_v29  ;;  %2775 = vmatprep.subr.bf16.mxu1 %v9318_v37 }
 0x487   :  { %2735 = vmatpush1.bf16.msra.mxu0 %v9323_v38  ;;  %2776 = vmatpush1.bf16.msra.mxu1 %v9328_v40 }
 0x488   :  { %2736 = vmatprep.subr.bf16.mxu0 %v9337_v41  ;;  %2777 = vmatprep.subr.bf16.mxu1 %v9342_v42 }
 0x48b   :  { %2737 = vmatpush1.bf16.msra.mxu0 %v9347_v4  ;;  %2778 = vmatpush1.bf16.msra.mxu1 %v9352_v16 }
 0x48c   :  { %2738 = vmatprep.subr.bf16.mxu0 %v9361_v45  ;;  %2779 = vmatprep.subr.bf16.mxu1 %v9366_v43 }
 0x48f   :  { %2739 = vmatpush1.bf16.msra.mxu0 %v9371_v50  ;;  %2780 = vmatpush1.bf16.msra.mxu1 %v9376_v51 }
 0x490   :  { %2740 = vmatprep.subr.bf16.mxu0 %v9385_v24  ;;  %2781 = vmatprep.subr.bf16.mxu1 %v9390_v52 }
 0x493   :  { %2741 = vmatpush1.bf16.msra.mxu0 %v9395_v53  ;;  %2782 = vmatpush1.bf16.msra.mxu1 %v9400_v61 }
 0x494   :  { %2742 = vmatprep.subr.bf16.mxu0 %v9409_v9  ;;  %2783 = vmatprep.subr.bf16.mxu1 %v9414_v57 }
 0x497   :  { %2743 = vmatpush1.bf16.msra.mxu0 %v9419_v14  ;;  %2784 = vmatpush1.bf16.msra.mxu1 %v9424_v44 }
 0x498   :  { %2744 = vmatprep.subr.bf16.mxu0 %v9433_v47  ;;  %2785 = vmatprep.subr.bf16.mxu1 %v9438_v62 }
 0x49b   :  { %2745 = vmatpush1.bf16.msra.mxu0 %v9443_v10  ;;  %2786 = vmatpush1.bf16.msra.mxu1 %v9448_v54 }
 0x49c   :  { %3004 = vmatprep.subr.bf16.mxu0 %v9457_v56  ;;  %3045 = vmatprep.subr.bf16.mxu1 %v9462_v17 }
 0x530   :  { %v2126_v12 = vpop.f32.mrb[48].mxu0  ;;  %v2167_v11 = vpop.f32.mrb[48].mxu1 }
 0x531   :  { %v2452_v46 = vadd.f32 %v2126_v12, %v8987_v58  ;;  %v2454_v8 = vadd.f32 %v2167_v11, %v8990_v59  ;;  %v2128_v6 = vpop.f32.mrb[49].mxu0  ;;  %v2169_v20 = vpop.f32.mrb[49].mxu1 }
 0x532   :  { %v2453_v21 = vadd.f32 %v2128_v6, %v8993_v63  ;;  %v2455_v60 = vadd.f32 %v2169_v20, %v11179_v22  ;;  %v2130_v19 = vpop.f32.mrb[50].mxu0  ;;  %v2171_v23 = vpop.f32.mrb[50].mxu1 }
 0x533   :  { %v6728_v18 = vmul.f32 -1.442695, %v2452_v46  ;;  %v2131_v25 = vpop.f32.mrb[51].mxu0  ;;  %v2172_v26 = vpop.f32.mrb[51].mxu1  ;;  %v1886_v46 = vsel %vm1883_vm8, %v9182_v15, 0.0  ;;  %v11184_v15 = vld [vmem:[#allocation62_spill] sm:$0xff] }
 0x534   :  { %v6729_v28 = vmul.f32 -1.442695, %v2453_v21  ;;  %v6730_v0 = vmul.f32 -1.442695, %v2455_v60  ;;  %v9473_v60 = vpop.permute.xlu1 %2516  ;;  %v11182_v26 = vld [vmem:[#allocation60_spill] sm:$0xff] }
 0x535   :  { %7762 = vpow2.f32 %v6728_v18  ;;  %11180 = vst [vmem:[#allocation10_spill] sm:$0xff] %v9473_v60  ;;  %vm2518_vm12 = vcmp.eq.s32.totalorder %v9473_v60, 1 }
 0x536   :  { %7764 = vpow2.f32 %v6729_v28  ;;  %vm9497_vm13 = vmpackc.low %vm2518_vm12, %vm2518_vm12 }
 0x537   :  { %7766 = vpow2.f32 %v6730_v0 }
 0x538   :  { %7768 = vtanh.f32 %v2454_v8  ;;  %v11181_v8 = vld [vmem:[#allocation59_spill] sm:$0xff] }
 0x53f   :  { %v7763_v2 = vpop.eup %7762 }
 0x540   :  { %v7765_v33 = vpop.eup %7764  ;;  %v2467_v58 = vadd.f32 1.0, %v7763_v2 }
 0x541   :  { %v2473_v59 = vadd.f32 1.0, %v7765_v33  ;;  %v7767_v63 = vpop.eup %7766  ;;  %v11183_v33 = vld [vmem:[#allocation61_spill] sm:$0xff] }
 0x542   :  { %7770 = vrcp.f32 %v2467_v58  ;;  %v7769_v12 = vpop.eup %7768  ;;  %v2480_v21 = vadd.f32 1.0, %v7767_v63 }
 0x543   :  { %7772 = vrcp.f32 %v2473_v59 }
 0x544   :  { %7774 = vrcp.f32 %v2480_v21 }
 0x54c   :  { %v7771_v11 = vpop.eup %7770 }
 0x54d   :  { %v7773_v6 = vpop.eup %7772  ;;  %v2484_v20 = vmul.f32 %v7771_v11, %v7769_v12 }
 0x54e   :  { %v2483_v22 = vmul.f32 %v7773_v6, %v1886_v46 }
 0x550   :  { %v2485_v19 = vadd.f32 %v2484_v20, %v2483_v22  ;;  %v2400_v23 = vpop.f32.mrb[52].mxu0  ;;  %v2441_v18 = vpop.f32.mrb[52].mxu1 }
 0x551   :  { %v2460_v25 = vadd.f32 %v2400_v23, %v11181_v8  ;;  %v2462_v28 = vadd.f32 %v2441_v18, %v11182_v26  ;;  %v2402_v0 = vpop.f32.mrb[53].mxu0  ;;  %v2443_v2 = vpop.f32.mrb[53].mxu1 }
 0x552   :  { %v2461_v58 = vadd.f32 %v2402_v0, %v11183_v33  ;;  %v2463_v59 = vadd.f32 %v2443_v2, %v11184_v15  ;;  %v2404_v63 = vpop.f32.mrb[54].mxu0  ;;  %v2445_v12 = vpop.f32.mrb[54].mxu1  ;;  %7776 = vtanh.f32 %v2485_v19  ;;  %v9482_v11 = vsel %vm2518_vm12, %v2485_v19, %v1886_v46  ;;  %v9487_v2 = vld [vmem:[%s11052_s8] ss:$16 sps:$4 sm:$0xff]   ;;  %v9492_v46 = vld [vmem:[%s11052_s8 + $0x8] ss:$16 sps:$4 sm:$0xff]  }
 0x553   :  { %v6731_v6 = vmul.f32 -1.442695, %v2460_v25  ;;  %v2405_v20 = vpop.f32.mrb[55].mxu0  ;;  %v2446_v21 = vpop.f32.mrb[55].mxu1  ;;  %v11185_v33 = vmov 0 }
 0x554   :  { %v6732_v22 = vmul.f32 -1.442695, %v2461_v58  ;;  %v7775_v23 = vpop.eup %7774  ;;  %v6733_v8 = vmul.f32 -1.442695, %v2463_v59  ;;  %v11186_v33 = vsel %vm9497_vm13, 4294967295, %v11185_v33 }
 0x555   :  { %7778 = vpow2.f32 %v6731_v6  ;;  %11187 = vst [vmem:[#allocation59_spill] sm:$0xff] %v11186_v33  ;;  %v9504_v15 = vld [vmem:[%s11052_s8 + $0x24] ss:$16 sps:$4 sm:$0xff]   ;;  %v9509_v59 = vld [vmem:[%s11052_s8 + $0x2c] ss:$16 sps:$4 sm:$0xff]  }
 0x556   :  { %7780 = vpow2.f32 %v6732_v22  ;;  %v9540_v21 = vld [vmem:[%s11052_s8 + $0x44] ss:$16 sps:$4 sm:$0xff]   ;;  %v9545_v22 = vld [vmem:[%s11052_s8 + $0x4c] ss:$16 sps:$4 sm:$0xff]  }
 0x557   :  { %7782 = vpow2.f32 %v6733_v8  ;;  %v9566_v8 = vld [vmem:[%s11052_s8 + $0x64] ss:$16 sps:$4 sm:$0xff]  }
 0x558   :  { %7784 = vtanh.f32 %v2462_v28  ;;  %v9525_v28 = vld [vmem:[%s11052_s8 + $0x20] ss:$16 sps:$4 sm:$0xff]   ;;  %11189 = vst [vmem:[#allocation61_spill] sm:$0xff] %v9566_v8 }
 0x55c   :  { %v7777_v18 = vpop.eup %7776 }
 0x55d   :  { %v2487_v26 = vmul.f32 %v7777_v18, %v7775_v23  ;;  %v9554_v23 = vld [vmem:[%s11052_s8 + $0x40] ss:$16 sps:$4 sm:$0xff]   ;;  %v9559_v18 = vld [vmem:[%s11052_s8 + $0x48] ss:$16 sps:$4 sm:$0xff]  }
 0x55e   :  { %11188 = vst [vmem:[#allocation60_spill] sm:$0xff] %v9559_v18 }
 0x55f   :  { %v7779_v0 = vpop.eup %7778  ;;  %v2488_v19 = vpack.c.bf16 %v2487_v26, %v2487_v26  ;;  %v9571_v26 = vld [vmem:[%s11052_s8 + $0x6c] ss:$16 sps:$4 sm:$0xff]  }
 0x560   :  { %v7781_v25 = vpop.eup %7780  ;;  %v2492_v58 = vadd.f32 1.0, %v7779_v0  ;;  %11190 = vst [vmem:[#allocation62_spill] sm:$0xff] %v9571_v26 }
 0x561   :  { %v2498_v63 = vadd.f32 1.0, %v7781_v25  ;;  %v9514_v12 = vsel %vm9497_vm13, %v2488_v19, %v9197_v49  ;;  %v2530_v6 = vsel %vm9497_vm13, %v2488_v19, 0  ;;  %v9530_v49 = vld [vmem:[%s11052_s8 + $0x28] ss:$16 sps:$4 sm:$0xff]   ;;  %v7783_v0 = vpop.eup %7782  ;;  %v9578_v25 = vld [vmem:[%s11052_s8 + $0x60] ss:$16 sps:$4 sm:$0xff]  }
 0x562   :  { %7786 = vrcp.f32 %v2492_v58  ;;  %v2531_v20 = vunpack.c.l.bf16 %v2530_v6  ;;  %2763 = vmatmul.mubr.bf16.vlgmr.msra.gmra.mrb[56].mxu0 %v9514_v12  ;;  %2804 = vmatmul.mubr.bf16.vlgmr.msra.gmra.mrb[56].mxu1 %v9514_v12  ;;  %v7785_v19 = vpop.eup %7784  ;;  %v9583_v58 = vld [vmem:[%s11052_s8 + $0x68] ss:$16 sps:$4 sm:$0xff]   ;;  %v9590_v6 = vld [vmem:[%s11052_s8 + $0x84] ss:$16 sps:$4 sm:$0xff]   ;;  %v2505_v33 = vadd.f32 1.0, %v7783_v0 }
 0x563   :  { %7788 = vrcp.f32 %v2498_v63  ;;  %3005 = vmatpush1.bf16.msra.mxu0 %v9487_v2  ;;  %3046 = vmatpush1.bf16.msra.mxu1 %v9492_v46  ;;  %v9624_v0 = vld [vmem:[%s11052_s8 + $0xac] ss:$16 sps:$4 sm:$0xff]  }
 0x564   :  { %6734 = vst [vmem:[%s11055_s11 + $0x10] sm:$0xff] %v2531_v20  ;;  %3006 = vmatprep.subr.bf16.mxu0 %v9504_v15  ;;  %3047 = vmatprep.subr.bf16.mxu1 %v9509_v59  ;;  %v9595_v20 = vld [vmem:[%s11052_s8 + $0x8c] ss:$16 sps:$4 sm:$0xff]   ;;  %11193 = vst [vmem:[#allocation68_spill] sm:$0xff] %v9624_v0  ;;  %7790 = vrcp.f32 %v2505_v33 }
 0x565   :  { %3036 = vmatprep.mubr.bf16.mxu0 %v11116_v39  ;;  %3077 = vmatprep.mubr.bf16.mxu1 %v11116_v39  ;;  %v9653_v33 = vld [vmem:[%s11052_s8 + $0xcc] ss:$16 sps:$4 sm:$0xff]  }
 0x566   :  { %11197 = vst [vmem:[#allocation72_spill] sm:$0xff] %v9653_v33 }
 0x567   :  { %3007 = vmatpush1.bf16.msra.mxu0 %v9525_v28  ;;  %3048 = vmatpush1.bf16.msra.mxu1 %v9530_v49 }
 0x568   :  { %3008 = vmatprep.subr.bf16.mxu0 %v9540_v21  ;;  %3049 = vmatprep.subr.bf16.mxu1 %v9545_v22 }
 0x56b   :  { %3009 = vmatpush1.bf16.msra.mxu0 %v9554_v23  ;;  %3050 = vmatpush1.bf16.msra.mxu1 %v9559_v18  ;;  %v9612_v18 = vpop.permute.xlu0 %2524 }
 0x56c   :  { %v7787_v63 = vpop.eup %7786  ;;  %3010 = vmatprep.subr.bf16.mxu0 %v9566_v8  ;;  %3051 = vmatprep.subr.bf16.mxu1 %v9571_v26  ;;  %v9605_v26 = vld [vmem:[%s11052_s8 + $0x80] ss:$16 sps:$4 sm:$0xff]   ;;  %v9610_v8 = vld [vmem:[%s11052_s8 + $0x88] ss:$16 sps:$4 sm:$0xff]   ;;  %11191 = vst [vmem:[#allocation66_spill] sm:$0xff] %v9612_v18  ;;  %vm2526_vm14 = vcmp.eq.s32.totalorder %v9612_v18, 1 }
 0x56d   :  { %v7789_v48 = vpop.eup %7788  ;;  %v2509_v31 = vmul.f32 %v7787_v63, %v7785_v19  ;;  %v9641_v19 = vld [vmem:[%s11052_s8 + $0xa8] ss:$16 sps:$4 sm:$0xff]   ;;  %v9660_v63 = vld [vmem:[%s11052_s8 + $0xc0] ss:$16 sps:$4 sm:$0xff]   ;;  %vm9698_vm15 = vmpackc.low %vm2526_vm14, %vm2526_vm14 }
 0x56e   :  { %v2508_v60 = vmul.f32 %v7789_v48, %v1894_v55  ;;  %v9619_v48 = vld [vmem:[%s11052_s8 + $0xa4] ss:$16 sps:$4 sm:$0xff]   ;;  %11195 = vst [vmem:[#allocation70_spill] sm:$0xff] %v9641_v19  ;;  %11198 = vst [vmem:[#allocation73_spill] sm:$0xff] %v9660_v63 }
 0x56f   :  { %3011 = vmatpush1.bf16.msra.mxu0 %v9578_v25  ;;  %3052 = vmatpush1.bf16.msra.mxu1 %v9583_v58  ;;  %11192 = vst [vmem:[#allocation67_spill] sm:$0xff] %v9619_v48 }
 0x570   :  { %v2510_v1 = vadd.f32 %v2509_v31, %v2508_v60  ;;  %3012 = vmatprep.subr.bf16.mxu0 %v9590_v6  ;;  %3053 = vmatprep.subr.bf16.mxu1 %v9595_v20  ;;  %v9636_v60 = vld [vmem:[%s11052_s8 + $0xa0] ss:$16 sps:$4 sm:$0xff]  }
 0x571   :  { %11194 = vst [vmem:[#allocation69_spill] sm:$0xff] %v9636_v60 }
 0x572   :  { %7792 = vtanh.f32 %v2510_v1  ;;  %v9629_v31 = vsel %vm2526_vm14, %v2510_v1, %v1894_v55  ;;  %v9648_v55 = vld [vmem:[%s11052_s8 + $0xc4] ss:$16 sps:$4 sm:$0xff]   ;;  %v9665_v1 = vld [vmem:[%s11052_s8 + $0xc8] ss:$16 sps:$4 sm:$0xff]  }
 0x573   :  { %3013 = vmatpush1.bf16.msra.mxu0 %v9605_v26  ;;  %3054 = vmatpush1.bf16.msra.mxu1 %v9610_v8  ;;  %11196 = vst [vmem:[#allocation71_spill] sm:$0xff] %v9648_v55  ;;  %11199 = vst [vmem:[#allocation74_spill] sm:$0xff] %v9665_v1 }
 0x574   :  { %3014 = vmatprep.subr.bf16.mxu0 %v9619_v48  ;;  %3055 = vmatprep.subr.bf16.mxu1 %v9624_v0 }
 0x577   :  { %3015 = vmatpush1.bf16.msra.mxu0 %v9636_v60  ;;  %3056 = vmatpush1.bf16.msra.mxu1 %v9641_v19  ;;  %v9677_v19 = vld [vmem:[%s11052_s8 + $0xec] ss:$16 sps:$4 sm:$0xff]   ;;  %v7791_v60 = vpop.eup %7790 }
 0x578   :  { %3016 = vmatprep.subr.bf16.mxu0 %v9648_v55  ;;  %3057 = vmatprep.subr.bf16.mxu1 %v9653_v33  ;;  %v9684_v55 = vld [vmem:[%s11052_s8 + $0xe0] ss:$16 sps:$4 sm:$0xff]   ;;  %v9689_v33 = vld [vmem:[%s11052_s8 + $0xe8] ss:$16 sps:$4 sm:$0xff]  }
 0x57b   :  { %3017 = vmatpush1.bf16.msra.mxu0 %v9660_v63  ;;  %3058 = vmatpush1.bf16.msra.mxu1 %v9665_v1  ;;  %v11200_v63 = vmov 0 }
 0x57c   :  { %v7793_v0 = vpop.eup %7792  ;;  %3018 = vmatprep.subr.bf16.mxu0 %v9672_v30  ;;  %3059 = vmatprep.subr.bf16.mxu1 %v9677_v19  ;;  %v11201_v63 = vsel %vm9698_vm15, 4294967295, %v11200_v63 }
 0x57d   :  { %v2512_v48 = vmul.f32 %v7793_v0, %v7791_v60  ;;  %11202 = vst [vmem:[#allocation75_spill] sm:$0xff] %v11201_v63 }
 0x57f   :  { %3019 = vmatpush1.bf16.msra.mxu0 %v9684_v55  ;;  %3060 = vmatpush1.bf16.msra.mxu1 %v9689_v33  ;;  %v2513_v1 = vpack.c.bf16 %v2512_v48, %v2512_v48 }
 0x580   :  { %3368 = vmatprep.subr.bf16.mxu0 %v9265_v13  ;;  %3409 = vmatprep.subr.bf16.mxu1 %v9270_v34  ;;  %v11203_v34 = vld [vmem:[#allocation11_spill] sm:$0xff] }
 0x581   :  { %v9707_v0 = vsel %vm9698_vm15, %v2513_v1, %v9252_v32  ;;  %v2534_v60 = vsel %vm9698_vm15, %v2513_v1, 0 }
 0x582   :  { %v2535_v48 = vunpack.c.l.bf16 %v2534_v60  ;;  %3037 = vmatmul.mubr.bf16.vlgmr.msra.gmra.mrb[60].mxu0 %v9707_v0  ;;  %3078 = vmatmul.mubr.bf16.vlgmr.msra.gmra.mrb[60].mxu1 %v9707_v0  ;;  %v11209_v60 = vld [vmem:[#allocation56_spill] sm:$0xff] }
 0x583   :  { %3369 = vmatpush1.bf16.msra.mxu0 %v9275_v35  ;;  %3410 = vmatpush1.bf16.msra.mxu1 %v9280_v36  ;;  %v11204_v36 = vld [vmem:[#allocation12_spill] sm:$0xff] }
 0x584   :  { %6735 = vst [vmem:[%s11055_s11 + $0x68] sm:$0xff] %v2535_v48  ;;  %3370 = vmatprep.subr.bf16.mxu0 %v9289_v3  ;;  %3411 = vmatprep.subr.bf16.mxu1 %v9294_v27 }
 0x585   :  { %3400 = vmatprep.mubr.bf16.mxu0 %v11116_v39  ;;  %3441 = vmatprep.mubr.bf16.mxu1 %v11116_v39 }
 0x587   :  { %3371 = vmatpush1.bf16.msra.mxu0 %v9299_v5  ;;  %3412 = vmatpush1.bf16.msra.mxu1 %v9304_v7  ;;  %v11205_v7 = vld [vmem:[#allocation13_spill] sm:$0xff] }
 0x588   :  { %3372 = vmatprep.subr.bf16.mxu0 %v9313_v29  ;;  %3413 = vmatprep.subr.bf16.mxu1 %v9318_v37  ;;  %v11206_v37 = vld [vmem:[#allocation14_spill] sm:$0xff] }
 0x58b   :  { %3373 = vmatpush1.bf16.msra.mxu0 %v9323_v38  ;;  %3414 = vmatpush1.bf16.msra.mxu1 %v9328_v40 }
 0x58c   :  { %3374 = vmatprep.subr.bf16.mxu0 %v9337_v41  ;;  %3415 = vmatprep.subr.bf16.mxu1 %v9342_v42 }
 0x58f   :  { %3375 = vmatpush1.bf16.msra.mxu0 %v9347_v4  ;;  %3416 = vmatpush1.bf16.msra.mxu1 %v9352_v16 }
 0x590   :  { %3376 = vmatprep.subr.bf16.mxu0 %v9361_v45  ;;  %3417 = vmatprep.subr.bf16.mxu1 %v9366_v43 }
 0x593   :  { %3377 = vmatpush1.bf16.msra.mxu0 %v9371_v50  ;;  %3418 = vmatpush1.bf16.msra.mxu1 %v9376_v51 }
 0x594   :  { %3378 = vmatprep.subr.bf16.mxu0 %v9385_v24  ;;  %3419 = vmatprep.subr.bf16.mxu1 %v9390_v52 }
 0x597   :  { %3379 = vmatpush1.bf16.msra.mxu0 %v9395_v53  ;;  %3420 = vmatpush1.bf16.msra.mxu1 %v9400_v61 }
 0x598   :  { %3380 = vmatprep.subr.bf16.mxu0 %v9409_v9  ;;  %3421 = vmatprep.subr.bf16.mxu1 %v9414_v57 }
 0x59b   :  { %3381 = vmatpush1.bf16.msra.mxu0 %v9419_v14  ;;  %3422 = vmatpush1.bf16.msra.mxu1 %v9424_v44 }
 0x59c   :  { %3382 = vmatprep.subr.bf16.mxu0 %v9433_v47  ;;  %3423 = vmatprep.subr.bf16.mxu1 %v9438_v62  ;;  %v9755_v62 = vpop.permute.xlu1 %3154 }
 0x59d   :  { %11207 = vst [vmem:[#allocation11_spill] sm:$0xff] %v9755_v62  ;;  %vm3156_vm0 = vcmp.eq.s32.totalorder %v9755_v62, 1 }
 0x59e   :  { %vm9770_vm1 = vmpackc.low %vm3156_vm0, %vm3156_vm0 }
 0x59f   :  { %3383 = vmatpush1.bf16.msra.mxu0 %v9443_v10  ;;  %3424 = vmatpush1.bf16.msra.mxu1 %v9448_v54 }
 0x5a0   :  { %3642 = vmatprep.subr.bf16.mxu0 %v9457_v56  ;;  %3683 = vmatprep.subr.bf16.mxu1 %v9462_v17  ;;  %v11208_v17 = vld [vmem:[#allocation55_spill] sm:$0xff] }
 0x635   :  { %v2764_v32 = vpop.f32.mrb[56].mxu0  ;;  %v2805_v13 = vpop.f32.mrb[56].mxu1 }
 0x636   :  { %v3090_v35 = vadd.f32 %v2764_v32, %v11203_v34  ;;  %v3092_v3 = vadd.f32 %v2805_v13, %v11204_v36  ;;  %v2766_v27 = vpop.f32.mrb[57].mxu0  ;;  %v2807_v5 = vpop.f32.mrb[57].mxu1  ;;  %v11210_v34 = vld [vmem:[#allocation57_spill] sm:$0xff]  ;;  %v11211_v36 = vld [vmem:[#allocation58_spill] sm:$0xff] }
 0x637   :  { %v3091_v29 = vadd.f32 %v2766_v27, %v11205_v7  ;;  %v3093_v38 = vadd.f32 %v2807_v5, %v11206_v37  ;;  %v2768_v40 = vpop.f32.mrb[58].mxu0  ;;  %v2809_v41 = vpop.f32.mrb[58].mxu1 }
 0x638   :  { %v6800_v42 = vmul.f32 -1.442695, %v3090_v35  ;;  %v2769_v4 = vpop.f32.mrb[59].mxu0  ;;  %v2810_v16 = vpop.f32.mrb[59].mxu1 }
 0x639   :  { %v6801_v45 = vmul.f32 -1.442695, %v3091_v29  ;;  %v6802_v43 = vmul.f32 -1.442695, %v3093_v38 }
 0x63a   :  { %7794 = vpow2.f32 %v6800_v42 }
 0x63b   :  { %7796 = vpow2.f32 %v6801_v45 }
 0x63c   :  { %7798 = vpow2.f32 %v6802_v43 }
 0x63d   :  { %7800 = vtanh.f32 %v3092_v3 }
 0x644   :  { %v7795_v50 = vpop.eup %7794 }
 0x645   :  { %v7797_v51 = vpop.eup %7796  ;;  %v3105_v24 = vadd.f32 1.0, %v7795_v50 }
 0x646   :  { %v3111_v52 = vadd.f32 1.0, %v7797_v51  ;;  %v7799_v53 = vpop.eup %7798  ;;  %v11212_v51 = vmov 0 }
 0x647   :  { %7802 = vrcp.f32 %v3105_v24  ;;  %v7801_v61 = vpop.eup %7800  ;;  %v3118_v44 = vadd.f32 1.0, %v7799_v53  ;;  %v11213_v51 = vsel %vm9770_vm1, 4294967295, %v11212_v51 }
 0x648   :  { %7804 = vrcp.f32 %v3111_v52  ;;  %11214 = vst [vmem:[#allocation12_spill] sm:$0xff] %v11213_v51 }
 0x649   :  { %7806 = vrcp.f32 %v3118_v44  ;;  %v11223_v44 = vld [vmem:[#allocation71_spill] sm:$0xff] }
 0x651   :  { %v7803_v9 = vpop.eup %7802 }
 0x652   :  { %v7805_v57 = vpop.eup %7804  ;;  %v3122_v14 = vmul.f32 %v7803_v9, %v7801_v61  ;;  %v11217_v9 = vld [vmem:[#allocation62_spill] sm:$0xff] }
 0x653   :  { %v3121_v47 = vmul.f32 %v7805_v57, %v9482_v11  ;;  %v7807_v41 = vpop.eup %7806 }
 0x655   :  { %v3123_v10 = vadd.f32 %v3122_v14, %v3121_v47  ;;  %v3038_v54 = vpop.f32.mrb[60].mxu0  ;;  %v3079_v56 = vpop.f32.mrb[60].mxu1  ;;  %v11224_v47 = vld [vmem:[#allocation72_spill] sm:$0xff] }
 0x656   :  { %v3098_v1 = vadd.f32 %v3038_v54, %v11208_v17  ;;  %v3100_v48 = vadd.f32 %v3079_v56, %v11209_v60  ;;  %v3040_v32 = vpop.f32.mrb[61].mxu0  ;;  %v3081_v13 = vpop.f32.mrb[61].mxu1  ;;  %v11225_v54 = vld [vmem:[#allocation73_spill] sm:$0xff]  ;;  %v11227_v17 = vmov 0  ;;  %v9866_v60 = vld [vmem:[%s11051_s7 + $0x8] ss:$16 sps:$4 sm:$0xff]  }
 0x657   :  { %v3099_v35 = vadd.f32 %v3040_v32, %v11210_v34  ;;  %v3101_v3 = vadd.f32 %v3081_v13, %v11211_v36  ;;  %v3042_v27 = vpop.f32.mrb[62].mxu0  ;;  %v3083_v5 = vpop.f32.mrb[62].mxu1  ;;  %7808 = vtanh.f32 %v3123_v10  ;;  %v9765_v7 = vsel %vm3156_vm0, %v3123_v10, %v9482_v11  ;;  %v9880_v32 = vld [vmem:[%s11051_s7 + $0x2c] ss:$16 sps:$4 sm:$0xff]   ;;  %v9885_v13 = vld [vmem:[%s11051_s7 + $0x20] ss:$16 sps:$4 sm:$0xff]  }
 0x658   :  { %v6803_v29 = vmul.f32 -1.442695, %v3098_v1  ;;  %v3043_v37 = vpop.f32.mrb[63].mxu0  ;;  %v3084_v38 = vpop.f32.mrb[63].mxu1  ;;  %v9890_v34 = vld [vmem:[%s11051_s7 + $0x28] ss:$16 sps:$4 sm:$0xff]  }
 0x659   :  { %v6804_v40 = vmul.f32 -1.442695, %v3099_v35  ;;  %v6805_v4 = vmul.f32 -1.442695, %v3101_v3  ;;  %v9899_v35 = vld [vmem:[%s11051_s7 + $0x44] ss:$16 sps:$4 sm:$0xff]  }
 0x65a   :  { %7810 = vpow2.f32 %v6803_v29  ;;  %v9904_v36 = vld [vmem:[%s11051_s7 + $0x4c] ss:$16 sps:$4 sm:$0xff]   ;;  %v9909_v3 = vld [vmem:[%s11051_s7 + $0x40] ss:$16 sps:$4 sm:$0xff]   ;;  %v9914_v27 = vld [vmem:[%s11051_s7 + $0x48] ss:$16 sps:$4 sm:$0xff]  }
 0x65b   :  { %7812 = vpow2.f32 %v6804_v40  ;;  %v9923_v5 = vld [vmem:[%s11051_s7 + $0x64] ss:$16 sps:$4 sm:$0xff]   ;;  %v9928_v29 = vld [vmem:[%s11051_s7 + $0x6c] ss:$16 sps:$4 sm:$0xff]   ;;  %v9933_v37 = vld [vmem:[%s11051_s7 + $0x60] ss:$16 sps:$4 sm:$0xff]  }
 0x65c   :  { %7814 = vpow2.f32 %v6805_v4  ;;  %v9938_v38 = vld [vmem:[%s11051_s7 + $0x68] ss:$16 sps:$4 sm:$0xff]   ;;  %v9947_v40 = vld [vmem:[%s11051_s7 + $0x84] ss:$16 sps:$4 sm:$0xff]  }
 0x65d   :  { %7816 = vtanh.f32 %v3100_v48  ;;  %v9875_v48 = vld [vmem:[%s11051_s7 + $0x24] ss:$16 sps:$4 sm:$0xff]   ;;  %v9962_v4 = vld [vmem:[%s11051_s7 + $0x88] ss:$16 sps:$4 sm:$0xff]  }
 0x661   :  { %v7809_v42 = vpop.eup %7808 }
 0x662   :  { %v3125_v16 = vmul.f32 %v7809_v42, %v7807_v41  ;;  %v9952_v41 = vld [vmem:[%s11051_s7 + $0x8c] ss:$16 sps:$4 sm:$0xff]   ;;  %v9957_v42 = vld [vmem:[%s11051_s7 + $0x80] ss:$16 sps:$4 sm:$0xff]  }
 0x664   :  { %v7811_v45 = vpop.eup %7810  ;;  %v3126_v43 = vpack.c.bf16 %v3125_v16, %v3125_v16  ;;  %v9971_v16 = vld [vmem:[%s11051_s7 + $0xa4] ss:$16 sps:$4 sm:$0xff]  }
 0x665   :  { %v7813_v50 = vpop.eup %7812  ;;  %v3130_v11 = vadd.f32 1.0, %v7811_v45  ;;  %v9976_v45 = vld [vmem:[%s11051_s7 + $0xac] ss:$16 sps:$4 sm:$0xff]  }
 0x666   :  { %v3136_v24 = vadd.f32 1.0, %v7813_v50  ;;  %v9777_v52 = vsel %vm9770_vm1, %v3126_v43, %v9514_v12  ;;  %v3168_v53 = vsel %vm9770_vm1, %v3126_v43, 0  ;;  %v11215_v12 = vld [vmem:[#allocation60_spill] sm:$0xff]  ;;  %v9981_v43 = vld [vmem:[%s11051_s7 + $0xa0] ss:$16 sps:$4 sm:$0xff]  }
 0x667   :  { %7818 = vrcp.f32 %v3130_v11  ;;  %v3169_v61 = vunpack.c.l.bf16 %v3168_v53  ;;  %3401 = vmatmul.mubr.bf16.vlgmr.msra.gmra.mrb[64].mxu0 %v9777_v52  ;;  %3442 = vmatmul.mubr.bf16.vlgmr.msra.gmra.mrb[64].mxu1 %v9777_v52  ;;  %v9986_v50 = vld [vmem:[%s11051_s7 + $0xa8] ss:$16 sps:$4 sm:$0xff]   ;;  %v9995_v11 = vld [vmem:[%s11051_s7 + $0xc4] ss:$16 sps:$4 sm:$0xff]   ;;  %v10005_v53 = vld [vmem:[%s11051_s7 + $0xc0] ss:$16 sps:$4 sm:$0xff]  }
 0x668   :  { %7820 = vrcp.f32 %v3136_v24  ;;  %3643 = vmatpush1.bf16.msra.mxu0 %v9487_v2  ;;  %3684 = vmatpush1.bf16.msra.mxu1 %v9492_v46  ;;  %v7815_v2 = vpop.eup %7814  ;;  %v10000_v24 = vld [vmem:[%s11051_s7 + $0xcc] ss:$16 sps:$4 sm:$0xff]  }
 0x669   :  { %6806 = vst [vmem:[%s11055_s11 + $0x20] sm:$0xff] %v3169_v61  ;;  %3644 = vmatprep.subr.bf16.mxu0 %v9504_v15  ;;  %3685 = vmatprep.subr.bf16.mxu1 %v9509_v59  ;;  %v7817_v46 = vpop.eup %7816  ;;  %v11216_v59 = vld [vmem:[#allocation61_spill] sm:$0xff]  ;;  %v10010_v61 = vld [vmem:[%s11051_s7 + $0xc8] ss:$16 sps:$4 sm:$0xff]  }
 0x66a   :  { %3674 = vmatprep.mubr.bf16.mxu0 %v11116_v39  ;;  %3715 = vmatprep.mubr.bf16.mxu1 %v11116_v39 }
 0x66c   :  { %3645 = vmatpush1.bf16.msra.mxu0 %v9525_v28  ;;  %3686 = vmatpush1.bf16.msra.mxu1 %v9530_v49  ;;  %v3143_v28 = vadd.f32 1.0, %v7815_v2  ;;  %v10019_v2 = vld [vmem:[%s11051_s7 + $0xe4] ss:$16 sps:$4 sm:$0xff]  }
 0x66d   :  { %3646 = vmatprep.subr.bf16.mxu0 %v9540_v21  ;;  %3687 = vmatprep.subr.bf16.mxu1 %v9545_v22  ;;  %v9803_v21 = vpop.permute.xlu0 %3162 }
 0x66e   :  { %11218 = vst [vmem:[#allocation13_spill] sm:$0xff] %v9803_v21  ;;  %vm3164_vm2 = vcmp.eq.s32.totalorder %v9803_v21, 1  ;;  %7822 = vrcp.f32 %v3143_v28  ;;  %v11230_v28 = vld [vmem:[#allocation15_spill] sm:$0xff] }
 0x66f   :  { %vm9830_vm3 = vmpackc.low %vm3164_vm2, %vm3164_vm2 }
 0x670   :  { %3647 = vmatpush1.bf16.msra.mxu0 %v9554_v23  ;;  %3688 = vmatpush1.bf16.msra.mxu1 %v11215_v12  ;;  %v11228_v17 = vsel %vm9830_vm3, 4294967295, %v11227_v17  ;;  %v10029_v12 = vld [vmem:[%s11051_s7 + $0xe0] ss:$16 sps:$4 sm:$0xff]  }
 0x671   :  { %v7819_v15 = vpop.eup %7818  ;;  %3648 = vmatprep.subr.bf16.mxu0 %v11216_v59  ;;  %3689 = vmatprep.subr.bf16.mxu1 %v11217_v9  ;;  %11229 = vst [vmem:[#allocation14_spill] sm:$0xff] %v11228_v17  ;;  %v10043_v59 = vld [vmem:[%s11052_s8 + $0x4] ss:$16 sps:$4 sm:$0xff]   ;;  %v10048_v9 = vld [vmem:[%s11052_s8 + $0xc] ss:$16 sps:$4 sm:$0xff]   ;;  %v10182_v21 = vpop.permute.xlu0 %3800 }
 0x672   :  { %v7821_v57 = vpop.eup %7820  ;;  %v3147_v14 = vmul.f32 %v7819_v15, %v7817_v46  ;;  %v10024_v46 = vld [vmem:[%s11051_s7 + $0xec] ss:$16 sps:$4 sm:$0xff]   ;;  %v10034_v15 = vld [vmem:[%s11051_s7 + $0xe8] ss:$16 sps:$4 sm:$0xff]   ;;  %vm3802_vm6 = vcmp.eq.s32.totalorder %v10182_v21, 1 }
 0x673   :  { %v3146_v49 = vmul.f32 %v7821_v57, %v9629_v31  ;;  %vm10282_vm7 = vmpackc.low %vm3802_vm6, %vm3802_vm6 }
 0x674   :  { %3649 = vmatpush1.bf16.msra.mxu0 %v9578_v25  ;;  %3690 = vmatpush1.bf16.msra.mxu1 %v9583_v58  ;;  %v11219_v25 = vld [vmem:[#allocation67_spill] sm:$0xff]  ;;  %v11220_v58 = vld [vmem:[#allocation68_spill] sm:$0xff] }
 0x675   :  { %v3148_v22 = vadd.f32 %v3147_v14, %v3146_v49  ;;  %3650 = vmatprep.subr.bf16.mxu0 %v9590_v6  ;;  %3691 = vmatprep.subr.bf16.mxu1 %v9595_v20  ;;  %v11221_v6 = vld [vmem:[#allocation69_spill] sm:$0xff]  ;;  %v11222_v20 = vld [vmem:[#allocation70_spill] sm:$0xff] }
 0x677   :  { %7824 = vtanh.f32 %v3148_v22  ;;  %v9811_v23 = vsel %vm3164_vm2, %v3148_v22, %v9629_v31  ;;  %v11226_v31 = vld [vmem:[#allocation74_spill] sm:$0xff]  ;;  %v11231_v22 = vld [vmem:[#allocation16_spill] sm:$0xff] }
 0x678   :  { %3651 = vmatpush1.bf16.msra.mxu0 %v9605_v26  ;;  %3692 = vmatpush1.bf16.msra.mxu1 %v9610_v8  ;;  %v7823_v10 = vpop.eup %7822 }
 0x679   :  { %3652 = vmatprep.subr.bf16.mxu0 %v11219_v25  ;;  %3693 = vmatprep.subr.bf16.mxu1 %v11220_v58 }
 0x67c   :  { %3653 = vmatpush1.bf16.msra.mxu0 %v11221_v6  ;;  %3694 = vmatpush1.bf16.msra.mxu1 %v11222_v20  ;;  %v11232_v20 = vld [vmem:[#allocation17_spill] sm:$0xff] }
 0x67d   :  { %3654 = vmatprep.subr.bf16.mxu0 %v11223_v44  ;;  %3695 = vmatprep.subr.bf16.mxu1 %v11224_v47  ;;  %v11233_v47 = vld [vmem:[#allocation18_spill] sm:$0xff] }
 0x680   :  { %3655 = vmatpush1.bf16.msra.mxu0 %v11225_v54  ;;  %3696 = vmatpush1.bf16.msra.mxu1 %v11226_v31 }
 0x681   :  { %v7825_v26 = vpop.eup %7824  ;;  %3656 = vmatprep.subr.bf16.mxu0 %v9672_v30  ;;  %3697 = vmatprep.subr.bf16.mxu1 %v9677_v19 }
 0x682   :  { %v3150_v8 = vmul.f32 %v7825_v26, %v7823_v10 }
 0x684   :  { %3657 = vmatpush1.bf16.msra.mxu0 %v9684_v55  ;;  %3698 = vmatpush1.bf16.msra.mxu1 %v9689_v33  ;;  %v3151_v56 = vpack.c.bf16 %v3150_v8, %v3150_v8  ;;  %v9851_v55 = vld [vmem:[%s11051_s7 + $0x4] ss:$16 sps:$4 sm:$0xff]   ;;  %v9856_v33 = vld [vmem:[%s11051_s7 + $0xc] ss:$16 sps:$4 sm:$0xff]  }
 0x685   :  { %4006 = vmatprep.subr.bf16.mxu0 %v9851_v55  ;;  %4047 = vmatprep.subr.bf16.mxu1 %v9856_v33 }
 0x686   :  { %v9837_v1 = vsel %vm9830_vm3, %v3151_v56, %v9707_v0  ;;  %v3172_v30 = vsel %vm9830_vm3, %v3151_v56, 0  ;;  %v9861_v0 = vld [vmem:[%s11051_s7] ss:$16 sps:$4 sm:$0xff]  }
 0x687   :  { %v3173_v19 = vunpack.c.l.bf16 %v3172_v30  ;;  %3675 = vmatmul.mubr.bf16.vlgmr.msra.gmra.mrb[68].mxu0 %v9837_v1  ;;  %3716 = vmatmul.mubr.bf16.vlgmr.msra.gmra.mrb[68].mxu1 %v9837_v1 }
 0x688   :  { %4038 = vmatprep.mubr.bf16.mxu0 %v11116_v39  ;;  %4079 = vmatprep.mubr.bf16.mxu1 %v11116_v39 }
 0x689   :  { %6807 = vst [vmem:[%s11055_s11 + $0x58] sm:$0xff] %v3173_v19  ;;  %4007 = vmatpush1.bf16.msra.mxu0 %v9861_v0  ;;  %4048 = vmatpush1.bf16.msra.mxu1 %v9866_v60 }
 0x68a   :  { %4008 = vmatprep.subr.bf16.mxu0 %v9875_v48  ;;  %4049 = vmatprep.subr.bf16.mxu1 %v9880_v32 }
 0x68d   :  { %4009 = vmatpush1.bf16.msra.mxu0 %v9885_v13  ;;  %4050 = vmatpush1.bf16.msra.mxu1 %v9890_v34 }
 0x68e   :  { %4010 = vmatprep.subr.bf16.mxu0 %v9899_v35  ;;  %4051 = vmatprep.subr.bf16.mxu1 %v9904_v36 }
 0x691   :  { %4011 = vmatpush1.bf16.msra.mxu0 %v9909_v3  ;;  %4052 = vmatpush1.bf16.msra.mxu1 %v9914_v27 }
 0x692   :  { %4012 = vmatprep.subr.bf16.mxu0 %v9923_v5  ;;  %4053 = vmatprep.subr.bf16.mxu1 %v9928_v29 }
 0x695   :  { %4013 = vmatpush1.bf16.msra.mxu0 %v9933_v37  ;;  %4054 = vmatpush1.bf16.msra.mxu1 %v9938_v38 }
 0x696   :  { %4014 = vmatprep.subr.bf16.mxu0 %v9947_v40  ;;  %4055 = vmatprep.subr.bf16.mxu1 %v9952_v41 }
 0x699   :  { %4015 = vmatpush1.bf16.msra.mxu0 %v9957_v42  ;;  %4056 = vmatpush1.bf16.msra.mxu1 %v9962_v4 }
 0x69a   :  { %4016 = vmatprep.subr.bf16.mxu0 %v9971_v16  ;;  %4057 = vmatprep.subr.bf16.mxu1 %v9976_v45 }
 0x69d   :  { %4017 = vmatpush1.bf16.msra.mxu0 %v9981_v43  ;;  %4058 = vmatpush1.bf16.msra.mxu1 %v9986_v50 }
 0x69e   :  { %4018 = vmatprep.subr.bf16.mxu0 %v9995_v11  ;;  %4059 = vmatprep.subr.bf16.mxu1 %v10000_v24 }
 0x6a1   :  { %4019 = vmatpush1.bf16.msra.mxu0 %v10005_v53  ;;  %4060 = vmatpush1.bf16.msra.mxu1 %v10010_v61 }
 0x6a2   :  { %4020 = vmatprep.subr.bf16.mxu0 %v10019_v2  ;;  %4061 = vmatprep.subr.bf16.mxu1 %v10024_v46 }
 0x6a5   :  { %4021 = vmatpush1.bf16.msra.mxu0 %v10029_v12  ;;  %4062 = vmatpush1.bf16.msra.mxu1 %v10034_v15 }
 0x6a6   :  { %4280 = vmatprep.subr.bf16.mxu0 %v10043_v59  ;;  %4321 = vmatprep.subr.bf16.mxu1 %v10048_v9 }
 0x73a   :  { %v3402_v57 = vpop.f32.mrb[64].mxu0  ;;  %v3443_v14 = vpop.f32.mrb[64].mxu1 }
 0x73b   :  { %v3728_v49 = vadd.f32 %v3402_v57, %v11230_v28  ;;  %v3730_v25 = vadd.f32 %v3443_v14, %v11231_v22  ;;  %v3404_v58 = vpop.f32.mrb[65].mxu0  ;;  %v3445_v6 = vpop.f32.mrb[65].mxu1 }
 0x73c   :  { %v3729_v44 = vadd.f32 %v3404_v58, %v11232_v20  ;;  %v3731_v10 = vadd.f32 %v3445_v6, %v11233_v47  ;;  %v3406_v54 = vpop.f32.mrb[66].mxu0  ;;  %v3447_v31 = vpop.f32.mrb[66].mxu1 }
 0x73d   :  { %v6872_v26 = vmul.f32 -1.442695, %v3728_v49  ;;  %v3407_v8 = vpop.f32.mrb[67].mxu0  ;;  %v3448_v56 = vpop.f32.mrb[67].mxu1 }
 0x73e   :  { %v6873_v30 = vmul.f32 -1.442695, %v3729_v44  ;;  %v6874_v19 = vmul.f32 -1.442695, %v3731_v10  ;;  %v10056_v47 = vpop.permute.xlu1 %3792 }
 0x73f   :  { %7826 = vpow2.f32 %v6872_v26  ;;  %11234 = vst [vmem:[#allocation55_spill] sm:$0xff] %v10056_v47  ;;  %vm3794_vm4 = vcmp.eq.s32.totalorder %v10056_v47, 1  ;;  %v10190_v47 = vld [vmem:[%s11052_s8 + $0x80] ss:$16 sps:$4 sm:$0xff]  }
 0x740   :  { %7828 = vpow2.f32 %v6873_v30  ;;  %v11237_v30 = vld [vmem:[#allocation53_spill] sm:$0xff]  ;;  %vm10082_vm5 = vmpackc.low %vm3794_vm4, %vm3794_vm4  ;;  %11243 = vst [vmem:[#allocation58_spill] sm:$0xff] %v10190_v47 }
 0x741   :  { %7830 = vpow2.f32 %v6874_v19 }
 0x742   :  { %7832 = vtanh.f32 %v3730_v25  ;;  %v11236_v25 = vld [vmem:[#allocation52_spill] sm:$0xff] }
 0x749   :  { %v7827_v63 = vpop.eup %7826 }
 0x74a   :  { %v7829_v18 = vpop.eup %7828  ;;  %v3743_v57 = vadd.f32 1.0, %v7827_v63  ;;  %v11235_v63 = vld [vmem:[#allocation51_spill] sm:$0xff] }
 0x74b   :  { %v3749_v14 = vadd.f32 1.0, %v7829_v18  ;;  %v7831_v28 = vpop.eup %7830 }
 0x74c   :  { %7834 = vrcp.f32 %v3743_v57  ;;  %v7833_v22 = vpop.eup %7832  ;;  %v3756_v49 = vadd.f32 1.0, %v7831_v28  ;;  %v11238_v57 = vld [vmem:[#allocation54_spill] sm:$0xff] }
 0x74d   :  { %7836 = vrcp.f32 %v3749_v14 }
 0x74e   :  { %7838 = vrcp.f32 %v3756_v49 }
 0x756   :  { %v7835_v58 = vpop.eup %7834 }
 0x757   :  { %v7837_v6 = vpop.eup %7836  ;;  %v3760_v20 = vmul.f32 %v7835_v58, %v7833_v22 }
 0x758   :  { %v3759_v44 = vmul.f32 %v7837_v6, %v9765_v7 }
 0x75a   :  { %v3761_v54 = vadd.f32 %v3760_v20, %v3759_v44  ;;  %v3676_v10 = vpop.f32.mrb[68].mxu0  ;;  %v3717_v31 = vpop.f32.mrb[68].mxu1 }
 0x75b   :  { %v3736_v18 = vadd.f32 %v3676_v10, %v11235_v63  ;;  %v3738_v26 = vadd.f32 %v3717_v31, %v11236_v25  ;;  %v3678_v8 = vpop.f32.mrb[69].mxu0  ;;  %v3719_v56 = vpop.f32.mrb[69].mxu1 }
 0x75c   :  { %v3737_v19 = vadd.f32 %v3678_v8, %v11237_v30  ;;  %v3739_v14 = vadd.f32 %v3719_v56, %v11238_v57  ;;  %v3680_v28 = vpop.f32.mrb[70].mxu0  ;;  %v3721_v22 = vpop.f32.mrb[70].mxu1  ;;  %7840 = vtanh.f32 %v3761_v54  ;;  %v10067_v58 = vsel %vm3794_vm4, %v3761_v54, %v9765_v7  ;;  %v10072_v56 = vld [vmem:[%s11052_s8] ss:$16 sps:$4 sm:$0xff]   ;;  %v10077_v7 = vld [vmem:[%s11052_s8 + $0x8] ss:$16 sps:$4 sm:$0xff]  }
 0x75d   :  { %v6875_v6 = vmul.f32 -1.442695, %v3736_v18  ;;  %v3681_v20 = vpop.f32.mrb[71].mxu0  ;;  %v3722_v49 = vpop.f32.mrb[71].mxu1  ;;  %v11239_v30 = vmov 0 }
 0x75e   :  { %v6876_v44 = vmul.f32 -1.442695, %v3737_v19  ;;  %v7839_v10 = vpop.eup %7838  ;;  %v6877_v63 = vmul.f32 -1.442695, %v3739_v14  ;;  %v11240_v30 = vsel %vm10082_vm5, 4294967295, %v11239_v30 }
 0x75f   :  { %7842 = vpow2.f32 %v6875_v6  ;;  %11241 = vst [vmem:[#allocation56_spill] sm:$0xff] %v11240_v30  ;;  %v10089_v57 = vld [vmem:[%s11052_s8 + $0x24] ss:$16 sps:$4 sm:$0xff]   ;;  %v10094_v14 = vld [vmem:[%s11052_s8 + $0x2c] ss:$16 sps:$4 sm:$0xff]  }
 0x760   :  { %7844 = vpow2.f32 %v6876_v44  ;;  %v10125_v49 = vld [vmem:[%s11052_s8 + $0x44] ss:$16 sps:$4 sm:$0xff]   ;;  %v10130_v44 = vld [vmem:[%s11052_s8 + $0x4c] ss:$16 sps:$4 sm:$0xff]  }
 0x761   :  { %7846 = vpow2.f32 %v6877_v63  ;;  %v10151_v63 = vld [vmem:[%s11052_s8 + $0x64] ss:$16 sps:$4 sm:$0xff]  }
 0x762   :  { %7848 = vtanh.f32 %v3738_v26  ;;  %v10110_v26 = vld [vmem:[%s11052_s8 + $0x20] ss:$16 sps:$4 sm:$0xff]  }
 0x766   :  { %v7841_v31 = vpop.eup %7840 }
 0x767   :  { %v3763_v25 = vmul.f32 %v7841_v31, %v7839_v10  ;;  %v10139_v10 = vld [vmem:[%s11052_s8 + $0x40] ss:$16 sps:$4 sm:$0xff]   ;;  %v10144_v31 = vld [vmem:[%s11052_s8 + $0x48] ss:$16 sps:$4 sm:$0xff]  }
 0x769   :  { %v7843_v8 = vpop.eup %7842  ;;  %v3764_v54 = vpack.c.bf16 %v3763_v25, %v3763_v25  ;;  %v10156_v25 = vld [vmem:[%s11052_s8 + $0x6c] ss:$16 sps:$4 sm:$0xff]  }
 0x76a   :  { %v7845_v18 = vpop.eup %7844  ;;  %v3768_v19 = vadd.f32 1.0, %v7843_v8  ;;  %11242 = vst [vmem:[#allocation57_spill] sm:$0xff] %v10156_v25 }
 0x76b   :  { %v3774_v28 = vadd.f32 1.0, %v7845_v18  ;;  %v10099_v22 = vsel %vm10082_vm5, %v3764_v54, %v9777_v52  ;;  %v3806_v6 = vsel %vm10082_vm5, %v3764_v54, 0  ;;  %v10115_v52 = vld [vmem:[%s11052_s8 + $0x28] ss:$16 sps:$4 sm:$0xff]   ;;  %v7847_v8 = vpop.eup %7846  ;;  %v10163_v18 = vld [vmem:[%s11052_s8 + $0x60] ss:$16 sps:$4 sm:$0xff]  }
 0x76c   :  { %7850 = vrcp.f32 %v3768_v19  ;;  %v3807_v20 = vunpack.c.l.bf16 %v3806_v6  ;;  %4039 = vmatmul.mubr.bf16.vlgmr.msra.gmra.mrb[72].mxu0 %v10099_v22  ;;  %4080 = vmatmul.mubr.bf16.vlgmr.msra.gmra.mrb[72].mxu1 %v10099_v22  ;;  %v7849_v54 = vpop.eup %7848  ;;  %v10168_v19 = vld [vmem:[%s11052_s8 + $0x68] ss:$16 sps:$4 sm:$0xff]   ;;  %v10175_v6 = vld [vmem:[%s11052_s8 + $0x84] ss:$16 sps:$4 sm:$0xff]   ;;  %v3781_v17 = vadd.f32 1.0, %v7847_v8 }
 0x76d   :  { %7852 = vrcp.f32 %v3774_v28  ;;  %4281 = vmatpush1.bf16.msra.mxu0 %v10072_v56  ;;  %4322 = vmatpush1.bf16.msra.mxu1 %v10077_v7  ;;  %v10207_v8 = vld [vmem:[%s11052_s8 + $0xac] ss:$16 sps:$4 sm:$0xff]  }
 0x76e   :  { %6878 = vst [vmem:[%s11055_s11 + $0x30] sm:$0xff] %v3807_v20  ;;  %4282 = vmatprep.subr.bf16.mxu0 %v10089_v57  ;;  %4323 = vmatprep.subr.bf16.mxu1 %v10094_v14  ;;  %v10180_v20 = vld [vmem:[%s11052_s8 + $0x8c] ss:$16 sps:$4 sm:$0xff]   ;;  %11246 = vst [vmem:[#allocation62_spill] sm:$0xff] %v10207_v8  ;;  %7854 = vrcp.f32 %v3781_v17 }
 0x76f   :  { %4312 = vmatprep.mubr.bf16.mxu0 %v11116_v39  ;;  %4353 = vmatprep.mubr.bf16.mxu1 %v11116_v39  ;;  %v10237_v17 = vld [vmem:[%s11052_s8 + $0xcc] ss:$16 sps:$4 sm:$0xff]  }
 0x770   :  { %11250 = vst [vmem:[#allocation70_spill] sm:$0xff] %v10237_v17 }
 0x771   :  { %4283 = vmatpush1.bf16.msra.mxu0 %v10110_v26  ;;  %4324 = vmatpush1.bf16.msra.mxu1 %v10115_v52 }
 0x772   :  { %4284 = vmatprep.subr.bf16.mxu0 %v10125_v49  ;;  %4325 = vmatprep.subr.bf16.mxu1 %v10130_v44 }
 0x775   :  { %4285 = vmatpush1.bf16.msra.mxu0 %v10139_v10  ;;  %4326 = vmatpush1.bf16.msra.mxu1 %v10144_v31 }
 0x776   :  { %v7851_v28 = vpop.eup %7850  ;;  %4286 = vmatprep.subr.bf16.mxu0 %v10151_v63  ;;  %4327 = vmatprep.subr.bf16.mxu1 %v10156_v25  ;;  %v10195_v25 = vld [vmem:[%s11052_s8 + $0x88] ss:$16 sps:$4 sm:$0xff]  }
 0x777   :  { %v7853_v51 = vpop.eup %7852  ;;  %v3785_v62 = vmul.f32 %v7851_v28, %v7849_v54  ;;  %11244 = vst [vmem:[#allocation60_spill] sm:$0xff] %v10195_v25  ;;  %v10225_v28 = vld [vmem:[%s11052_s8 + $0xa8] ss:$16 sps:$4 sm:$0xff]  }
 0x778   :  { %v3784_v30 = vmul.f32 %v7853_v51, %v9811_v23  ;;  %v10202_v51 = vld [vmem:[%s11052_s8 + $0xa4] ss:$16 sps:$4 sm:$0xff]   ;;  %11248 = vst [vmem:[#allocation68_spill] sm:$0xff] %v10225_v28 }
 0x779   :  { %4287 = vmatpush1.bf16.msra.mxu0 %v10163_v18  ;;  %4328 = vmatpush1.bf16.msra.mxu1 %v10168_v19  ;;  %11245 = vst [vmem:[#allocation61_spill] sm:$0xff] %v10202_v51 }
 0x77a   :  { %v3786_v54 = vadd.f32 %v3785_v62, %v3784_v30  ;;  %4288 = vmatprep.subr.bf16.mxu0 %v10175_v6  ;;  %4329 = vmatprep.subr.bf16.mxu1 %v10180_v20  ;;  %v10220_v30 = vld [vmem:[%s11052_s8 + $0xa0] ss:$16 sps:$4 sm:$0xff]  }
 0x77b   :  { %11247 = vst [vmem:[#allocation67_spill] sm:$0xff] %v10220_v30 }
 0x77c   :  { %7856 = vtanh.f32 %v3786_v54  ;;  %v10213_v62 = vsel %vm3802_vm6, %v3786_v54, %v9811_v23  ;;  %v10232_v23 = vld [vmem:[%s11052_s8 + $0xc4] ss:$16 sps:$4 sm:$0xff]   ;;  %v10244_v54 = vld [vmem:[%s11052_s8 + $0xc0] ss:$16 sps:$4 sm:$0xff]  }
 0x77d   :  { %4289 = vmatpush1.bf16.msra.mxu0 %v10190_v47  ;;  %4330 = vmatpush1.bf16.msra.mxu1 %v10195_v25  ;;  %11249 = vst [vmem:[#allocation69_spill] sm:$0xff] %v10232_v23  ;;  %11251 = vst [vmem:[#allocation71_spill] sm:$0xff] %v10244_v54 }
 0x77e   :  { %4290 = vmatprep.subr.bf16.mxu0 %v10202_v51  ;;  %4331 = vmatprep.subr.bf16.mxu1 %v10207_v8  ;;  %v10249_v8 = vld [vmem:[%s11052_s8 + $0xc8] ss:$16 sps:$4 sm:$0xff]   ;;  %v7855_v51 = vpop.eup %7854 }
 0x77f   :  { %11252 = vst [vmem:[#allocation72_spill] sm:$0xff] %v10249_v8 }
 0x781   :  { %4291 = vmatpush1.bf16.msra.mxu0 %v10220_v30  ;;  %4332 = vmatpush1.bf16.msra.mxu1 %v10225_v28  ;;  %v10256_v30 = vld [vmem:[%s11052_s8 + $0xe4] ss:$16 sps:$4 sm:$0xff]   ;;  %v10261_v28 = vld [vmem:[%s11052_s8 + $0xec] ss:$16 sps:$4 sm:$0xff]  }
 0x782   :  { %4292 = vmatprep.subr.bf16.mxu0 %v10232_v23  ;;  %4333 = vmatprep.subr.bf16.mxu1 %v10237_v17  ;;  %v10268_v23 = vld [vmem:[%s11052_s8 + $0xe0] ss:$16 sps:$4 sm:$0xff]   ;;  %v10273_v17 = vld [vmem:[%s11052_s8 + $0xe8] ss:$16 sps:$4 sm:$0xff]  }
 0x785   :  { %4293 = vmatpush1.bf16.msra.mxu0 %v10244_v54  ;;  %4334 = vmatpush1.bf16.msra.mxu1 %v10249_v8 }
 0x786   :  { %v7857_v25 = vpop.eup %7856  ;;  %4294 = vmatprep.subr.bf16.mxu0 %v10256_v30  ;;  %4335 = vmatprep.subr.bf16.mxu1 %v10261_v28 }
 0x787   :  { %v3788_v47 = vmul.f32 %v7857_v25, %v7855_v51 }
 0x789   :  { %4295 = vmatpush1.bf16.msra.mxu0 %v10268_v23  ;;  %4336 = vmatpush1.bf16.msra.mxu1 %v10273_v17  ;;  %v3789_v8 = vpack.c.bf16 %v3788_v47, %v3788_v47 }
 0x78a   :  { %4630 = vmatprep.subr.bf16.mxu0 %v9851_v55  ;;  %4671 = vmatprep.subr.bf16.mxu1 %v9856_v33  ;;  %v11255_v33 = vld [vmem:[#allocation19_spill] sm:$0xff] }
 0x78b   :  { %v10291_v25 = vsel %vm10282_vm7, %v3789_v8, %v9837_v1  ;;  %v3810_v51 = vsel %vm10282_vm7, %v3789_v8, 0  ;;  %v11260_v8 = vld [vmem:[#allocation48_spill] sm:$0xff] }
 0x78c   :  { %v3811_v47 = vunpack.c.l.bf16 %v3810_v51  ;;  %4313 = vmatmul.mubr.bf16.vlgmr.msra.gmra.mrb[76].mxu0 %v10291_v25  ;;  %4354 = vmatmul.mubr.bf16.vlgmr.msra.gmra.mrb[76].mxu1 %v10291_v25 }
 0x78d   :  { %4631 = vmatpush1.bf16.msra.mxu0 %v9861_v0  ;;  %4672 = vmatpush1.bf16.msra.mxu1 %v9866_v60  ;;  %v11256_v60 = vld [vmem:[#allocation20_spill] sm:$0xff] }
 0x78e   :  { %6879 = vst [vmem:[%s11055_s11 + $0x48] sm:$0xff] %v3811_v47  ;;  %4632 = vmatprep.subr.bf16.mxu0 %v9875_v48  ;;  %4673 = vmatprep.subr.bf16.mxu1 %v9880_v32 }
 0x78f   :  { %4662 = vmatprep.mubr.bf16.mxu0 %v11116_v39  ;;  %4703 = vmatprep.mubr.bf16.mxu1 %v11116_v39 }
 0x791   :  { %4633 = vmatpush1.bf16.msra.mxu0 %v9885_v13  ;;  %4674 = vmatpush1.bf16.msra.mxu1 %v9890_v34  ;;  %v11257_v34 = vld [vmem:[#allocation21_spill] sm:$0xff] }
 0x792   :  { %4634 = vmatprep.subr.bf16.mxu0 %v9899_v35  ;;  %4675 = vmatprep.subr.bf16.mxu1 %v9904_v36  ;;  %v11258_v36 = vld [vmem:[#allocation22_spill] sm:$0xff] }
 0x795   :  { %4635 = vmatpush1.bf16.msra.mxu0 %v9909_v3  ;;  %4676 = vmatpush1.bf16.msra.mxu1 %v9914_v27 }
 0x796   :  { %4636 = vmatprep.subr.bf16.mxu0 %v9923_v5  ;;  %4677 = vmatprep.subr.bf16.mxu1 %v9928_v29 }
 0x799   :  { %4637 = vmatpush1.bf16.msra.mxu0 %v9933_v37  ;;  %4678 = vmatpush1.bf16.msra.mxu1 %v9938_v38 }
 0x79a   :  { %4638 = vmatprep.subr.bf16.mxu0 %v9947_v40  ;;  %4679 = vmatprep.subr.bf16.mxu1 %v9952_v41 }
 0x79d   :  { %4639 = vmatpush1.bf16.msra.mxu0 %v9957_v42  ;;  %4680 = vmatpush1.bf16.msra.mxu1 %v9962_v4 }
 0x79e   :  { %4640 = vmatprep.subr.bf16.mxu0 %v9971_v16  ;;  %4681 = vmatprep.subr.bf16.mxu1 %v9976_v45 }
 0x7a1   :  { %4641 = vmatpush1.bf16.msra.mxu0 %v9981_v43  ;;  %4682 = vmatpush1.bf16.msra.mxu1 %v9986_v50 }
 0x7a2   :  { %4642 = vmatprep.subr.bf16.mxu0 %v9995_v11  ;;  %4683 = vmatprep.subr.bf16.mxu1 %v10000_v24 }
 0x7a5   :  { %4643 = vmatpush1.bf16.msra.mxu0 %v10005_v53  ;;  %4684 = vmatpush1.bf16.msra.mxu1 %v10010_v61 }
 0x7a6   :  { %4644 = vmatprep.subr.bf16.mxu0 %v10019_v2  ;;  %4685 = vmatprep.subr.bf16.mxu1 %v10024_v46 }
 0x7a9   :  { %4645 = vmatpush1.bf16.msra.mxu0 %v10029_v12  ;;  %4686 = vmatpush1.bf16.msra.mxu1 %v10034_v15 }
 0x7aa   :  { %4904 = vmatprep.subr.bf16.mxu0 %v10043_v59  ;;  %4945 = vmatprep.subr.bf16.mxu1 %v10048_v9  ;;  %v11259_v59 = vld [vmem:[#allocation47_spill] sm:$0xff] }
 0x83f   :  { %v4040_v1 = vpop.f32.mrb[72].mxu0  ;;  %v4081_v55 = vpop.f32.mrb[72].mxu1 }
 0x840   :  { %v4366_v0 = vadd.f32 %v4040_v1, %v11255_v33  ;;  %v4368_v48 = vadd.f32 %v4081_v55, %v11256_v60  ;;  %v4042_v32 = vpop.f32.mrb[73].mxu0  ;;  %v4083_v13 = vpop.f32.mrb[73].mxu1  ;;  %v11261_v55 = vld [vmem:[#allocation49_spill] sm:$0xff] }
 0x841   :  { %v4367_v35 = vadd.f32 %v4042_v32, %v11257_v34  ;;  %v4369_v3 = vadd.f32 %v4083_v13, %v11258_v36  ;;  %v4044_v27 = vpop.f32.mrb[74].mxu0  ;;  %v4085_v5 = vpop.f32.mrb[74].mxu1 }
 0x842   :  { %v6944_v29 = vmul.f32 -1.442695, %v4366_v0  ;;  %v4045_v37 = vpop.f32.mrb[75].mxu0  ;;  %v4086_v38 = vpop.f32.mrb[75].mxu1  ;;  %v11262_v0 = vld [vmem:[#allocation50_spill] sm:$0xff] }
 0x843   :  { %v6945_v40 = vmul.f32 -1.442695, %v4367_v35  ;;  %v6946_v41 = vmul.f32 -1.442695, %v4369_v3 }
 0x844   :  { %7858 = vpow2.f32 %v6944_v29 }
 0x845   :  { %7860 = vpow2.f32 %v6945_v40 }
 0x846   :  { %7862 = vpow2.f32 %v6946_v41 }
 0x847   :  { %7864 = vtanh.f32 %v4368_v48 }
 0x84e   :  { %v7859_v42 = vpop.eup %7858 }
 0x84f   :  { %v7861_v4 = vpop.eup %7860  ;;  %v4381_v16 = vadd.f32 1.0, %v7859_v42 }
 0x850   :  { %v4387_v45 = vadd.f32 1.0, %v7861_v4  ;;  %v7863_v43 = vpop.eup %7862 }
 0x851   :  { %7866 = vrcp.f32 %v4381_v16  ;;  %v7865_v50 = vpop.eup %7864  ;;  %v4394_v61 = vadd.f32 1.0, %v7863_v43  ;;  %v11272_v43 = vld [vmem:[#allocation70_spill] sm:$0xff] }
 0x852   :  { %7868 = vrcp.f32 %v4387_v45  ;;  %v11267_v45 = vld [vmem:[#allocation61_spill] sm:$0xff] }
 0x853   :  { %7870 = vrcp.f32 %v4394_v61 }
 0x85b   :  { %v7867_v11 = vpop.eup %7866 }
 0x85c   :  { %v7869_v24 = vpop.eup %7868  ;;  %v4398_v53 = vmul.f32 %v7867_v11, %v7865_v50  ;;  %v11273_v11 = vld [vmem:[#allocation71_spill] sm:$0xff] }
 0x85d   :  { %v4397_v2 = vmul.f32 %v7869_v24, %v10067_v58  ;;  %v7871_v27 = vpop.eup %7870 }
 0x85f   :  { %v4399_v46 = vadd.f32 %v4398_v53, %v4397_v2  ;;  %v4314_v12 = vpop.f32.mrb[76].mxu0  ;;  %v4355_v15 = vpop.f32.mrb[76].mxu1 }
 0x860   :  { %v4374_v9 = vadd.f32 %v4314_v12, %v11259_v59  ;;  %v4376_v51 = vadd.f32 %v4355_v15, %v11260_v8  ;;  %v4316_v47 = vpop.f32.mrb[77].mxu0  ;;  %v4357_v1 = vpop.f32.mrb[77].mxu1  ;;  %v10444_v59 = vld [vmem:[%s11051_s7 + $0x2c] ss:$16 sps:$4 sm:$0xff]   ;;  %v10454_v8 = vld [vmem:[%s11051_s7 + $0x28] ss:$16 sps:$4 sm:$0xff]  }
 0x861   :  { %v4375_v33 = vadd.f32 %v4316_v47, %v11261_v55  ;;  %v4377_v60 = vadd.f32 %v4357_v1, %v11262_v0  ;;  %v4318_v48 = vpop.f32.mrb[78].mxu0  ;;  %v4359_v32 = vpop.f32.mrb[78].mxu1  ;;  %7872 = vtanh.f32 %v4399_v46  ;;  %v10346_v13 = vsel %vm3802_vm6, %v4399_v46, %v10067_v58  ;;  %v10468_v47 = vld [vmem:[%s11051_s7 + $0x4c] ss:$16 sps:$4 sm:$0xff]   ;;  %v10473_v1 = vld [vmem:[%s11051_s7 + $0x40] ss:$16 sps:$4 sm:$0xff]  }
 0x862   :  { %v6947_v34 = vmul.f32 -1.442695, %v4374_v9  ;;  %v4319_v35 = vpop.f32.mrb[79].mxu0  ;;  %v4360_v36 = vpop.f32.mrb[79].mxu1  ;;  %v10449_v9 = vld [vmem:[%s11051_s7 + $0x20] ss:$16 sps:$4 sm:$0xff]  }
 0x863   :  { %v6948_v3 = vmul.f32 -1.442695, %v4375_v33  ;;  %v6949_v29 = vmul.f32 -1.442695, %v4377_v60  ;;  %v10478_v55 = vld [vmem:[%s11051_s7 + $0x48] ss:$16 sps:$4 sm:$0xff]  }
 0x864   :  { %7874 = vpow2.f32 %v6947_v34  ;;  %v10487_v33 = vld [vmem:[%s11051_s7 + $0x64] ss:$16 sps:$4 sm:$0xff]   ;;  %v10492_v0 = vld [vmem:[%s11051_s7 + $0x6c] ss:$16 sps:$4 sm:$0xff]   ;;  %v10497_v60 = vld [vmem:[%s11051_s7 + $0x60] ss:$16 sps:$4 sm:$0xff]  }
 0x865   :  { %7876 = vpow2.f32 %v6948_v3  ;;  %v10502_v48 = vld [vmem:[%s11051_s7 + $0x68] ss:$16 sps:$4 sm:$0xff]   ;;  %v10511_v32 = vld [vmem:[%s11051_s7 + $0x84] ss:$16 sps:$4 sm:$0xff]   ;;  %v10516_v34 = vld [vmem:[%s11051_s7 + $0x8c] ss:$16 sps:$4 sm:$0xff]  }
 0x866   :  { %7878 = vpow2.f32 %v6949_v29  ;;  %v10521_v35 = vld [vmem:[%s11051_s7 + $0x80] ss:$16 sps:$4 sm:$0xff]   ;;  %v10526_v36 = vld [vmem:[%s11051_s7 + $0x88] ss:$16 sps:$4 sm:$0xff]   ;;  %v10535_v3 = vld [vmem:[%s11051_s7 + $0xa4] ss:$16 sps:$4 sm:$0xff]  }
 0x867   :  { %7880 = vtanh.f32 %v4376_v51  ;;  %v10463_v51 = vld [vmem:[%s11051_s7 + $0x44] ss:$16 sps:$4 sm:$0xff]   ;;  %v10550_v29 = vld [vmem:[%s11051_s7 + $0xa8] ss:$16 sps:$4 sm:$0xff]  }
 0x86b   :  { %v7873_v5 = vpop.eup %7872 }
 0x86c   :  { %v4401_v37 = vmul.f32 %v7873_v5, %v7871_v27  ;;  %v10540_v27 = vld [vmem:[%s11051_s7 + $0xac] ss:$16 sps:$4 sm:$0xff]   ;;  %v10545_v5 = vld [vmem:[%s11051_s7 + $0xa0] ss:$16 sps:$4 sm:$0xff]  }
 0x86e   :  { %v7875_v38 = vpop.eup %7874  ;;  %v4402_v40 = vpack.c.bf16 %v4401_v37, %v4401_v37  ;;  %v10559_v37 = vld [vmem:[%s11051_s7 + $0xc4] ss:$16 sps:$4 sm:$0xff]  }
 0x86f   :  { %v7877_v41 = vpop.eup %7876  ;;  %v4406_v42 = vadd.f32 1.0, %v7875_v38  ;;  %v10564_v38 = vld [vmem:[%s11051_s7 + $0xcc] ss:$16 sps:$4 sm:$0xff]  }
 0x870   :  { %v4412_v4 = vadd.f32 1.0, %v7877_v41  ;;  %v10351_v21 = vsel %vm10282_vm7, %v4402_v40, %v10099_v22  ;;  %v4432_v58 = vsel %vm10282_vm7, %v4402_v40, 0  ;;  %v10569_v40 = vld [vmem:[%s11051_s7 + $0xc0] ss:$16 sps:$4 sm:$0xff]   ;;  %v10574_v41 = vld [vmem:[%s11051_s7 + $0xc8] ss:$16 sps:$4 sm:$0xff]  }
 0x871   :  { %7882 = vrcp.f32 %v4406_v42  ;;  %v4433_v16 = vunpack.c.l.bf16 %v4432_v58  ;;  %4663 = vmatmul.mubr.bf16.vlgmr.msra.gmra.mrb[80].mxu0 %v10351_v21  ;;  %4704 = vmatmul.mubr.bf16.vlgmr.msra.gmra.mrb[80].mxu1 %v10351_v21  ;;  %v10583_v42 = vld [vmem:[%s11051_s7 + $0xe4] ss:$16 sps:$4 sm:$0xff]   ;;  %v10593_v58 = vld [vmem:[%s11051_s7 + $0xe0] ss:$16 sps:$4 sm:$0xff]  }
 0x872   :  { %7884 = vrcp.f32 %v4412_v4  ;;  %4905 = vmatpush1.bf16.msra.mxu0 %v10072_v56  ;;  %4946 = vmatpush1.bf16.msra.mxu1 %v10077_v7  ;;  %v7879_v56 = vpop.eup %7878  ;;  %v10588_v4 = vld [vmem:[%s11051_s7 + $0xec] ss:$16 sps:$4 sm:$0xff]  }
 0x873   :  { %6950 = vst [vmem:[%s11055_s11 + $0x40] sm:$0xff] %v4433_v16  ;;  %4906 = vmatprep.subr.bf16.mxu0 %v10089_v57  ;;  %4947 = vmatprep.subr.bf16.mxu1 %v10094_v14  ;;  %v7881_v7 = vpop.eup %7880  ;;  %v11263_v14 = vld [vmem:[#allocation57_spill] sm:$0xff]  ;;  %v10598_v16 = vld [vmem:[%s11051_s7 + $0xe8] ss:$16 sps:$4 sm:$0xff]  }
 0x874   :  { %4936 = vmatprep.mubr.bf16.mxu0 %v11116_v39  ;;  %4977 = vmatprep.mubr.bf16.mxu1 %v11116_v39 }
 0x876   :  { %4907 = vmatpush1.bf16.msra.mxu0 %v10110_v26  ;;  %4948 = vmatpush1.bf16.msra.mxu1 %v10115_v52  ;;  %v4419_v26 = vadd.f32 1.0, %v7879_v56  ;;  %v10607_v56 = vld [vmem:[%s11052_s8 + $0x4] ss:$16 sps:$4 sm:$0xff]  }
 0x877   :  { %4908 = vmatprep.subr.bf16.mxu0 %v10125_v49  ;;  %4949 = vmatprep.subr.bf16.mxu1 %v10130_v44 }
 0x878   :  { %7886 = vrcp.f32 %v4419_v26  ;;  %v11277_v26 = vld [vmem:[#allocation24_spill] sm:$0xff] }
 0x87a   :  { %4909 = vmatpush1.bf16.msra.mxu0 %v10139_v10  ;;  %4950 = vmatpush1.bf16.msra.mxu1 %v10144_v31  ;;  %v11265_v31 = vld [vmem:[#allocation58_spill] sm:$0xff] }
 0x87b   :  { %v7883_v57 = vpop.eup %7882  ;;  %4910 = vmatprep.subr.bf16.mxu0 %v10151_v63  ;;  %4951 = vmatprep.subr.bf16.mxu1 %v11263_v14  ;;  %v11266_v63 = vld [vmem:[#allocation60_spill] sm:$0xff] }
 0x87c   :  { %v7885_v22 = vpop.eup %7884  ;;  %v4423_v54 = vmul.f32 %v7883_v57, %v7881_v7  ;;  %v10612_v7 = vld [vmem:[%s11052_s8 + $0xc] ss:$16 sps:$4 sm:$0xff]  }
 0x87d   :  { %v4422_v52 = vmul.f32 %v7885_v22, %v10213_v62  ;;  %v11276_v22 = vld [vmem:[#allocation23_spill] sm:$0xff] }
 0x87e   :  { %4911 = vmatpush1.bf16.msra.mxu0 %v10163_v18  ;;  %4952 = vmatpush1.bf16.msra.mxu1 %v10168_v19  ;;  %v11268_v18 = vld [vmem:[#allocation62_spill] sm:$0xff]  ;;  %v11269_v19 = vld [vmem:[#allocation67_spill] sm:$0xff] }
 0x87f   :  { %v4424_v49 = vadd.f32 %v4423_v54, %v4422_v52  ;;  %4912 = vmatprep.subr.bf16.mxu0 %v10175_v6  ;;  %4953 = vmatprep.subr.bf16.mxu1 %v10180_v20  ;;  %v11270_v6 = vld [vmem:[#allocation68_spill] sm:$0xff]  ;;  %v11271_v20 = vld [vmem:[#allocation69_spill] sm:$0xff] }
 0x881   :  { %7888 = vtanh.f32 %v4424_v49  ;;  %v10382_v10 = vsel %vm3794_vm4, %v4424_v49, %v10213_v62  ;;  %v11274_v62 = vld [vmem:[#allocation72_spill] sm:$0xff] }
 0x882   :  { %4913 = vmatpush1.bf16.msra.mxu0 %v11265_v31  ;;  %4954 = vmatpush1.bf16.msra.mxu1 %v11266_v63  ;;  %v7887_v50 = vpop.eup %7886  ;;  %v11278_v31 = vld [vmem:[#allocation25_spill] sm:$0xff] }
 0x883   :  { %4914 = vmatprep.subr.bf16.mxu0 %v11267_v45  ;;  %4955 = vmatprep.subr.bf16.mxu1 %v11268_v18  ;;  %v11279_v45 = vld [vmem:[#allocation26_spill] sm:$0xff] }
 0x886   :  { %4915 = vmatpush1.bf16.msra.mxu0 %v11269_v19  ;;  %4956 = vmatpush1.bf16.msra.mxu1 %v11270_v6 }
 0x887   :  { %4916 = vmatprep.subr.bf16.mxu0 %v11271_v20  ;;  %4957 = vmatprep.subr.bf16.mxu1 %v11272_v43 }
 0x88a   :  { %4917 = vmatpush1.bf16.msra.mxu0 %v11273_v11  ;;  %4958 = vmatpush1.bf16.msra.mxu1 %v11274_v62 }
 0x88b   :  { %v7889_v24 = vpop.eup %7888  ;;  %4918 = vmatprep.subr.bf16.mxu0 %v10256_v30  ;;  %4959 = vmatprep.subr.bf16.mxu1 %v10261_v28  ;;  %v10415_v30 = vld [vmem:[%s11051_s7 + $0x4] ss:$16 sps:$4 sm:$0xff]   ;;  %v10420_v28 = vld [vmem:[%s11051_s7 + $0xc] ss:$16 sps:$4 sm:$0xff]  }
 0x88c   :  { %v4426_v53 = vmul.f32 %v7889_v24, %v7887_v50 }
 0x88e   :  { %4919 = vmatpush1.bf16.msra.mxu0 %v10268_v23  ;;  %4960 = vmatpush1.bf16.msra.mxu1 %v10273_v17  ;;  %v4427_v61 = vpack.c.bf16 %v4426_v53, %v4426_v53  ;;  %v10425_v23 = vld [vmem:[%s11051_s7] ss:$16 sps:$4 sm:$0xff]   ;;  %v10430_v17 = vld [vmem:[%s11051_s7 + $0x8] ss:$16 sps:$4 sm:$0xff]  }
 0x88f   :  { %5254 = vmatprep.subr.bf16.mxu0 %v10415_v30  ;;  %5295 = vmatprep.subr.bf16.mxu1 %v10420_v28 }
 0x890   :  { %v10401_v46 = vsel %vm10082_vm5, %v4427_v61, %v10291_v25  ;;  %v4435_v12 = vsel %vm10082_vm5, %v4427_v61, 0  ;;  %v10439_v25 = vld [vmem:[%s11051_s7 + $0x24] ss:$16 sps:$4 sm:$0xff]  }
 0x891   :  { %v4436_v15 = vunpack.c.l.bf16 %v4435_v12  ;;  %4937 = vmatmul.mubr.bf16.vlgmr.msra.gmra.mrb[84].mxu0 %v10401_v46  ;;  %4978 = vmatmul.mubr.bf16.vlgmr.msra.gmra.mrb[84].mxu1 %v10401_v46 }
 0x892   :  { %5286 = vmatprep.mubr.bf16.mxu0 %v11116_v39  ;;  %5327 = vmatprep.mubr.bf16.mxu1 %v11116_v39 }
 0x893   :  { %6951 = vst [vmem:[%s11055_s11 + $0x38] sm:$0xff] %v4436_v15  ;;  %5255 = vmatpush1.bf16.msra.mxu0 %v10425_v23  ;;  %5296 = vmatpush1.bf16.msra.mxu1 %v10430_v17 }
 0x894   :  { %5256 = vmatprep.subr.bf16.mxu0 %v10439_v25  ;;  %5297 = vmatprep.subr.bf16.mxu1 %v10444_v59 }
 0x897   :  { %5257 = vmatpush1.bf16.msra.mxu0 %v10449_v9  ;;  %5298 = vmatpush1.bf16.msra.mxu1 %v10454_v8 }
 0x898   :  { %5258 = vmatprep.subr.bf16.mxu0 %v10463_v51  ;;  %5299 = vmatprep.subr.bf16.mxu1 %v10468_v47 }
 0x89b   :  { %5259 = vmatpush1.bf16.msra.mxu0 %v10473_v1  ;;  %5300 = vmatpush1.bf16.msra.mxu1 %v10478_v55 }
 0x89c   :  { %5260 = vmatprep.subr.bf16.mxu0 %v10487_v33  ;;  %5301 = vmatprep.subr.bf16.mxu1 %v10492_v0 }
 0x89f   :  { %5261 = vmatpush1.bf16.msra.mxu0 %v10497_v60  ;;  %5302 = vmatpush1.bf16.msra.mxu1 %v10502_v48 }
 0x8a0   :  { %5262 = vmatprep.subr.bf16.mxu0 %v10511_v32  ;;  %5303 = vmatprep.subr.bf16.mxu1 %v10516_v34 }
 0x8a3   :  { %5263 = vmatpush1.bf16.msra.mxu0 %v10521_v35  ;;  %5304 = vmatpush1.bf16.msra.mxu1 %v10526_v36 }
 0x8a4   :  { %5264 = vmatprep.subr.bf16.mxu0 %v10535_v3  ;;  %5305 = vmatprep.subr.bf16.mxu1 %v10540_v27 }
 0x8a7   :  { %5265 = vmatpush1.bf16.msra.mxu0 %v10545_v5  ;;  %5306 = vmatpush1.bf16.msra.mxu1 %v10550_v29 }
 0x8a8   :  { %5266 = vmatprep.subr.bf16.mxu0 %v10559_v37  ;;  %5307 = vmatprep.subr.bf16.mxu1 %v10564_v38 }
 0x8ab   :  { %5267 = vmatpush1.bf16.msra.mxu0 %v10569_v40  ;;  %5308 = vmatpush1.bf16.msra.mxu1 %v10574_v41 }
 0x8ac   :  { %5268 = vmatprep.subr.bf16.mxu0 %v10583_v42  ;;  %5309 = vmatprep.subr.bf16.mxu1 %v10588_v4 }
 0x8af   :  { %5269 = vmatpush1.bf16.msra.mxu0 %v10593_v58  ;;  %5310 = vmatpush1.bf16.msra.mxu1 %v10598_v16 }
 0x8b0   :  { %5528 = vmatprep.subr.bf16.mxu0 %v10607_v56  ;;  %5569 = vmatprep.subr.bf16.mxu1 %v10612_v7 }
 0x944   :  { %v4664_v57 = vpop.f32.mrb[80].mxu0  ;;  %v4705_v14 = vpop.f32.mrb[80].mxu1 }
 0x945   :  { %v4990_v54 = vadd.f32 %v4664_v57, %v11276_v22  ;;  %v4992_v52 = vadd.f32 %v4705_v14, %v11277_v26  ;;  %v4666_v49 = vpop.f32.mrb[81].mxu0  ;;  %v4707_v44 = vpop.f32.mrb[81].mxu1 }
 0x946   :  { %v4991_v63 = vadd.f32 %v4666_v49, %v11278_v31  ;;  %v4993_v18 = vadd.f32 %v4707_v44, %v11279_v45  ;;  %v4668_v19 = vpop.f32.mrb[82].mxu0  ;;  %v4709_v6 = vpop.f32.mrb[82].mxu1 }
 0x947   :  { %v7016_v20 = vmul.f32 -1.442695, %v4990_v54  ;;  %v4669_v43 = vpop.f32.mrb[83].mxu0  ;;  %v4710_v50 = vpop.f32.mrb[83].mxu1 }
 0x948   :  { %v7017_v11 = vmul.f32 -1.442695, %v4991_v63  ;;  %v7018_v62 = vmul.f32 -1.442695, %v4993_v18  ;;  %v11280_v63 = vld [vmem:[#allocation43_spill] sm:$0xff]  ;;  %v11281_v18 = vld [vmem:[#allocation44_spill] sm:$0xff] }
 0x949   :  { %7890 = vpow2.f32 %v7016_v20  ;;  %v11282_v20 = vld [vmem:[#allocation45_spill] sm:$0xff]  ;;  %v11283_v50 = vld [vmem:[#allocation46_spill] sm:$0xff] }
 0x94a   :  { %7892 = vpow2.f32 %v7017_v11 }
 0x94b   :  { %7894 = vpow2.f32 %v7018_v62 }
 0x94c   :  { %7896 = vtanh.f32 %v4992_v52 }
 0x953   :  { %v7891_v24 = vpop.eup %7890 }
 0x954   :  { %v7893_v53 = vpop.eup %7892  ;;  %v5005_v61 = vadd.f32 1.0, %v7891_v24 }
 0x955   :  { %v5011_v2 = vadd.f32 1.0, %v7893_v53  ;;  %v7895_v12 = vpop.eup %7894  ;;  %v10693_v53 = vld [vmem:[%s11052_s8 + $0x40] ss:$16 sps:$4 sm:$0xff]  }
 0x956   :  { %7898 = vrcp.f32 %v5005_v61  ;;  %v7897_v15 = vpop.eup %7896  ;;  %v5018_v54 = vadd.f32 1.0, %v7895_v12 }
 0x957   :  { %7900 = vrcp.f32 %v5011_v2 }
 0x958   :  { %7902 = vrcp.f32 %v5018_v54 }
 0x960   :  { %v7899_v57 = vpop.eup %7898 }
 0x961   :  { %v7901_v14 = vpop.eup %7900  ;;  %v5022_v22 = vmul.f32 %v7899_v57, %v7897_v15 }
 0x962   :  { %v5021_v26 = vmul.f32 %v7901_v14, %v10346_v13  ;;  %v7903_v14 = vpop.eup %7902 }
 0x964   :  { %v5023_v49 = vadd.f32 %v5022_v22, %v5021_v26  ;;  %v4938_v44 = vpop.f32.mrb[84].mxu0  ;;  %v4979_v31 = vpop.f32.mrb[84].mxu1 }
 0x965   :  { %v4998_v45 = vadd.f32 %v4938_v44, %v11280_v63  ;;  %v5000_v19 = vadd.f32 %v4979_v31, %v11281_v18  ;;  %v4940_v52 = vpop.f32.mrb[85].mxu0  ;;  %v4981_v6 = vpop.f32.mrb[85].mxu1  ;;  %v10633_v31 = vld [vmem:[%s11052_s8] ss:$16 sps:$4 sm:$0xff]   ;;  %v10643_v18 = vld [vmem:[%s11052_s8 + $0x24] ss:$16 sps:$4 sm:$0xff]  }
 0x966   :  { %v4999_v43 = vadd.f32 %v4940_v52, %v11282_v20  ;;  %v5001_v11 = vadd.f32 %v4981_v6, %v11283_v50  ;;  %v4942_v62 = vpop.f32.mrb[86].mxu0  ;;  %v4983_v24 = vpop.f32.mrb[86].mxu1  ;;  %7904 = vtanh.f32 %v5023_v49  ;;  %v10628_v61 = vsel %vm3164_vm2, %v5023_v49, %v10346_v13  ;;  %v10638_v13 = vld [vmem:[%s11052_s8 + $0x8] ss:$16 sps:$4 sm:$0xff]   ;;  %v10648_v52 = vld [vmem:[%s11052_s8 + $0x2c] ss:$16 sps:$4 sm:$0xff]  }
 0x967   :  { %v7019_v2 = vmul.f32 -1.442695, %v4998_v45  ;;  %v4943_v12 = vpop.f32.mrb[87].mxu0  ;;  %v4984_v15 = vpop.f32.mrb[87].mxu1  ;;  %v10679_v62 = vld [vmem:[%s11052_s8 + $0x44] ss:$16 sps:$4 sm:$0xff]  }
 0x968   :  { %v7020_v57 = vmul.f32 -1.442695, %v4999_v43  ;;  %v7021_v54 = vmul.f32 -1.442695, %v5001_v11  ;;  %v10684_v24 = vld [vmem:[%s11052_s8 + $0x4c] ss:$16 sps:$4 sm:$0xff]  }
 0x969   :  { %7906 = vpow2.f32 %v7019_v2  ;;  %v10698_v2 = vld [vmem:[%s11052_s8 + $0x48] ss:$16 sps:$4 sm:$0xff]   ;;  %v10705_v12 = vld [vmem:[%s11052_s8 + $0x64] ss:$16 sps:$4 sm:$0xff]   ;;  %v10710_v15 = vld [vmem:[%s11052_s8 + $0x6c] ss:$16 sps:$4 sm:$0xff]  }
 0x96a   :  { %7908 = vpow2.f32 %v7020_v57  ;;  %11286 = vst [vmem:[#allocation73_spill] sm:$0xff] %v10710_v15 }
 0x96b   :  { %7910 = vpow2.f32 %v7021_v54  ;;  %v10722_v54 = vld [vmem:[%s11052_s8 + $0x68] ss:$16 sps:$4 sm:$0xff]  }
 0x96c   :  { %7912 = vtanh.f32 %v5000_v19  ;;  %v10664_v19 = vld [vmem:[%s11052_s8 + $0x20] ss:$16 sps:$4 sm:$0xff]  }
 0x970   :  { %v7905_v22 = vpop.eup %7904 }
 0x971   :  { %v5025_v26 = vmul.f32 %v7905_v22, %v7903_v14  ;;  %v10717_v22 = vld [vmem:[%s11052_s8 + $0x60] ss:$16 sps:$4 sm:$0xff]  }
 0x973   :  { %v7907_v44 = vpop.eup %7906  ;;  %v5026_v49 = vpack.c.bf16 %v5025_v26, %v5025_v26 }
 0x974   :  { %v7909_v63 = vpop.eup %7908  ;;  %v5030_v45 = vadd.f32 1.0, %v7907_v44  ;;  %v10729_v44 = vld [vmem:[%s11052_s8 + $0x84] ss:$16 sps:$4 sm:$0xff]  }
 0x975   :  { %v5036_v6 = vadd.f32 1.0, %v7909_v63  ;;  %v10653_v43 = vsel %vm9830_vm3, %v5026_v49, %v10351_v21  ;;  %v5056_v50 = vsel %vm9830_vm3, %v5026_v49, 0  ;;  %v10669_v21 = vld [vmem:[%s11052_s8 + $0x28] ss:$16 sps:$4 sm:$0xff]   ;;  %v7911_v57 = vpop.eup %7910  ;;  %v10734_v49 = vld [vmem:[%s11052_s8 + $0x8c] ss:$16 sps:$4 sm:$0xff]  }
 0x976   :  { %7914 = vrcp.f32 %v5030_v45  ;;  %v5057_v11 = vunpack.c.l.bf16 %v5056_v50  ;;  %5287 = vmatmul.mubr.bf16.vlgmr.msra.gmra.mrb[88].mxu0 %v10653_v43  ;;  %5328 = vmatmul.mubr.bf16.vlgmr.msra.gmra.mrb[88].mxu1 %v10653_v43  ;;  %v7913_v14 = vpop.eup %7912  ;;  %11287 = vst [vmem:[#allocation74_spill] sm:$0xff] %v10734_v49  ;;  %v10742_v50 = vld [vmem:[%s11052_s8 + $0x80] ss:$16 sps:$4 sm:$0xff]  }
 0x977   :  { %7916 = vrcp.f32 %v5036_v6  ;;  %5529 = vmatpush1.bf16.msra.mxu0 %v10633_v31  ;;  %5570 = vmatpush1.bf16.msra.mxu1 %v10638_v13  ;;  %v5043_v6 = vadd.f32 1.0, %v7911_v57  ;;  %11288 = vst [vmem:[#allocation15_spill] sm:$0xff] %v10742_v50  ;;  %v10754_v57 = vld [vmem:[%s11052_s8 + $0xa4] ss:$16 sps:$4 sm:$0xff]  }
 0x978   :  { %7022 = vst [vmem:[%s11055_s11 + $0x50] sm:$0xff] %v5057_v11  ;;  %5530 = vmatprep.subr.bf16.mxu0 %v10643_v18  ;;  %5571 = vmatprep.subr.bf16.mxu1 %v10648_v52  ;;  %v10747_v11 = vld [vmem:[%s11052_s8 + $0x88] ss:$16 sps:$4 sm:$0xff]   ;;  %11290 = vst [vmem:[#allocation17_spill] sm:$0xff] %v10754_v57 }
 0x979   :  { %5560 = vmatprep.mubr.bf16.mxu0 %v11116_v39  ;;  %5601 = vmatprep.mubr.bf16.mxu1 %v11116_v39  ;;  %11289 = vst [vmem:[#allocation16_spill] sm:$0xff] %v10747_v11  ;;  %7918 = vrcp.f32 %v5043_v6  ;;  %v10795_v6 = vld [vmem:[%s11052_s8 + $0xc0] ss:$16 sps:$4 sm:$0xff]  }
 0x97a   :  { %11297 = vst [vmem:[#allocation19_spill] sm:$0xff] %v10795_v6 }
 0x97b   :  { %5531 = vmatpush1.bf16.msra.mxu0 %v10664_v19  ;;  %5572 = vmatpush1.bf16.msra.mxu1 %v10669_v21 }
 0x97c   :  { %5532 = vmatprep.subr.bf16.mxu0 %v10679_v62  ;;  %5573 = vmatprep.subr.bf16.mxu1 %v10684_v24 }
 0x97f   :  { %5533 = vmatpush1.bf16.msra.mxu0 %v10693_v53  ;;  %5574 = vmatpush1.bf16.msra.mxu1 %v10698_v2 }
 0x980   :  { %v7915_v26 = vpop.eup %7914  ;;  %5534 = vmatprep.subr.bf16.mxu0 %v10705_v12  ;;  %5575 = vmatprep.subr.bf16.mxu1 %v10710_v15 }
 0x981   :  { %v7917_v63 = vpop.eup %7916  ;;  %v5047_v45 = vmul.f32 %v7915_v26, %v7913_v14  ;;  %v10759_v14 = vld [vmem:[%s11052_s8 + $0xac] ss:$16 sps:$4 sm:$0xff]   ;;  %v10800_v26 = vld [vmem:[%s11052_s8 + $0xc8] ss:$16 sps:$4 sm:$0xff]  }
 0x982   :  { %v5046_v20 = vmul.f32 %v7917_v63, %v10382_v10  ;;  %11291 = vst [vmem:[#allocation18_spill] sm:$0xff] %v10759_v14  ;;  %11298 = vst [vmem:[#allocation20_spill] sm:$0xff] %v10800_v26 }
 0x983   :  { %5535 = vmatpush1.bf16.msra.mxu0 %v10717_v22  ;;  %5576 = vmatpush1.bf16.msra.mxu1 %v10722_v54 }
 0x984   :  { %v5048_v15 = vadd.f32 %v5047_v45, %v5046_v20  ;;  %5536 = vmatprep.subr.bf16.mxu0 %v10729_v44  ;;  %5577 = vmatprep.subr.bf16.mxu1 %v10734_v49  ;;  %v10771_v45 = vld [vmem:[%s11052_s8 + $0xa0] ss:$16 sps:$4 sm:$0xff]   ;;  %v10776_v20 = vld [vmem:[%s11052_s8 + $0xa8] ss:$16 sps:$4 sm:$0xff]  }
 0x985   :  { %11293 = vst [vmem:[#allocation51_spill] sm:$0xff] %v10771_v45  ;;  %11294 = vst [vmem:[#allocation52_spill] sm:$0xff] %v10776_v20 }
 0x986   :  { %7920 = vtanh.f32 %v5048_v15  ;;  %v10764_v63 = vsel %vm3156_vm0, %v5048_v15, %v10382_v10  ;;  %v10783_v10 = vld [vmem:[%s11052_s8 + $0xc4] ss:$16 sps:$4 sm:$0xff]   ;;  %v10788_v15 = vld [vmem:[%s11052_s8 + $0xcc] ss:$16 sps:$4 sm:$0xff]  }
 0x987   :  { %5537 = vmatpush1.bf16.msra.mxu0 %v10742_v50  ;;  %5578 = vmatpush1.bf16.msra.mxu1 %v10747_v11  ;;  %11295 = vst [vmem:[#allocation53_spill] sm:$0xff] %v10783_v10  ;;  %11296 = vst [vmem:[#allocation54_spill] sm:$0xff] %v10788_v15 }
 0x988   :  { %5538 = vmatprep.subr.bf16.mxu0 %v10754_v57  ;;  %5579 = vmatprep.subr.bf16.mxu1 %v10759_v14  ;;  %v7919_v14 = vpop.eup %7918 }
 0x98b   :  { %5539 = vmatpush1.bf16.msra.mxu0 %v10771_v45  ;;  %5580 = vmatpush1.bf16.msra.mxu1 %v10776_v20  ;;  %v10807_v45 = vld [vmem:[%s11052_s8 + $0xe4] ss:$16 sps:$4 sm:$0xff]   ;;  %v10812_v20 = vld [vmem:[%s11052_s8 + $0xec] ss:$16 sps:$4 sm:$0xff]  }
 0x98c   :  { %5540 = vmatprep.subr.bf16.mxu0 %v10783_v10  ;;  %5581 = vmatprep.subr.bf16.mxu1 %v10788_v15  ;;  %11299 = vst [vmem:[#allocation21_spill] sm:$0xff] %v10807_v45  ;;  %v10819_v10 = vld [vmem:[%s11052_s8 + $0xe0] ss:$16 sps:$4 sm:$0xff]   ;;  %v10824_v15 = vld [vmem:[%s11052_s8 + $0xe8] ss:$16 sps:$4 sm:$0xff]  }
 0x98f   :  { %5541 = vmatpush1.bf16.msra.mxu0 %v10795_v6  ;;  %5582 = vmatpush1.bf16.msra.mxu1 %v10800_v26 }
 0x990   :  { %v7921_v57 = vpop.eup %7920  ;;  %5542 = vmatprep.subr.bf16.mxu0 %v10807_v45  ;;  %5583 = vmatprep.subr.bf16.mxu1 %v10812_v20 }
 0x991   :  { %v5050_v11 = vmul.f32 %v7921_v57, %v7919_v14 }
 0x993   :  { %5543 = vmatpush1.bf16.msra.mxu0 %v10819_v10  ;;  %5584 = vmatpush1.bf16.msra.mxu1 %v10824_v15  ;;  %v5051_v26 = vpack.c.bf16 %v5050_v11, %v5050_v11 }
 0x994   :  { %5878 = vmatprep.subr.bf16.mxu0 %v10415_v30  ;;  %5919 = vmatprep.subr.bf16.mxu1 %v10420_v28  ;;  %v11301_v28 = vld [vmem:[#allocation27_spill] sm:$0xff] }
 0x995   :  { %v10835_v50 = vsel %vm9770_vm1, %v5051_v26, %v10401_v46  ;;  %v5059_v45 = vsel %vm9770_vm1, %v5051_v26, 0  ;;  %v11308_v26 = vld [vmem:[#allocation42_spill] sm:$0xff] }
 0x996   :  { %v5060_v49 = vunpack.c.l.bf16 %v5059_v45  ;;  %5561 = vmatmul.mubr.bf16.vlgmr.msra.gmra.mrb[92].mxu0 %v10835_v50  ;;  %5602 = vmatmul.mubr.bf16.vlgmr.msra.gmra.mrb[92].mxu1 %v10835_v50  ;;  %v11307_v45 = vld [vmem:[#allocation41_spill] sm:$0xff] }
 0x997   :  { %5879 = vmatpush1.bf16.msra.mxu0 %v10425_v23  ;;  %5920 = vmatpush1.bf16.msra.mxu1 %v10430_v17  ;;  %v11302_v17 = vld [vmem:[#allocation28_spill] sm:$0xff] }
 0x998   :  { %7023 = vst [vmem:[%s11055_s11 + $0x28] sm:$0xff] %v5060_v49  ;;  %5880 = vmatprep.subr.bf16.mxu0 %v10439_v25  ;;  %5921 = vmatprep.subr.bf16.mxu1 %v10444_v59  ;;  %v11306_v49 = vld [vmem:[#allocation40_spill] sm:$0xff] }
 0x999   :  { %5910 = vmatprep.mubr.bf16.mxu0 %v11116_v39  ;;  %5951 = vmatprep.mubr.bf16.mxu1 %v11116_v39 }
 0x99b   :  { %5881 = vmatpush1.bf16.msra.mxu0 %v10449_v9  ;;  %5922 = vmatpush1.bf16.msra.mxu1 %v10454_v8  ;;  %v11303_v8 = vld [vmem:[#allocation29_spill] sm:$0xff] }
 0x99c   :  { %5882 = vmatprep.subr.bf16.mxu0 %v10463_v51  ;;  %5923 = vmatprep.subr.bf16.mxu1 %v10468_v47  ;;  %v11304_v47 = vld [vmem:[#allocation30_spill] sm:$0xff] }
 0x99f   :  { %5883 = vmatpush1.bf16.msra.mxu0 %v10473_v1  ;;  %5924 = vmatpush1.bf16.msra.mxu1 %v10478_v55 }
 0x9a0   :  { %5884 = vmatprep.subr.bf16.mxu0 %v10487_v33  ;;  %5925 = vmatprep.subr.bf16.mxu1 %v10492_v0 }
 0x9a3   :  { %5885 = vmatpush1.bf16.msra.mxu0 %v10497_v60  ;;  %5926 = vmatpush1.bf16.msra.mxu1 %v10502_v48 }
 0x9a4   :  { %5886 = vmatprep.subr.bf16.mxu0 %v10511_v32  ;;  %5927 = vmatprep.subr.bf16.mxu1 %v10516_v34 }
 0x9a7   :  { %5887 = vmatpush1.bf16.msra.mxu0 %v10521_v35  ;;  %5928 = vmatpush1.bf16.msra.mxu1 %v10526_v36 }
 0x9a8   :  { %5888 = vmatprep.subr.bf16.mxu0 %v10535_v3  ;;  %5929 = vmatprep.subr.bf16.mxu1 %v10540_v27 }
 0x9ab   :  { %5889 = vmatpush1.bf16.msra.mxu0 %v10545_v5  ;;  %5930 = vmatpush1.bf16.msra.mxu1 %v10550_v29 }
 0x9ac   :  { %5890 = vmatprep.subr.bf16.mxu0 %v10559_v37  ;;  %5931 = vmatprep.subr.bf16.mxu1 %v10564_v38 }
 0x9af   :  { %5891 = vmatpush1.bf16.msra.mxu0 %v10569_v40  ;;  %5932 = vmatpush1.bf16.msra.mxu1 %v10574_v41 }
 0x9b0   :  { %5892 = vmatprep.subr.bf16.mxu0 %v10583_v42  ;;  %5933 = vmatprep.subr.bf16.mxu1 %v10588_v4 }
 0x9b3   :  { %5893 = vmatpush1.bf16.msra.mxu0 %v10593_v58  ;;  %5934 = vmatpush1.bf16.msra.mxu1 %v10598_v16 }
 0x9b4   :  { %6152 = vmatprep.subr.bf16.mxu0 %v10607_v56  ;;  %6193 = vmatprep.subr.bf16.mxu1 %v10612_v7  ;;  %v11305_v56 = vld [vmem:[#allocation39_spill] sm:$0xff] }
 0xa49   :  { %v5288_v46 = vpop.f32.mrb[88].mxu0  ;;  %v5329_v30 = vpop.f32.mrb[88].mxu1 }
 0xa4a   :  { %v5614_v23 = vadd.f32 %v5288_v46, %v11301_v28  ;;  %v5616_v25 = vadd.f32 %v5329_v30, %v11302_v17  ;;  %v5290_v59 = vpop.f32.mrb[89].mxu0  ;;  %v5331_v9 = vpop.f32.mrb[89].mxu1 }
 0xa4b   :  { %v5615_v51 = vadd.f32 %v5290_v59, %v11303_v8  ;;  %v5617_v1 = vadd.f32 %v5331_v9, %v11304_v47  ;;  %v5292_v55 = vpop.f32.mrb[90].mxu0  ;;  %v5333_v33 = vpop.f32.mrb[90].mxu1 }
 0xa4c   :  { %v7088_v0 = vmul.f32 -1.442695, %v5614_v23  ;;  %v5293_v60 = vpop.f32.mrb[91].mxu0  ;;  %v5334_v48 = vpop.f32.mrb[91].mxu1  ;;  %v7696_v23 = vld [vmem:[%s11054_s10 + $0x78] sm:$0xff]  }
 0xa4d   :  { %v7089_v32 = vmul.f32 -1.442695, %v5615_v51  ;;  %v7090_v34 = vmul.f32 -1.442695, %v5617_v1 }
 0xa4e   :  { %7922 = vpow2.f32 %v7088_v0 }
 0xa4f   :  { %7924 = vpow2.f32 %v7089_v32 }
 0xa50   :  { %7926 = vpow2.f32 %v7090_v34 }
 0xa51   :  { %7928 = vtanh.f32 %v5616_v25 }
 0xa58   :  { %v7923_v35 = vpop.eup %7922 }
 0xa59   :  { %v7925_v36 = vpop.eup %7924  ;;  %v5629_v3 = vadd.f32 1.0, %v7923_v35 }
 0xa5a   :  { %v5635_v27 = vadd.f32 1.0, %v7925_v36  ;;  %v7927_v5 = vpop.eup %7926 }
 0xa5b   :  { %7930 = vrcp.f32 %v5629_v3  ;;  %v7929_v29 = vpop.eup %7928  ;;  %v5642_v41 = vadd.f32 1.0, %v7927_v5  ;;  %v11315_v3 = vld [vmem:[#allocation16_spill] sm:$0xff]  ;;  %v11320_v5 = vld [vmem:[#allocation53_spill] sm:$0xff] }
 0xa5c   :  { %7932 = vrcp.f32 %v5635_v27  ;;  %v11316_v27 = vld [vmem:[#allocation17_spill] sm:$0xff] }
 0xa5d   :  { %7934 = vrcp.f32 %v5642_v41  ;;  %v11324_v41 = vld [vmem:[#allocation21_spill] sm:$0xff] }
 0xa65   :  { %v7931_v37 = vpop.eup %7930 }
 0xa66   :  { %v7933_v38 = vpop.eup %7932  ;;  %v5646_v40 = vmul.f32 %v7931_v37, %v7929_v29  ;;  %v11321_v29 = vld [vmem:[#allocation54_spill] sm:$0xff] }
 0xa67   :  { %v5645_v42 = vmul.f32 %v7933_v38, %v10628_v61  ;;  %v7935_v51 = vpop.eup %7934  ;;  %v11322_v38 = vld [vmem:[#allocation19_spill] sm:$0xff] }
 0xa69   :  { %v5647_v4 = vadd.f32 %v5646_v40, %v5645_v42  ;;  %v5562_v58 = vpop.f32.mrb[92].mxu0  ;;  %v5603_v16 = vpop.f32.mrb[92].mxu1 }
 0xa6a   :  { %v5622_v7 = vadd.f32 %v5562_v58, %v11305_v56  ;;  %v5624_v11 = vadd.f32 %v5603_v16, %v11306_v49  ;;  %v5564_v57 = vpop.f32.mrb[93].mxu0  ;;  %v5605_v14 = vpop.f32.mrb[93].mxu1  ;;  %v7686_v49 = vld [vmem:[%s11054_s10 + $0x50] sm:$0xff]  }
 0xa6b   :  { %v5623_v6 = vadd.f32 %v5564_v57, %v11307_v45  ;;  %v5625_v46 = vadd.f32 %v5605_v14, %v11308_v26  ;;  %v5566_v30 = vpop.f32.mrb[94].mxu0  ;;  %v5607_v28 = vpop.f32.mrb[94].mxu1  ;;  %7936 = vtanh.f32 %v5647_v4  ;;  %v10890_v17 = vsel %vm2526_vm14, %v5647_v4, %v10628_v61  ;;  %v7688_v57 = vld [vmem:[%s11054_s10 + $0x58] sm:$0xff]   ;;  %v7690_v45 = vld [vmem:[%s11054_s10 + $0x60] sm:$0xff]   ;;  %v7692_v26 = vld [vmem:[%s11054_s10 + $0x68] sm:$0xff]  }
 0xa6c   :  { %v7091_v25 = vmul.f32 -1.442695, %v5622_v7  ;;  %v5567_v59 = vpop.f32.mrb[95].mxu0  ;;  %v5608_v9 = vpop.f32.mrb[95].mxu1  ;;  %v7689_v14 = vld [vmem:[%s11054_s10 + $0x18] sm:$0xff]   ;;  %v7694_v30 = vld [vmem:[%s11054_s10 + $0x70] sm:$0xff]  }
 0xa6d   :  { %v7092_v8 = vmul.f32 -1.442695, %v5623_v6  ;;  %v7093_v1 = vmul.f32 -1.442695, %v5625_v46  ;;  %v7691_v6 = vld [vmem:[%s11054_s10 + $0x20] sm:$0xff]   ;;  %v7693_v46 = vld [vmem:[%s11054_s10 + $0x28] sm:$0xff]  }
 0xa6e   :  { %7938 = vpow2.f32 %v7091_v25  ;;  %v7695_v28 = vld [vmem:[%s11054_s10 + $0x30] sm:$0xff]   ;;  %v7697_v25 = vld [vmem:[%s11054_s10 + $0x38] sm:$0xff]  }
 0xa6f   :  { %7940 = vpow2.f32 %v7092_v8  ;;  %v11326_v8 = vld [vmem:[#allocation31_spill] sm:$0xff] }
 0xa70   :  { %7942 = vpow2.f32 %v7093_v1 }
 0xa71   :  { %7944 = vtanh.f32 %v5624_v11  ;;  %v7687_v11 = vld [vmem:[%s11054_s10 + $0x10] sm:$0xff]  }
 0xa75   :  { %v7937_v47 = vpop.eup %7936 }
 0xa76   :  { %v5649_v55 = vmul.f32 %v7937_v47, %v7935_v51  ;;  %v11327_v47 = vld [vmem:[#allocation32_spill] sm:$0xff] }
 0xa78   :  { %v7939_v33 = vpop.eup %7938  ;;  %v5650_v0 = vpack.c.bf16 %v5649_v55, %v5649_v55 }
 0xa79   :  { %v7941_v60 = vpop.eup %7940  ;;  %v5654_v48 = vadd.f32 1.0, %v7939_v33 }
 0xa7a   :  { %v5660_v32 = vadd.f32 1.0, %v7941_v60  ;;  %v5676_v34 = vsel %vm9698_vm15, %v5650_v0, %v10653_v43  ;;  %v5680_v35 = vsel %vm9698_vm15, %v5650_v0, 0  ;;  %v11328_v0 = vld [vmem:[#allocation33_spill] sm:$0xff] }
 0xa7b   :  { %7946 = vrcp.f32 %v5654_v48  ;;  %v5681_v36 = vunpack.c.l.bf16 %v5680_v35  ;;  %5911 = vmatmul.mubr.bf16.vlgmr.msra.gmra.mrb[96].mxu0 %v5676_v34  ;;  %5952 = vmatmul.mubr.bf16.vlgmr.msra.gmra.mrb[96].mxu1 %v5676_v34  ;;  %v11329_v48 = vld [vmem:[#allocation34_spill] sm:$0xff] }
 0xa7c   :  { %7948 = vrcp.f32 %v5660_v32  ;;  %6153 = vmatpush1.bf16.msra.mxu0 %v10633_v31  ;;  %6194 = vmatpush1.bf16.msra.mxu1 %v10638_v13  ;;  %v7943_v31 = vpop.eup %7942 }
 0xa7d   :  { %7094 = vst [vmem:[%s11055_s11 + $0x60] sm:$0xff] %v5681_v36  ;;  %6154 = vmatprep.subr.bf16.mxu0 %v10643_v18  ;;  %6195 = vmatprep.subr.bf16.mxu1 %v10648_v52  ;;  %v7945_v13 = vpop.eup %7944  ;;  %v11311_v52 = vld [vmem:[#allocation73_spill] sm:$0xff] }
 0xa7e   :  { %6184 = vmatprep.mubr.bf16.mxu0 %v11116_v39  ;;  %6225 = vmatprep.mubr.bf16.mxu1 %v11116_v39 }
 0xa80   :  { %6155 = vmatpush1.bf16.msra.mxu0 %v10664_v19  ;;  %6196 = vmatpush1.bf16.msra.mxu1 %v10669_v21  ;;  %v5667_v19 = vadd.f32 1.0, %v7943_v31 }
 0xa81   :  { %6156 = vmatprep.subr.bf16.mxu0 %v10679_v62  ;;  %6197 = vmatprep.subr.bf16.mxu1 %v10684_v24  ;;  %v11312_v24 = vld [vmem:[#allocation74_spill] sm:$0xff] }
 0xa82   :  { %7950 = vrcp.f32 %v5667_v19 }
 0xa84   :  { %6157 = vmatpush1.bf16.msra.mxu0 %v10693_v53  ;;  %6198 = vmatpush1.bf16.msra.mxu1 %v10698_v2 }
 0xa85   :  { %v7947_v18 = vpop.eup %7946  ;;  %6158 = vmatprep.subr.bf16.mxu0 %v10705_v12  ;;  %6199 = vmatprep.subr.bf16.mxu1 %v11311_v52  ;;  %v11314_v12 = vld [vmem:[#allocation15_spill] sm:$0xff] }
 0xa86   :  { %v7949_v39 = vpop.eup %7948  ;;  %v5671_v43 = vmul.f32 %v7947_v18, %v7945_v13 }
 0xa87   :  { %v5670_v21 = vmul.f32 %v7949_v39, %v10764_v63 }
 0xa88   :  { %6159 = vmatpush1.bf16.msra.mxu0 %v10717_v22  ;;  %6200 = vmatpush1.bf16.msra.mxu1 %v10722_v54  ;;  %v11317_v22 = vld [vmem:[#allocation18_spill] sm:$0xff]  ;;  %v11318_v54 = vld [vmem:[#allocation51_spill] sm:$0xff] }
 0xa89   :  { %v5672_v62 = vadd.f32 %v5671_v43, %v5670_v21  ;;  %6160 = vmatprep.subr.bf16.mxu0 %v10729_v44  ;;  %6201 = vmatprep.subr.bf16.mxu1 %v11312_v24  ;;  %v11319_v44 = vld [vmem:[#allocation52_spill] sm:$0xff] }
 0xa8b   :  { %7952 = vtanh.f32 %v5672_v62  ;;  %v10922_v2 = vsel %vm2518_vm12, %v5672_v62, %v10764_v63  ;;  %v11323_v63 = vld [vmem:[#allocation20_spill] sm:$0xff] }
 0xa8c   :  { %6161 = vmatpush1.bf16.msra.mxu0 %v11314_v12  ;;  %6202 = vmatpush1.bf16.msra.mxu1 %v11315_v3  ;;  %v7951_v37 = vpop.eup %7950 }
 0xa8d   :  { %6162 = vmatprep.subr.bf16.mxu0 %v11316_v27  ;;  %6203 = vmatprep.subr.bf16.mxu1 %v11317_v22 }
 0xa90   :  { %6163 = vmatpush1.bf16.msra.mxu0 %v11318_v54  ;;  %6204 = vmatpush1.bf16.msra.mxu1 %v11319_v44 }
 0xa91   :  { %6164 = vmatprep.subr.bf16.mxu0 %v11320_v5  ;;  %6205 = vmatprep.subr.bf16.mxu1 %v11321_v29  ;;  %v11330_v5 = vld [vmem:[#allocation35_spill] sm:$0xff] }
 0xa94   :  { %6165 = vmatpush1.bf16.msra.mxu0 %v11322_v38  ;;  %6206 = vmatpush1.bf16.msra.mxu1 %v11323_v63 }
 0xa95   :  { %v7953_v40 = vpop.eup %7952  ;;  %6166 = vmatprep.subr.bf16.mxu0 %v11324_v41  ;;  %6207 = vmatprep.subr.bf16.mxu1 %v10812_v20  ;;  %v7682_v20 = vld [vmem:[%s11054_s10 + $0x40] sm:$0xff]   ;;  %v11332_v41 = vld [vmem:[#allocation37_spill] sm:$0xff] }
 0xa96   :  { %v5674_v42 = vmul.f32 %v7953_v40, %v7951_v37  ;;  %v11331_v37 = vld [vmem:[#allocation36_spill] sm:$0xff] }
 0xa98   :  { %6167 = vmatpush1.bf16.msra.mxu0 %v10819_v10  ;;  %6208 = vmatpush1.bf16.msra.mxu1 %v10824_v15  ;;  %v5675_v4 = vpack.c.bf16 %v5674_v42, %v5674_v42  ;;  %v7683_v10 = vld [vmem:[%s11054_s10] sm:$0xff]   ;;  %v7685_v15 = vld [vmem:[%s11054_s10 + $0x8] sm:$0xff]  }
 0xa99   :  { %7207 = vmatprep.subr.bf16.mxu0 %v7682_v20 }
 0xa9a   :  { %v5678_v16 = vsel %vm9497_vm13, %v5675_v4, %v10835_v50  ;;  %v5683_v56 = vsel %vm9497_vm13, %v5675_v4, 0  ;;  %v7684_v50 = vld [vmem:[%s11054_s10 + $0x48] sm:$0xff]   ;;  %v11333_v4 = vld [vmem:[#allocation38_spill] sm:$0xff] }
 0xa9b   :  { %v5684_v7 = vunpack.c.l.bf16 %v5683_v56  ;;  %6185 = vmatmul.mubr.bf16.vlgmr.msra.gmra.mrb[100].mxu0 %v5678_v16  ;;  %6226 = vmatmul.mubr.bf16.vlgmr.msra.gmra.mrb[100].mxu1 %v5678_v16 }
 0xa9c   :  { %7208 = vmatpush3.bf16.msra.mxu0 %v7683_v10 }
 0xa9d   :  { %7095 = vst [vmem:[%s11055_s11 + $0x18] sm:$0xff] %v5684_v7  ;;  %7209 = vmatprep.subr.bf16.mxu0 %v7684_v50 }
 0xaa0   :  { %7210 = vmatpush3.bf16.msra.mxu0 %v7685_v15 }
 0xaa1   :  { %7211 = vmatprep.subr.bf16.mxu0 %v7686_v49 }
 0xaa4   :  { %7212 = vmatpush3.bf16.msra.mxu0 %v7687_v11 }
 0xaa5   :  { %7213 = vmatprep.subr.bf16.mxu0 %v7688_v57 }
 0xaa8   :  { %7214 = vmatpush3.bf16.msra.mxu0 %v7689_v14 }
 0xaa9   :  { %7215 = vmatprep.subr.bf16.mxu0 %v7690_v45 }
 0xaac   :  { %7216 = vmatpush3.bf16.msra.mxu0 %v7691_v6 }
 0xaad   :  { %7217 = vmatprep.subr.bf16.mxu0 %v7692_v26 }
 0xab0   :  { %7218 = vmatpush3.bf16.msra.mxu0 %v7693_v46 }
 0xab1   :  { %7219 = vmatprep.subr.bf16.mxu0 %v7694_v30 }
 0xab4   :  { %7220 = vmatpush3.bf16.msra.mxu0 %v7695_v28 }
 0xab5   :  { %7221 = vmatprep.subr.bf16.mxu0 %v7696_v23 }
 0xab8   :  { %7222 = vmatpush3.bf16.msra.mxu0 %v7697_v25 }
 0xb4e   :  { %v5912_v59 = vpop.f32.mrb[96].mxu0  ;;  %v5953_v9 = vpop.f32.mrb[96].mxu1 }
 0xb4f   :  { %v6238_v51 = vadd.f32 %v5912_v59, %v11326_v8  ;;  %v6240_v1 = vadd.f32 %v5953_v9, %v11327_v47  ;;  %v5914_v55 = vpop.f32.mrb[97].mxu0  ;;  %v5955_v33 = vpop.f32.mrb[97].mxu1 }
 0xb50   :  { %v6239_v60 = vadd.f32 %v5914_v55, %v11328_v0  ;;  %v6241_v32 = vadd.f32 %v5955_v33, %v11329_v48  ;;  %v5916_v61 = vpop.f32.mrb[98].mxu0  ;;  %v5957_v34 = vpop.f32.mrb[98].mxu1 }
 0xb51   :  { %v7160_v35 = vmul.f32 -1.442695, %v6238_v51  ;;  %v5917_v36 = vpop.f32.mrb[99].mxu0  ;;  %v5958_v31 = vpop.f32.mrb[99].mxu1 }
 0xb52   :  { %v7161_v13 = vmul.f32 -1.442695, %v6239_v60  ;;  %v7162_v18 = vmul.f32 -1.442695, %v6241_v32 }
 0xb53   :  { %7954 = vpow2.f32 %v7160_v35 }
 0xb54   :  { %7956 = vpow2.f32 %v7161_v13 }
 0xb55   :  { %7958 = vpow2.f32 %v7162_v18 }
 0xb56   :  { %7960 = vtanh.f32 %v6240_v1 }
 0xb5d   :  { %v7955_v52 = vpop.eup %7954 }
 0xb5e   :  { %v7957_v39 = vpop.eup %7956  ;;  %v6253_v43 = vadd.f32 1.0, %v7955_v52 }
 0xb5f   :  { %v6259_v19 = vadd.f32 1.0, %v7957_v39  ;;  %v7959_v21 = vpop.eup %7958 }
 0xb60   :  { %7962 = vrcp.f32 %v6253_v43  ;;  %v7961_v62 = vpop.eup %7960  ;;  %v6266_v3 = vadd.f32 1.0, %v7959_v21 }
 0xb61   :  { %7964 = vrcp.f32 %v6259_v19 }
 0xb62   :  { %7966 = vrcp.f32 %v6266_v3 }
 0xb6a   :  { %v7963_v24 = vpop.eup %7962 }
 0xb6b   :  { %v7965_v53 = vpop.eup %7964  ;;  %v6270_v12 = vmul.f32 %v7963_v24, %v7961_v62 }
 0xb6c   :  { %v6269_v27 = vmul.f32 %v7965_v53, %v10890_v17  ;;  %v7967_v11 = vpop.eup %7966 }
 0xb6e   :  { %v6186_v22 = vpop.f32.mrb[100].mxu0  ;;  %v6227_v54 = vpop.f32.mrb[100].mxu1  ;;  %v6271_v44 = vadd.f32 %v6270_v12, %v6269_v27 }
 0xb6f   :  { %v6246_v29 = vadd.f32 %v6186_v22, %v11330_v5  ;;  %v6248_v38 = vadd.f32 %v6227_v54, %v11331_v37  ;;  %v6188_v63 = vpop.f32.mrb[101].mxu0  ;;  %v6229_v40 = vpop.f32.mrb[101].mxu1 }
 0xb70   :  { %v6247_v42 = vadd.f32 %v6188_v63, %v11332_v41  ;;  %v6249_v58 = vadd.f32 %v6229_v40, %v11333_v4  ;;  %v6190_v16 = vpop.f32.mrb[102].mxu0  ;;  %v6231_v56 = vpop.f32.mrb[102].mxu1  ;;  %7968 = vtanh.f32 %v6271_v44  ;;  %v6300_v20 = vsel %vm1891_vm10, %v6271_v44, %v10890_v17 }
 0xb71   :  { %v7163_v10 = vmul.f32 -1.442695, %v6246_v29  ;;  %v6191_v50 = vpop.f32.mrb[103].mxu0  ;;  %v6232_v15 = vpop.f32.mrb[103].mxu1  ;;  %v6308_v32 = vpack.c.bf16 %v6300_v20, %v6300_v20 }
 0xb72   :  { %v7164_v49 = vmul.f32 -1.442695, %v6247_v42  ;;  %v7165_v14 = vmul.f32 -1.442695, %v6249_v58 }
 0xb73   :  { %7970 = vpow2.f32 %v7163_v10 }
 0xb74   :  { %7972 = vpow2.f32 %v7164_v49 }
 0xb75   :  { %7974 = vpow2.f32 %v7165_v14 }
 0xb76   :  { %7976 = vtanh.f32 %v6248_v38 }
 0xb7a   :  { %v7969_v57 = vpop.eup %7968 }
 0xb7b   :  { %v6273_v45 = vmul.f32 %v7969_v57, %v7967_v11 }
 0xb7d   :  { %v7971_v6 = vpop.eup %7970  ;;  %v6274_v26 = vpack.c.bf16 %v6273_v45, %v6273_v45 }
 0xb7e   :  { %v7973_v46 = vpop.eup %7972  ;;  %v6278_v30 = vadd.f32 1.0, %v7971_v6 }
 0xb7f   :  { %v6284_v28 = vadd.f32 1.0, %v7973_v46  ;;  %v6302_v17 = vsel %vm9246_vm11, %v6274_v26, 0  ;;  %v7975_v59 = vpop.eup %7974 }
 0xb80   :  { %7978 = vrcp.f32 %v6278_v30  ;;  %v6303_v25 = vunpack.c.l.bf16 %v6302_v17  ;;  %v7977_v9 = vpop.eup %7976  ;;  %v6291_v47 = vadd.f32 1.0, %v7975_v59 }
 0xb81   :  { %7980 = vrcp.f32 %v6284_v28 }
 0xb82   :  { %7166 = vst [vmem:[%s11055_s11 + $0x70] sm:$0xff] %v6303_v25  ;;  %7982 = vrcp.f32 %v6291_v47 }
 0xb8a   :  { %v7979_v8 = vpop.eup %7978 }
 0xb8b   :  { %v7981_v51 = vpop.eup %7980  ;;  %v6295_v1 = vmul.f32 %v7979_v8, %v7977_v9 }
 0xb8c   :  { %v6294_v55 = vmul.f32 %v7981_v51, %v10922_v2  ;;  %v7983_v61 = vpop.eup %7982 }
 0xb8e   :  { %v6296_v33 = vadd.f32 %v6295_v1, %v6294_v55 }
 0xb90   :  { %7984 = vtanh.f32 %v6296_v33  ;;  %v6301_v60 = vsel %vm1883_vm8, %v6296_v33, %v10922_v2 }
 0xb91   :  { %v6309_v48 = vpack.c.bf16 %v6301_v60, %v6301_v60 }
 0xb93   :  { %6470 = vmatprep.mubr.bf16.mxu0 %v6309_v48 }
 0xb94   :  { %6471 = vmatmul.mubr.bf16.vlgmr.msra.gmra.mrb[104].mxu0 %v6308_v32 }
 0xb9a   :  { %v7985_v34 = vpop.eup %7984 }
 0xb9b   :  { %v6298_v35 = vmul.f32 %v7985_v34, %v7983_v61 }
 0xb9d   :  { %v6299_v36 = vpack.c.bf16 %v6298_v35, %v6298_v35 }
 0xb9f   :  { %v6305_v13 = vsel %vm9191_vm9, %v6299_v36, 0 }
 0xba0   :  { %v6306_v18 = vunpack.c.l.bf16 %v6305_v13 }
 0xba2   :  { %6307 = vst [vmem:[%s11055_s11 + $0x8] sm:$0xff] %v6306_v18 }
 0xc67   :  { %v7223_v52 = vpop.f32.mrb[104].mxu0 }
 0xc68   :  { %v7224_v2 = vpop.f32.mrb[105].mxu0 }
 0xc69   :  { %v7225_v39 = vadd.f32 %v7224_v2, %v7223_v52  ;;  %v7226_v43 = vpop.f32.mrb[106].mxu0 }
 0xc6a   :  { %v7227_v19 = vpop.f32.mrb[107].mxu0 }
 0xc6b   :  { %7986 = vtanh.f32 %v7225_v39  ;;  %6478 = vst [vmem:[#allocation3] sm:$0xff] %v7225_v39 }
 0xc6c   :  { %7999 = shalt.err (!%p7996_p4)
}
 0xc6d   :  { %s8000_s11 = scalar_lea.hbm %s11056_s12, 128 }
 0xc6e   :  { %p8001_p5 = scmp.ne.s32.totalorder %s11056_s12, %s8000_s11  ;;  %p8004_p6 = scmp.lt.u32.totalorder %s8000_s11, %s11056_s12 }
 0xc70   :  { %p8006_p7 = pnand %p8004_p6, %p8001_p5 }
 0xc72   :  { %8009 = shalt.err (!%p8006_p7)
}
 0xc73   :  { %6492 = dma.vmem_to_hbm [thread:$0]  %s6490_s25, 128, %s11056_s12, [#allocation4]  }
 0xc74   :  { %s8038_s15 = smov [#allocation5]  }
 0xc75   :  { %s6499_s2 = sshll.u32 %s8038_s15, 4  ;;  %v7987_v21 = vpop.eup %7986  ;;  %s6500_s2 = int_to_ptr.vmem [resolvable:$true] %s6499_s2 }
 0xc76   :  { %6480 = vst [vmem:[#allocation5] sm:$0xff] %v7987_v21  ;;  %s8010_s8 = scalar_lea.vmem %s6500_s2, 128  ;;  %p8015_p9 = scmp.lt.s32.totalorder %s6500_s2, %s6500_s2 }
 0xc77   :  { %p8011_p8 = scmp.ne.s32.totalorder %s6500_s2, %s8010_s8  ;;  %p8016_p10 = scmp.lt.s32.totalorder %s8010_s8, %s8010_s8 }
 0xc79   :  { %p8017_p11 = por %p8016_p10, %p8015_p9 }
 0xc7b   :  { %p8018_p12 = pnand %p8017_p11, %p8011_p8 }
 0xc7d   :  { %8021 = shalt.err (!%p8018_p12)
}
 0xc7e   :  { %s8022_s17 = scalar_lea.hbm %s11057_s13, 128 }
 0xc7f   :  { %p8023_p13 = scmp.ne.s32.totalorder %s11057_s13, %s8022_s17  ;;  %p8026_p0 = scmp.lt.u32.totalorder %s8022_s17, %s11057_s13 }
 0xc81   :  { %p8028_p1 = pnand %p8026_p0, %p8023_p13 }
 0xc83   :  { %8031 = shalt.err (!%p8028_p1)
}
 0xc84   :  { %6502 = dma.vmem_to_hbm [thread:$0]  %s6500_s2, 128, %s11057_s13, [#allocation6]  }
 0xc85   :  { %8032 = dma.done.wait [#allocation4], 128  }
 0xc86   :  { %8033 = vsyncadd [#allocation4], 4294967168 }
 0xc87   :  { %8034 = dma.done.wait [#allocation6], 128  }
 0xc88   :  { %8035 = vsyncadd [#allocation6], 4294967168 }
 0xc89   :  { %6511 = vsyncpa [#allocation4], 1 }
 0xc8a   :  { %6512 = vsyncpa [#allocation6], 1 }

</bundles_post_ra>
